<compile_context>
chip_gen: v7x
topology: tpu7x:2x2x1
jax: 0.10.0
libtpu: 0.0.40
codegen_flags: <defaults>
</compile_context>

<pallas_src>
import math
import functools

import jax
import jax.numpy as jnp
from jax import lax
from jax.experimental import pallas as pl
from jax.experimental.pallas import tpu as pltpu


# ---------------------------------------------------------------------------
# The single fused kernel: embedding (l==0) + encoder stack + last-token out.
# ---------------------------------------------------------------------------
def stack_kernel(x_ref, ew1_ref, ew23_ref, eb_ref, pe_ref,
                 wproj_ref, vec_ref, w1_ref, b1_ref, w2_ref,
                 o_ref, h_ref, *, num_heads, num_layers, eps):
    l = pl.program_id(1)          # layer index      (arbitrary axis)
    b = pl.program_id(2)          # batch-in-chunk   (arbitrary axis)

    S = h_ref.shape[1]
    D = h_ref.shape[2]
    H = num_heads
    hd = D // H

    # --- layer 0: fused embedding MLP (Lin->ReLU->Lin->ReLU->Lin) + PE ---
    @pl.when(l == 0)
    def _():
        xr = x_ref[b].astype(jnp.bfloat16)                              # (S, Din)
        h = jnp.dot(xr, ew1_ref[...],
                    preferred_element_type=jnp.float32) + eb_ref[0:1, :]
        h = jnp.maximum(h, 0.0)
        h = jnp.dot(h.astype(jnp.bfloat16), ew23_ref[0],
                    preferred_element_type=jnp.float32) + eb_ref[1:2, :]
        h = jnp.maximum(h, 0.0)
        h = jnp.dot(h.astype(jnp.bfloat16), ew23_ref[1],
                    preferred_element_type=jnp.float32) + eb_ref[2:3, :]
        # sqrt(D) scale pre-folded into ew23[1]/eb[2].
        # TODO(synk): dropout(p=0.1) after positional encoding is identity (eval).
        h_ref[b] = h + pe_ref[...]

    x = h_ref[b]                                                        # (S, D) f32
    xb = x.astype(jnp.bfloat16)

    # K / V projections are needed by every query row -> compute once per layer.
    k = jnp.dot(xb, wproj_ref[1],
                preferred_element_type=jnp.float32) + vec_ref[1:2, :]
    v = jnp.dot(xb, wproj_ref[2],
                preferred_element_type=jnp.float32) + vec_ref[2:3, :]
    kh = k.reshape(S, H, hd).transpose(1, 0, 2).astype(jnp.bfloat16)    # (H, S, hd)
    vh = v.reshape(S, H, hd).transpose(1, 0, 2).astype(jnp.bfloat16)    # (H, S, hd)

    def layer_norm(y, w, b_):
        mu = jnp.mean(y, axis=-1, keepdims=True)
        var = jnp.mean(jnp.square(y - mu), axis=-1, keepdims=True)
        return (y - mu) * lax.rsqrt(var + eps) * w + b_

    def layer_tail(xq):
        """Causal attention + FFN for query rows `xq` (Sq, D); keys/values cover all S."""
        Sq = xq.shape[0]
        # 1/sqrt(hd) is folded into Wq / bq at init time.
        q = jnp.dot(xq.astype(jnp.bfloat16), wproj_ref[0],
                    preferred_element_type=jnp.float32) + vec_ref[0:1, :]
        qh = q.reshape(Sq, H, hd).transpose(1, 0, 2).astype(jnp.bfloat16)   # (H, Sq, hd)
        s = jnp.einsum('hqd,hkd->hqk', qh, kh,
                       preferred_element_type=jnp.float32)                  # (H, Sq, S)
        if Sq > 1:   # causal mask; a lone last row attends to everything anyway
            row = lax.broadcasted_iota(jnp.int32, (Sq, S), 0) + (S - Sq)
            col = lax.broadcasted_iota(jnp.int32, (Sq, S), 1)
            s = jnp.where((col <= row)[None, :, :], s, jnp.float32(-1e30))
        m = jnp.max(s, axis=-1, keepdims=True)
        p = jnp.exp(s - m)
        p = p * pl.reciprocal(jnp.sum(p, axis=-1, keepdims=True), approx=True)
        attn = jnp.einsum('hqk,hkd->hqd', p.astype(jnp.bfloat16), vh,
                          preferred_element_type=jnp.float32)                # (H, Sq, hd)
        attn = attn.transpose(1, 0, 2).reshape(Sq, D)
        attn = jnp.dot(attn.astype(jnp.bfloat16), wproj_ref[3],
                       preferred_element_type=jnp.float32) + vec_ref[3:4, :]
        # residual + LayerNorm1 (dropout = identity), f32
        src = layer_norm(xq + attn, vec_ref[4:5, :], vec_ref[5:6, :])
        # feed-forward: Linear -> ReLU -> Linear
        ff = jnp.dot(src.astype(jnp.bfloat16), w1_ref[...],
                     preferred_element_type=jnp.float32) + b1_ref[...]
        ff = jnp.maximum(ff, 0.0)
        ff = jnp.dot(ff.astype(jnp.bfloat16), w2_ref[...],
                     preferred_element_type=jnp.float32) + vec_ref[6:7, :]
        # residual + LayerNorm2
        return layer_norm(src + ff, vec_ref[7:8, :], vec_ref[8:9, :])

    # Non-final layers: full sequence, activation stays in VMEM scratch.
    @pl.when(l < num_layers - 1)
    def _():
        h_ref[b] = layer_tail(x)

    # Final layer: only the trailing (sublane-aligned) query tile is computed,
    # and only the last token is written back to HBM.
    @pl.when(l == num_layers - 1)
    def _():
        sq = min(S, 8)
        src = layer_tail(x[S - sq:S, :])
        o_ref[b] = src[sq - 1:sq, :]


# ---------------------------------------------------------------------------
# Wrapper: one pallas_call for the whole forward pass.
# ---------------------------------------------------------------------------
def transformer_forward(t, x, params, num_heads):
    # `t` is accepted but unused — same as the PyTorch forward signature.
    del t
    B, S, Din = x.shape
    D = params["emb_w23"].shape[-1]
    L = params["wproj"].shape[0]
    ff = params["w1"].shape[-1]

    NB = 2 if (B >= 2 and B % 2 == 0) else 1   # leading "parallel" axis (megacore)
    bb = B // NB

    pe_s = params["pe"][:S]                    # (S, D) slice of the PE buffer

    kern = functools.partial(stack_kernel, num_heads=num_heads,
                             num_layers=L, eps=1e-5)

    in_specs = [
        pl.BlockSpec((bb, S, Din), lambda nb, l, b: (nb, 0, 0)),   # raw input
        pl.BlockSpec((Din, D), lambda nb, l, b: (0, 0)),           # emb_w1 (resident)
        pl.BlockSpec((2, D, D), lambda nb, l, b: (0, 0, 0)),       # emb_w2|w3
        pl.BlockSpec((3, D), lambda nb, l, b: (0, 0)),             # emb biases
        pl.BlockSpec((S, D), lambda nb, l, b: (0, 0)),             # pe[:S]
        pl.BlockSpec((None, 4, D, D), lambda nb, l, b: (l, 0, 0, 0)),  # Wq|Wk|Wv|Wo
        pl.BlockSpec((None, 16, D), lambda nb, l, b: (l, 0, 0)),   # packed vectors
        pl.BlockSpec((None, D, ff), lambda nb, l, b: (l, 0, 0)),   # FFN w1
        pl.BlockSpec((None, 1, ff), lambda nb, l, b: (l, 0, 0)),   # FFN b1
        pl.BlockSpec((None, ff, D), lambda nb, l, b: (l, 0, 0)),   # FFN w2
    ]

    out = pl.pallas_call(
        kern,
        grid=(NB, L, bb),
        in_specs=in_specs,
        out_specs=pl.BlockSpec((bb, 1, D), lambda nb, l, b: (nb, 0, 0)),
        out_shape=jax.ShapeDtypeStruct((B, 1, D), jnp.float32),
        scratch_shapes=[pltpu.VMEM((bb, S, D), jnp.float32)],
        compiler_params=pltpu.CompilerParams(
            dimension_semantics=("parallel", "arbitrary", "arbitrary"),
            vmem_limit_bytes=32 * 1024 * 1024),
    )(x, params["emb_w1"], params["emb_w23"], params["emb_b"], pe_s,
      params["wproj"], params["vec"], params["w1"], params["b1"], params["w2"])

    return out[:, 0, :]                                            # (B, D)


# ---------------------------------------------------------------------------
# Deterministic parameter construction.
#   * matmul weights stored bf16, biases / LN / PE f32
#   * weights pre-transposed to (in, out); Wq|Wk|Wv|Wo stacked as (L,4,D,D)
#   * 1/sqrt(hd) folded into Wq/bq; sqrt(D) folded into emb_w3/emb_b3
#   * small per-layer vectors packed into one (L,16,D) array:
#       rows: 0 bq, 1 bk, 2 bv, 3 bo, 4 ln1_w, 5 ln1_b, 6 b2, 7 ln2_w, 8 ln2_b
# ---------------------------------------------------------------------------
def init_params(key, input_dim, hidden_dim, num_layers, num_heads,
                ff_dim=2048, max_len=5000):
    D, H = hidden_dim, num_heads
    hd = D // H
    keys = iter(jax.random.split(key, 3 + num_layers * 6))

    def lin(k_, fan_in, fan_out):
        bound = 1.0 / math.sqrt(fan_in)
        w = jax.random.uniform(k_, (fan_in, fan_out), jnp.float32, -bound, bound)
        b = jax.random.uniform(jax.random.fold_in(k_, 1), (fan_out,),
                               jnp.float32, -bound, bound)
        return w, b

    params = {}

    # Embedding MLP (sqrt(D) output scale folded into the last layer).
    ew1, eb1 = lin(next(keys), input_dim, D)
    ew2, eb2 = lin(next(keys), D, D)
    ew3, eb3 = lin(next(keys), D, D)
    scale = math.sqrt(D)
    ew3, eb3 = ew3 * scale, eb3 * scale
    params["emb_w1"] = ew1.astype(jnp.bfloat16)
    params["emb_w23"] = jnp.stack([ew2, ew3]).astype(jnp.bfloat16)     # (2, D, D)
    params["emb_b"] = jnp.stack([eb1, eb2, eb3])                       # (3, D) f32

    # Positional-encoding buffer (same construction as the PyTorch module).
    position = jnp.arange(max_len, dtype=jnp.float32)[:, None]
    div_term = jnp.exp(jnp.arange(0, D, 2, dtype=jnp.float32)
                       * (-math.log(10000.0) / D))
    ang = position * div_term
    pe = jnp.zeros((max_len, D), jnp.float32)
    pe = pe.at[:, 0::2].set(jnp.sin(ang))
    pe = pe.at[:, 1::2].set(jnp.cos(ang))
    params["pe"] = pe

    inv_sqrt_hd = 1.0 / math.sqrt(hd)
    wproj_l, vec_l, w1_l, b1_l, w2_l = [], [], [], [], []
    for _ in range(num_layers):
        wq, bq = lin(next(keys), D, D)
        wk, bk = lin(next(keys), D, D)
        wv, bv = lin(next(keys), D, D)
        wo, bo = lin(next(keys), D, D)
        w1, b1 = lin(next(keys), D, ff_dim)
        w2, b2 = lin(next(keys), ff_dim, D)
        wq, bq = wq * inv_sqrt_hd, bq * inv_sqrt_hd        # fold q-scale in
        wproj_l.append(jnp.stack([wq, wk, wv, wo]).astype(jnp.bfloat16))  # (4,D,D)
        vec = jnp.zeros((16, D), jnp.float32)
        vec = vec.at[0].set(bq).at[1].set(bk).at[2].set(bv).at[3].set(bo)
        vec = vec.at[4].set(1.0).at[5].set(0.0)            # ln1 weight / bias
        vec = vec.at[6].set(b2)
        vec = vec.at[7].set(1.0).at[8].set(0.0)            # ln2 weight / bias
        vec_l.append(vec)
        w1_l.append(w1.astype(jnp.bfloat16))
        b1_l.append(b1[None, :])
        w2_l.append(w2.astype(jnp.bfloat16))

    params["wproj"] = jnp.stack(wproj_l)     # (L, 4, D, D) bf16
    params["vec"] = jnp.stack(vec_l)         # (L, 16, D)   f32
    params["w1"] = jnp.stack(w1_l)           # (L, D, ff)   bf16
    params["b1"] = jnp.stack(b1_l)           # (L, 1, ff)   f32
    params["w2"] = jnp.stack(w2_l)           # (L, ff, D)   bf16
    return params


if __name__ == "__main__":
    # Small shapes consistent with the module's forward.
    B, S = 2, 8
    input_dim, hidden_dim, num_layers, num_heads = 4, 32, 2, 4

    key = jax.random.PRNGKey(0)
    kp, kx, kt = jax.random.split(key, 3)
    params = init_params(kp, input_dim, hidden_dim, num_layers, num_heads)

    x = jax.random.normal(kx, (B, S, input_dim), jnp.float32)
    t = jax.random.normal(kt, (B,), jnp.float32)   # unused, as in the PyTorch forward

    out = transformer_forward(t, x, params, num_heads)
    out = jax.block_until_ready(out)
    assert out.shape == (B, hidden_dim)
    assert bool(jnp.all(jnp.isfinite(out)))
    print("KERNEL_OK")
</pallas_src>

<mosaic_0001>
module attributes {stable_mosaic.version = 11 : i64} {
  func.func @stack_kernel(%arg0: i32, %arg1: i32, %arg2: i32, %arg3: memref<1x8x4xf32, #tpu.memory_space<vmem>>, %arg4: memref<4x32xbf16, #tpu.memory_space<vmem>>, %arg5: memref<2x32x32xbf16, #tpu.memory_space<vmem>>, %arg6: memref<3x32xf32, #tpu.memory_space<vmem>>, %arg7: memref<8x32xf32, #tpu.memory_space<vmem>>, %arg8: memref<1x4x32x32xbf16, #tpu.memory_space<vmem>>, %arg9: memref<1x16x32xf32, #tpu.memory_space<vmem>>, %arg10: memref<1x32x2048xbf16, #tpu.memory_space<vmem>>, %arg11: memref<1x1x2048xf32, #tpu.memory_space<vmem>>, %arg12: memref<1x2048x32xbf16, #tpu.memory_space<vmem>>, %arg13: memref<1x1x32xf32, #tpu.memory_space<vmem>>, %arg14: memref<1x8x32xf32, #tpu.memory_space<vmem>>) attributes {dimension_semantics = [#tpu.dimension_semantics<parallel>, #tpu.dimension_semantics<arbitrary>, #tpu.dimension_semantics<arbitrary>], iteration_bounds = array<i64: 2, 2, 1>, scalar_prefetch = 0 : i64, scratch_operands = 1 : i64, tpu.core_type = #tpu.core_type<tc>, window_params = [{transform_indices = @transform_0, window_bounds = array<i64: 1, 8, 4>}, {pipeline_mode = #tpu.pipeline_mode<synchronous>, transform_indices = @transform_1, window_bounds = array<i64: 4, 32>}, {pipeline_mode = #tpu.pipeline_mode<synchronous>, transform_indices = @transform_2, window_bounds = array<i64: 2, 32, 32>}, {pipeline_mode = #tpu.pipeline_mode<synchronous>, transform_indices = @transform_3, window_bounds = array<i64: 3, 32>}, {pipeline_mode = #tpu.pipeline_mode<synchronous>, transform_indices = @transform_4, window_bounds = array<i64: 8, 32>}, {transform_indices = @transform_5, window_bounds = array<i64: 1, 4, 32, 32>}, {transform_indices = @transform_6, window_bounds = array<i64: 1, 16, 32>}, {transform_indices = @transform_7, window_bounds = array<i64: 1, 32, 2048>}, {transform_indices = @transform_8, window_bounds = array<i64: 1, 1, 2048>}, {transform_indices = @transform_9, window_bounds = array<i64: 1, 2048, 32>}, {transform_indices = @transform_10, window_bounds = array<i64: 1, 1, 32>}]} {
    %c0_i32 = arith.constant 0 : i32
    %0 = arith.cmpi eq, %arg1, %c0_i32 : i32
    %1 = arith.extui %0 : i1 to i32
    %c0_i32_0 = arith.constant 0 : i32
    %2 = arith.cmpi ne, %1, %c0_i32_0 : i32
    scf.if %2 {
      %33 = arith.index_cast %arg2 : i32 to index
      %c0_18 = arith.constant 0 : index
      %c0_19 = arith.constant 0 : index
      %34 = vector.load %arg3[%33, %c0_18, %c0_19] : memref<1x8x4xf32, #tpu.memory_space<vmem>>, vector<1x8x4xf32>
      %35 = vector.shape_cast %34 : vector<1x8x4xf32> to vector<8x4xf32>
      %36 = arith.truncf %35 : vector<8x4xf32> to vector<8x4xbf16>
      %c0_20 = arith.constant 0 : index
      %c0_21 = arith.constant 0 : index
      %37 = vector.load %arg4[%c0_20, %c0_21] : memref<4x32xbf16, #tpu.memory_space<vmem>>, vector<4x32xbf16>
      %cst_22 = arith.constant dense<0.000000e+00> : vector<8x32xf32>
      %38 = tpu.matmul %36, %37, %cst_22 {dimension_numbers = #tpu.dot_dimension_numbers<[1], [0], [0], [1], [0, 0, 1, 1], [], []>} : vector<8x4xbf16>, vector<4x32xbf16>, vector<8x32xf32> -> vector<8x32xf32>
      %c0_23 = arith.constant 0 : index
      %c0_24 = arith.constant 0 : index
      %39 = vector.load %arg6[%c0_23, %c0_24] : memref<3x32xf32, #tpu.memory_space<vmem>>, vector<1x32xf32>
      %40 = vector.broadcast %39 : vector<1x32xf32> to vector<8x32xf32>
      %41 = arith.addf %38, %40 : vector<8x32xf32>
      %cst_25 = arith.constant 0.000000e+00 : f32
      %42 = vector.broadcast %cst_25 : f32 to vector<8x32xf32>
      %43 = arith.maximumf %41, %42 : vector<8x32xf32>
      %44 = arith.truncf %43 : vector<8x32xf32> to vector<8x32xbf16>
      %c0_26 = arith.constant 0 : index
      %c0_27 = arith.constant 0 : index
      %c0_28 = arith.constant 0 : index
      %45 = vector.load %arg5[%c0_26, %c0_27, %c0_28] : memref<2x32x32xbf16, #tpu.memory_space<vmem>>, vector<1x32x32xbf16>
      %46 = vector.shape_cast %45 : vector<1x32x32xbf16> to vector<32x32xbf16>
      %cst_29 = arith.constant dense<0.000000e+00> : vector<8x32xf32>
      %47 = tpu.matmul %44, %46, %cst_29 {dimension_numbers = #tpu.dot_dimension_numbers<[1], [0], [0], [1], [0, 0, 1, 1], [], []>} : vector<8x32xbf16>, vector<32x32xbf16>, vector<8x32xf32> -> vector<8x32xf32>
      %c1_30 = arith.constant 1 : index
      %c0_31 = arith.constant 0 : index
      %48 = vector.load %arg6[%c1_30, %c0_31] : memref<3x32xf32, #tpu.memory_space<vmem>>, vector<1x32xf32>
      %49 = vector.broadcast %48 : vector<1x32xf32> to vector<8x32xf32>
      %50 = arith.addf %47, %49 : vector<8x32xf32>
      %cst_32 = arith.constant 0.000000e+00 : f32
      %51 = vector.broadcast %cst_32 : f32 to vector<8x32xf32>
      %52 = arith.maximumf %50, %51 : vector<8x32xf32>
      %53 = arith.truncf %52 : vector<8x32xf32> to vector<8x32xbf16>
      %c1_33 = arith.constant 1 : index
      %c0_34 = arith.constant 0 : index
      %c0_35 = arith.constant 0 : index
      %54 = vector.load %arg5[%c1_33, %c0_34, %c0_35] : memref<2x32x32xbf16, #tpu.memory_space<vmem>>, vector<1x32x32xbf16>
      %55 = vector.shape_cast %54 : vector<1x32x32xbf16> to vector<32x32xbf16>
      %cst_36 = arith.constant dense<0.000000e+00> : vector<8x32xf32>
      %56 = tpu.matmul %53, %55, %cst_36 {dimension_numbers = #tpu.dot_dimension_numbers<[1], [0], [0], [1], [0, 0, 1, 1], [], []>} : vector<8x32xbf16>, vector<32x32xbf16>, vector<8x32xf32> -> vector<8x32xf32>
      %c2_37 = arith.constant 2 : index
      %c0_38 = arith.constant 0 : index
      %57 = vector.load %arg6[%c2_37, %c0_38] : memref<3x32xf32, #tpu.memory_space<vmem>>, vector<1x32xf32>
      %58 = vector.broadcast %57 : vector<1x32xf32> to vector<8x32xf32>
      %59 = arith.addf %56, %58 : vector<8x32xf32>
      %c0_39 = arith.constant 0 : index
      %c0_40 = arith.constant 0 : index
      %60 = vector.load %arg7[%c0_39, %c0_40] : memref<8x32xf32, #tpu.memory_space<vmem>>, vector<8x32xf32>
      %61 = arith.addf %59, %60 : vector<8x32xf32>
      %62 = arith.index_cast %arg2 : i32 to index
      %c0_41 = arith.constant 0 : index
      %c0_42 = arith.constant 0 : index
      %63 = vector.load %arg14[%62, %c0_41, %c0_42] : memref<1x8x32xf32, #tpu.memory_space<vmem>>, vector<1x8x32xf32>
      %64 = vector.shape_cast %63 : vector<1x8x32xf32> to vector<8x32xf32>
      %65 = vector.shape_cast %61 : vector<8x32xf32> to vector<1x8x32xf32>
      tpu.vector_store %arg14[%62, %c0_41, %c0_42], %65 {strides = array<i32>} : memref<1x8x32xf32, #tpu.memory_space<vmem>>, vector<1x8x32xf32>,
    } else {
    }
    %3 = arith.index_cast %arg2 : i32 to index
    %c0 = arith.constant 0 : index
    %c0_1 = arith.constant 0 : index
    %4 = vector.load %arg14[%3, %c0, %c0_1] : memref<1x8x32xf32, #tpu.memory_space<vmem>>, vector<1x8x32xf32>
    %5 = vector.shape_cast %4 : vector<1x8x32xf32> to vector<8x32xf32>
    %6 = arith.truncf %5 : vector<8x32xf32> to vector<8x32xbf16>
    %c0_2 = arith.constant 0 : index
    %c1 = arith.constant 1 : index
    %c0_3 = arith.constant 0 : index
    %c0_4 = arith.constant 0 : index
    %7 = vector.load %arg8[%c0_2, %c1, %c0_3, %c0_4] : memref<1x4x32x32xbf16, #tpu.memory_space<vmem>>, vector<1x1x32x32xbf16>
    %8 = vector.shape_cast %7 : vector<1x1x32x32xbf16> to vector<32x32xbf16>
    %cst = arith.constant dense<0.000000e+00> : vector<8x32xf32>
    %9 = tpu.matmul %6, %8, %cst {dimension_numbers = #tpu.dot_dimension_numbers<[1], [0], [0], [1], [0, 0, 1, 1], [], []>} : vector<8x32xbf16>, vector<32x32xbf16>, vector<8x32xf32> -> vector<8x32xf32>
    %c0_5 = arith.constant 0 : index
    %c1_6 = arith.constant 1 : index
    %c0_7 = arith.constant 0 : index
    %10 = vector.load %arg9[%c0_5, %c1_6, %c0_7] : memref<1x16x32xf32, #tpu.memory_space<vmem>>, vector<1x1x32xf32>
    %11 = vector.shape_cast %10 : vector<1x1x32xf32> to vector<1x32xf32>
    %12 = vector.broadcast %11 : vector<1x32xf32> to vector<8x32xf32>
    %13 = arith.addf %9, %12 : vector<8x32xf32>
    %c0_8 = arith.constant 0 : index
    %c2 = arith.constant 2 : index
    %c0_9 = arith.constant 0 : index
    %c0_10 = arith.constant 0 : index
    %14 = vector.load %arg8[%c0_8, %c2, %c0_9, %c0_10] : memref<1x4x32x32xbf16, #tpu.memory_space<vmem>>, vector<1x1x32x32xbf16>
    %15 = vector.shape_cast %14 : vector<1x1x32x32xbf16> to vector<32x32xbf16>
    %cst_11 = arith.constant dense<0.000000e+00> : vector<8x32xf32>
    %16 = tpu.matmul %6, %15, %cst_11 {dimension_numbers = #tpu.dot_dimension_numbers<[1], [0], [0], [1], [0, 0, 1, 1], [], []>} : vector<8x32xbf16>, vector<32x32xbf16>, vector<8x32xf32> -> vector<8x32xf32>
    %c0_12 = arith.constant 0 : index
    %c2_13 = arith.constant 2 : index
    %c0_14 = arith.constant 0 : index
    %17 = vector.load %arg9[%c0_12, %c2_13, %c0_14] : memref<1x16x32xf32, #tpu.memory_space<vmem>>, vector<1x1x32xf32>
    %18 = vector.shape_cast %17 : vector<1x1x32xf32> to vector<1x32xf32>
    %19 = vector.broadcast %18 : vector<1x32xf32> to vector<8x32xf32>
    %20 = arith.addf %16, %19 : vector<8x32xf32>
    %21 = vector.shape_cast %13 : vector<8x32xf32> to vector<8x4x8xf32>
    %22 = tpu.transpose %21, [1, 0, 2] : vector<8x4x8xf32> -> vector<4x8x8xf32>
    %23 = arith.truncf %22 : vector<4x8x8xf32> to vector<4x8x8xbf16>
    %24 = vector.shape_cast %20 : vector<8x32xf32> to vector<8x4x8xf32>
    %25 = tpu.transpose %24, [1, 0, 2] : vector<8x4x8xf32> -> vector<4x8x8xf32>
    %26 = arith.truncf %25 : vector<4x8x8xf32> to vector<4x8x8xbf16>
    %c1_i32 = arith.constant 1 : i32
    %27 = arith.cmpi slt, %arg1, %c1_i32 : i32
    %28 = arith.extui %27 : i1 to i32
    %c0_i32_15 = arith.constant 0 : i32
    %29 = arith.cmpi ne, %28, %c0_i32_15 : i32
    scf.if %29 {
      %33 = arith.truncf %5 : vector<8x32xf32> to vector<8x32xbf16>
      %c0_18 = arith.constant 0 : index
      %c0_19 = arith.constant 0 : index
      %c0_20 = arith.constant 0 : index
      %c0_21 = arith.constant 0 : index
      %34 = vector.load %arg8[%c0_18, %c0_19, %c0_20, %c0_21] : memref<1x4x32x32xbf16, #tpu.memory_space<vmem>>, vector<1x1x32x32xbf16>
      %35 = vector.shape_cast %34 : vector<1x1x32x32xbf16> to vector<32x32xbf16>
      %cst_22 = arith.constant dense<0.000000e+00> : vector<8x32xf32>
      %36 = tpu.matmul %33, %35, %cst_22 {dimension_numbers = #tpu.dot_dimension_numbers<[1], [0], [0], [1], [0, 0, 1, 1], [], []>} : vector<8x32xbf16>, vector<32x32xbf16>, vector<8x32xf32> -> vector<8x32xf32>
      %c0_23 = arith.constant 0 : index
      %c0_24 = arith.constant 0 : index
      %c0_25 = arith.constant 0 : index
      %37 = vector.load %arg9[%c0_23, %c0_24, %c0_25] : memref<1x16x32xf32, #tpu.memory_space<vmem>>, vector<1x1x32xf32>
      %38 = vector.shape_cast %37 : vector<1x1x32xf32> to vector<1x32xf32>
      %39 = vector.broadcast %38 : vector<1x32xf32> to vector<8x32xf32>
      %40 = arith.addf %36, %39 : vector<8x32xf32>
      %41 = vector.shape_cast %40 : vector<8x32xf32> to vector<8x4x8xf32>
      %42 = tpu.transpose %41, [1, 0, 2] : vector<8x4x8xf32> -> vector<4x8x8xf32>
      %43 = arith.truncf %42 : vector<4x8x8xf32> to vector<4x8x8xbf16>
      "tpu.trace_start"() <{level = 10 : i32, message = "hqd,hkd->hqk"}> : () -> ()
      %cst_26 = arith.constant dense<0.000000e+00> : vector<4x8x8xf32>
      %44 = tpu.matmul %43, %23, %cst_26 {dimension_numbers = #tpu.dot_dimension_numbers<[2], [2], [1], [1], [0, 0, 0, 1, 1, 1], [0], [0]>} : vector<4x8x8xbf16>, vector<4x8x8xbf16>, vector<4x8x8xf32> -> vector<4x8x8xf32>
      "tpu.trace_stop"() : () -> ()
      %45 = tpu.iota {dimensions = array<i32: 0>} : vector<8x8xi32>
      %c0_i32_27 = arith.constant 0 : i32
      %46 = vector.broadcast %c0_i32_27 : i32 to vector<8x8xi32>
      %47 = arith.addi %45, %46 : vector<8x8xi32>
      %48 = tpu.iota {dimensions = array<i32: 1>} : vector<8x8xi32>
      %49 = arith.cmpi sle, %48, %47 : vector<8x8xi32>
      %50 = vector.shape_cast %49 : vector<8x8xi1> to vector<1x8x8xi1>
      %cst_28 = arith.constant -1.000000e+30 : f32
      %51 = vector.shape_cast %50 : vector<1x8x8xi1> to vector<1x8x8xi1>
      %52 = vector.broadcast %51 : vector<1x8x8xi1> to vector<4x8x8xi1>
      %53 = vector.broadcast %cst_28 : f32 to vector<4x8x8xf32>
      %54 = arith.select %52, %44, %53 : vector<4x8x8xi1>, vector<4x8x8xf32>
      %cst_29 = arith.constant dense<0xFF800000> : vector<4x8xf32>
      %55 = vector.multi_reduction <maximumf>, %54, %cst_29 [2] : vector<4x8x8xf32> to vector<4x8xf32>
      %56 = vector.shape_cast %55 : vector<4x8xf32> to vector<4x8x1xf32>
      %57 = vector.broadcast %56 : vector<4x8x1xf32> to vector<4x8x8xf32>
      %58 = arith.subf %54, %57 : vector<4x8x8xf32>
      %59 = math.exp %58 : vector<4x8x8xf32>
      %cst_30 = arith.constant dense<0.000000e+00> : vector<4x8xf32>
      %60 = vector.multi_reduction <add>, %59, %cst_30 [2] : vector<4x8x8xf32> to vector<4x8xf32>
      %61 = vector.shape_cast %60 : vector<4x8xf32> to vector<4x8x1xf32>
      %62 = tpu.reciprocal %61 {approx = true} : vector<4x8x1xf32> -> vector<4x8x1xf32>
      %63 = vector.broadcast %62 : vector<4x8x1xf32> to vector<4x8x8xf32>
      %64 = arith.mulf %59, %63 : vector<4x8x8xf32>
      %65 = arith.truncf %64 : vector<4x8x8xf32> to vector<4x8x8xbf16>
      "tpu.trace_start"() <{level = 10 : i32, message = "hqk,hkd->hqd"}> : () -> ()
      %cst_31 = arith.constant dense<0.000000e+00> : vector<4x8x8xf32>
      %66 = tpu.matmul %65, %26, %cst_31 {dimension_numbers = #tpu.dot_dimension_numbers<[2], [1], [1], [2], [0, 0, 0, 1, 1, 2], [0], [0]>} : vector<4x8x8xbf16>, vector<4x8x8xbf16>, vector<4x8x8xf32> -> vector<4x8x8xf32>
      "tpu.trace_stop"() : () -> ()
      %67 = tpu.transpose %66, [1, 0, 2] : vector<4x8x8xf32> -> vector<8x4x8xf32>
      %68 = vector.shape_cast %67 : vector<8x4x8xf32> to vector<8x32xf32>
      %69 = arith.truncf %68 : vector<8x32xf32> to vector<8x32xbf16>
      %c0_32 = arith.constant 0 : index
      %c3 = arith.constant 3 : index
      %c0_33 = arith.constant 0 : index
      %c0_34 = arith.constant 0 : index
      %70 = vector.load %arg8[%c0_32, %c3, %c0_33, %c0_34] : memref<1x4x32x32xbf16, #tpu.memory_space<vmem>>, vector<1x1x32x32xbf16>
      %71 = vector.shape_cast %70 : vector<1x1x32x32xbf16> to vector<32x32xbf16>
      %cst_35 = arith.constant dense<0.000000e+00> : vector<8x32xf32>
      %72 = tpu.matmul %69, %71, %cst_35 {dimension_numbers = #tpu.dot_dimension_numbers<[1], [0], [0], [1], [0, 0, 1, 1], [], []>} : vector<8x32xbf16>, vector<32x32xbf16>, vector<8x32xf32> -> vector<8x32xf32>
      %c0_36 = arith.constant 0 : index
      %c3_37 = arith.constant 3 : index
      %c0_38 = arith.constant 0 : index
      %73 = vector.load %arg9[%c0_36, %c3_37, %c0_38] : memref<1x16x32xf32, #tpu.memory_space<vmem>>, vector<1x1x32xf32>
      %74 = vector.shape_cast %73 : vector<1x1x32xf32> to vector<1x32xf32>
      %75 = vector.broadcast %74 : vector<1x32xf32> to vector<8x32xf32>
      %76 = arith.addf %72, %75 : vector<8x32xf32>
      %77 = arith.addf %5, %76 : vector<8x32xf32>
      %c0_39 = arith.constant 0 : index
      %c4 = arith.constant 4 : index
      %c0_40 = arith.constant 0 : index
      %78 = vector.load %arg9[%c0_39, %c4, %c0_40] : memref<1x16x32xf32, #tpu.memory_space<vmem>>, vector<1x1x32xf32>
      %79 = vector.shape_cast %78 : vector<1x1x32xf32> to vector<1x32xf32>
      %c0_41 = arith.constant 0 : index
      %c5 = arith.constant 5 : index
      %c0_42 = arith.constant 0 : index
      %80 = vector.load %arg9[%c0_41, %c5, %c0_42] : memref<1x16x32xf32, #tpu.memory_space<vmem>>, vector<1x1x32xf32>
      %81 = vector.shape_cast %80 : vector<1x1x32xf32> to vector<1x32xf32>
      %cst_43 = arith.constant dense<0.000000e+00> : vector<8xf32>
      %82 = vector.multi_reduction <add>, %77, %cst_43 [1] : vector<8x32xf32> to vector<8xf32>
      %83 = vector.shape_cast %82 : vector<8xf32> to vector<8x1xf32>
      %cst_44 = arith.constant 3.200000e+01 : f32
      %84 = vector.broadcast %cst_44 : f32 to vector<8x1xf32>
      %85 = arith.divf %83, %84 : vector<8x1xf32>
      %86 = vector.broadcast %85 : vector<8x1xf32> to vector<8x32xf32>
      %87 = arith.subf %77, %86 : vector<8x32xf32>
      %88 = arith.mulf %87, %87 : vector<8x32xf32>
      %cst_45 = arith.constant dense<0.000000e+00> : vector<8xf32>
      %89 = vector.multi_reduction <add>, %88, %cst_45 [1] : vector<8x32xf32> to vector<8xf32>
      %90 = vector.shape_cast %89 : vector<8xf32> to vector<8x1xf32>
      %cst_46 = arith.constant 3.200000e+01 : f32
      %91 = vector.broadcast %cst_46 : f32 to vector<8x1xf32>
      %92 = arith.divf %90, %91 : vector<8x1xf32>
      %93 = vector.broadcast %85 : vector<8x1xf32> to vector<8x32xf32>
      %94 = arith.subf %77, %93 : vector<8x32xf32>
      %cst_47 = arith.constant 9.99999974E-6 : f32
      %95 = vector.broadcast %cst_47 : f32 to vector<8x1xf32>
      %96 = arith.addf %92, %95 : vector<8x1xf32>
      %97 = math.rsqrt %96 : vector<8x1xf32>
      %98 = vector.broadcast %97 : vector<8x1xf32> to vector<8x32xf32>
      %99 = arith.mulf %94, %98 : vector<8x32xf32>
      %100 = vector.broadcast %79 : vector<1x32xf32> to vector<8x32xf32>
      %101 = arith.mulf %99, %100 : vector<8x32xf32>
      %102 = vector.broadcast %81 : vector<1x32xf32> to vector<8x32xf32>
      %103 = arith.addf %101, %102 : vector<8x32xf32>
      %104 = arith.truncf %103 : vector<8x32xf32> to vector<8x32xbf16>
      %c0_48 = arith.constant 0 : index
      %c0_49 = arith.constant 0 : index
      %c0_50 = arith.constant 0 : index
      %105 = vector.load %arg10[%c0_48, %c0_49, %c0_50] : memref<1x32x2048xbf16, #tpu.memory_space<vmem>>, vector<1x32x2048xbf16>
      %106 = vector.shape_cast %105 : vector<1x32x2048xbf16> to vector<32x2048xbf16>
      %cst_51 = arith.constant dense<0.000000e+00> : vector<8x2048xf32>
      %107 = tpu.matmul %104, %106, %cst_51 {dimension_numbers = #tpu.dot_dimension_numbers<[1], [0], [0], [1], [0, 0, 1, 1], [], []>} : vector<8x32xbf16>, vector<32x2048xbf16>, vector<8x2048xf32> -> vector<8x2048xf32>
      %c0_52 = arith.constant 0 : index
      %c0_53 = arith.constant 0 : index
      %c0_54 = arith.constant 0 : index
      %108 = vector.load %arg11[%c0_52, %c0_53, %c0_54] : memref<1x1x2048xf32, #tpu.memory_space<vmem>>, vector<1x1x2048xf32>
      %109 = vector.shape_cast %108 : vector<1x1x2048xf32> to vector<1x2048xf32>
      %110 = vector.broadcast %109 : vector<1x2048xf32> to vector<8x2048xf32>
      %111 = arith.addf %107, %110 : vector<8x2048xf32>
      %cst_55 = arith.constant 0.000000e+00 : f32
      %112 = vector.broadcast %cst_55 : f32 to vector<8x2048xf32>
      %113 = arith.maximumf %111, %112 : vector<8x2048xf32>
      %114 = arith.truncf %113 : vector<8x2048xf32> to vector<8x2048xbf16>
      %c0_56 = arith.constant 0 : index
      %c0_57 = arith.constant 0 : index
      %c0_58 = arith.constant 0 : index
      %115 = vector.load %arg12[%c0_56, %c0_57, %c0_58] : memref<1x2048x32xbf16, #tpu.memory_space<vmem>>, vector<1x2048x32xbf16>
      %116 = vector.shape_cast %115 : vector<1x2048x32xbf16> to vector<2048x32xbf16>
      %cst_59 = arith.constant dense<0.000000e+00> : vector<8x32xf32>
      %117 = tpu.matmul %114, %116, %cst_59 {dimension_numbers = #tpu.dot_dimension_numbers<[1], [0], [0], [1], [0, 0, 1, 1], [], []>} : vector<8x2048xbf16>, vector<2048x32xbf16>, vector<8x32xf32> -> vector<8x32xf32>
      %c0_60 = arith.constant 0 : index
      %c6 = arith.constant 6 : index
      %c0_61 = arith.constant 0 : index
      %118 = vector.load %arg9[%c0_60, %c6, %c0_61] : memref<1x16x32xf32, #tpu.memory_space<vmem>>, vector<1x1x32xf32>
      %119 = vector.shape_cast %118 : vector<1x1x32xf32> to vector<1x32xf32>
      %120 = vector.broadcast %119 : vector<1x32xf32> to vector<8x32xf32>
      %121 = arith.addf %117, %120 : vector<8x32xf32>
      %122 = arith.addf %103, %121 : vector<8x32xf32>
      %c0_62 = arith.constant 0 : index
      %c7 = arith.constant 7 : index
      %c0_63 = arith.constant 0 : index
      %123 = vector.load %arg9[%c0_62, %c7, %c0_63] : memref<1x16x32xf32, #tpu.memory_space<vmem>>, vector<1x1x32xf32>
      %124 = vector.shape_cast %123 : vector<1x1x32xf32> to vector<1x32xf32>
      %c0_64 = arith.constant 0 : index
      %c8 = arith.constant 8 : index
      %c0_65 = arith.constant 0 : index
      %125 = vector.load %arg9[%c0_64, %c8, %c0_65] : memref<1x16x32xf32, #tpu.memory_space<vmem>>, vector<1x1x32xf32>
      %126 = vector.shape_cast %125 : vector<1x1x32xf32> to vector<1x32xf32>
      %cst_66 = arith.constant dense<0.000000e+00> : vector<8xf32>
      %127 = vector.multi_reduction <add>, %122, %cst_66 [1] : vector<8x32xf32> to vector<8xf32>
      %128 = vector.shape_cast %127 : vector<8xf32> to vector<8x1xf32>
      %cst_67 = arith.constant 3.200000e+01 : f32
      %129 = vector.broadcast %cst_67 : f32 to vector<8x1xf32>
      %130 = arith.divf %128, %129 : vector<8x1xf32>
      %131 = vector.broadcast %130 : vector<8x1xf32> to vector<8x32xf32>
      %132 = arith.subf %122, %131 : vector<8x32xf32>
      %133 = arith.mulf %132, %132 : vector<8x32xf32>
      %cst_68 = arith.constant dense<0.000000e+00> : vector<8xf32>
      %134 = vector.multi_reduction <add>, %133, %cst_68 [1] : vector<8x32xf32> to vector<8xf32>
      %135 = vector.shape_cast %134 : vector<8xf32> to vector<8x1xf32>
      %cst_69 = arith.constant 3.200000e+01 : f32
      %136 = vector.broadcast %cst_69 : f32 to vector<8x1xf32>
      %137 = arith.divf %135, %136 : vector<8x1xf32>
      %138 = vector.broadcast %130 : vector<8x1xf32> to vector<8x32xf32>
      %139 = arith.subf %122, %138 : vector<8x32xf32>
      %cst_70 = arith.constant 9.99999974E-6 : f32
      %140 = vector.broadcast %cst_70 : f32 to vector<8x1xf32>
      %141 = arith.addf %137, %140 : vector<8x1xf32>
      %142 = math.rsqrt %141 : vector<8x1xf32>
      %143 = vector.broadcast %142 : vector<8x1xf32> to vector<8x32xf32>
      %144 = arith.mulf %139, %143 : vector<8x32xf32>
      %145 = vector.broadcast %124 : vector<1x32xf32> to vector<8x32xf32>
      %146 = arith.mulf %144, %145 : vector<8x32xf32>
      %147 = vector.broadcast %126 : vector<1x32xf32> to vector<8x32xf32>
      %148 = arith.addf %146, %147 : vector<8x32xf32>
      %149 = arith.index_cast %arg2 : i32 to index
      %c0_71 = arith.constant 0 : index
      %c0_72 = arith.constant 0 : index
      %150 = vector.load %arg14[%149, %c0_71, %c0_72] : memref<1x8x32xf32, #tpu.memory_space<vmem>>, vector<1x8x32xf32>
      %151 = vector.shape_cast %150 : vector<1x8x32xf32> to vector<8x32xf32>
      %152 = vector.shape_cast %148 : vector<8x32xf32> to vector<1x8x32xf32>
      tpu.vector_store %arg14[%149, %c0_71, %c0_72], %152 {strides = array<i32>} : memref<1x8x32xf32, #tpu.memory_space<vmem>>, vector<1x8x32xf32>,
    } else {
    }
    %c1_i32_16 = arith.constant 1 : i32
    %30 = arith.cmpi eq, %arg1, %c1_i32_16 : i32
    %31 = arith.extui %30 : i1 to i32
    %c0_i32_17 = arith.constant 0 : i32
    %32 = arith.cmpi ne, %31, %c0_i32_17 : i32
    scf.if %32 {
      %33 = arith.truncf %5 : vector<8x32xf32> to vector<8x32xbf16>
      %c0_18 = arith.constant 0 : index
      %c0_19 = arith.constant 0 : index
      %c0_20 = arith.constant 0 : index
      %c0_21 = arith.constant 0 : index
      %34 = vector.load %arg8[%c0_18, %c0_19, %c0_20, %c0_21] : memref<1x4x32x32xbf16, #tpu.memory_space<vmem>>, vector<1x1x32x32xbf16>
      %35 = vector.shape_cast %34 : vector<1x1x32x32xbf16> to vector<32x32xbf16>
      %cst_22 = arith.constant dense<0.000000e+00> : vector<8x32xf32>
      %36 = tpu.matmul %33, %35, %cst_22 {dimension_numbers = #tpu.dot_dimension_numbers<[1], [0], [0], [1], [0, 0, 1, 1], [], []>} : vector<8x32xbf16>, vector<32x32xbf16>, vector<8x32xf32> -> vector<8x32xf32>
      %c0_23 = arith.constant 0 : index
      %c0_24 = arith.constant 0 : index
      %c0_25 = arith.constant 0 : index
      %37 = vector.load %arg9[%c0_23, %c0_24, %c0_25] : memref<1x16x32xf32, #tpu.memory_space<vmem>>, vector<1x1x32xf32>
      %38 = vector.shape_cast %37 : vector<1x1x32xf32> to vector<1x32xf32>
      %39 = vector.broadcast %38 : vector<1x32xf32> to vector<8x32xf32>
      %40 = arith.addf %36, %39 : vector<8x32xf32>
      %41 = vector.shape_cast %40 : vector<8x32xf32> to vector<8x4x8xf32>
      %42 = tpu.transpose %41, [1, 0, 2] : vector<8x4x8xf32> -> vector<4x8x8xf32>
      %43 = arith.truncf %42 : vector<4x8x8xf32> to vector<4x8x8xbf16>
      "tpu.trace_start"() <{level = 10 : i32, message = "hqd,hkd->hqk"}> : () -> ()
      %cst_26 = arith.constant dense<0.000000e+00> : vector<4x8x8xf32>
      %44 = tpu.matmul %43, %23, %cst_26 {dimension_numbers = #tpu.dot_dimension_numbers<[2], [2], [1], [1], [0, 0, 0, 1, 1, 1], [0], [0]>} : vector<4x8x8xbf16>, vector<4x8x8xbf16>, vector<4x8x8xf32> -> vector<4x8x8xf32>
      "tpu.trace_stop"() : () -> ()
      %45 = tpu.iota {dimensions = array<i32: 0>} : vector<8x8xi32>
      %c0_i32_27 = arith.constant 0 : i32
      %46 = vector.broadcast %c0_i32_27 : i32 to vector<8x8xi32>
      %47 = arith.addi %45, %46 : vector<8x8xi32>
      %48 = tpu.iota {dimensions = array<i32: 1>} : vector<8x8xi32>
      %49 = arith.cmpi sle, %48, %47 : vector<8x8xi32>
      %50 = vector.shape_cast %49 : vector<8x8xi1> to vector<1x8x8xi1>
      %cst_28 = arith.constant -1.000000e+30 : f32
      %51 = vector.shape_cast %50 : vector<1x8x8xi1> to vector<1x8x8xi1>
      %52 = vector.broadcast %51 : vector<1x8x8xi1> to vector<4x8x8xi1>
      %53 = vector.broadcast %cst_28 : f32 to vector<4x8x8xf32>
      %54 = arith.select %52, %44, %53 : vector<4x8x8xi1>, vector<4x8x8xf32>
      %cst_29 = arith.constant dense<0xFF800000> : vector<4x8xf32>
      %55 = vector.multi_reduction <maximumf>, %54, %cst_29 [2] : vector<4x8x8xf32> to vector<4x8xf32>
      %56 = vector.shape_cast %55 : vector<4x8xf32> to vector<4x8x1xf32>
      %57 = vector.broadcast %56 : vector<4x8x1xf32> to vector<4x8x8xf32>
      %58 = arith.subf %54, %57 : vector<4x8x8xf32>
      %59 = math.exp %58 : vector<4x8x8xf32>
      %cst_30 = arith.constant dense<0.000000e+00> : vector<4x8xf32>
      %60 = vector.multi_reduction <add>, %59, %cst_30 [2] : vector<4x8x8xf32> to vector<4x8xf32>
      %61 = vector.shape_cast %60 : vector<4x8xf32> to vector<4x8x1xf32>
      %62 = tpu.reciprocal %61 {approx = true} : vector<4x8x1xf32> -> vector<4x8x1xf32>
      %63 = vector.broadcast %62 : vector<4x8x1xf32> to vector<4x8x8xf32>
      %64 = arith.mulf %59, %63 : vector<4x8x8xf32>
      %65 = arith.truncf %64 : vector<4x8x8xf32> to vector<4x8x8xbf16>
      "tpu.trace_start"() <{level = 10 : i32, message = "hqk,hkd->hqd"}> : () -> ()
      %cst_31 = arith.constant dense<0.000000e+00> : vector<4x8x8xf32>
      %66 = tpu.matmul %65, %26, %cst_31 {dimension_numbers = #tpu.dot_dimension_numbers<[2], [1], [1], [2], [0, 0, 0, 1, 1, 2], [0], [0]>} : vector<4x8x8xbf16>, vector<4x8x8xbf16>, vector<4x8x8xf32> -> vector<4x8x8xf32>
      "tpu.trace_stop"() : () -> ()
      %67 = tpu.transpose %66, [1, 0, 2] : vector<4x8x8xf32> -> vector<8x4x8xf32>
      %68 = vector.shape_cast %67 : vector<8x4x8xf32> to vector<8x32xf32>
      %69 = arith.truncf %68 : vector<8x32xf32> to vector<8x32xbf16>
      %c0_32 = arith.constant 0 : index
      %c3 = arith.constant 3 : index
      %c0_33 = arith.constant 0 : index
      %c0_34 = arith.constant 0 : index
      %70 = vector.load %arg8[%c0_32, %c3, %c0_33, %c0_34] : memref<1x4x32x32xbf16, #tpu.memory_space<vmem>>, vector<1x1x32x32xbf16>
      %71 = vector.shape_cast %70 : vector<1x1x32x32xbf16> to vector<32x32xbf16>
      %cst_35 = arith.constant dense<0.000000e+00> : vector<8x32xf32>
      %72 = tpu.matmul %69, %71, %cst_35 {dimension_numbers = #tpu.dot_dimension_numbers<[1], [0], [0], [1], [0, 0, 1, 1], [], []>} : vector<8x32xbf16>, vector<32x32xbf16>, vector<8x32xf32> -> vector<8x32xf32>
      %c0_36 = arith.constant 0 : index
      %c3_37 = arith.constant 3 : index
      %c0_38 = arith.constant 0 : index
      %73 = vector.load %arg9[%c0_36, %c3_37, %c0_38] : memref<1x16x32xf32, #tpu.memory_space<vmem>>, vector<1x1x32xf32>
      %74 = vector.shape_cast %73 : vector<1x1x32xf32> to vector<1x32xf32>
      %75 = vector.broadcast %74 : vector<1x32xf32> to vector<8x32xf32>
      %76 = arith.addf %72, %75 : vector<8x32xf32>
      %77 = arith.addf %5, %76 : vector<8x32xf32>
      %c0_39 = arith.constant 0 : index
      %c4 = arith.constant 4 : index
      %c0_40 = arith.constant 0 : index
      %78 = vector.load %arg9[%c0_39, %c4, %c0_40] : memref<1x16x32xf32, #tpu.memory_space<vmem>>, vector<1x1x32xf32>
      %79 = vector.shape_cast %78 : vector<1x1x32xf32> to vector<1x32xf32>
      %c0_41 = arith.constant 0 : index
      %c5 = arith.constant 5 : index
      %c0_42 = arith.constant 0 : index
      %80 = vector.load %arg9[%c0_41, %c5, %c0_42] : memref<1x16x32xf32, #tpu.memory_space<vmem>>, vector<1x1x32xf32>
      %81 = vector.shape_cast %80 : vector<1x1x32xf32> to vector<1x32xf32>
      %cst_43 = arith.constant dense<0.000000e+00> : vector<8xf32>
      %82 = vector.multi_reduction <add>, %77, %cst_43 [1] : vector<8x32xf32> to vector<8xf32>
      %83 = vector.shape_cast %82 : vector<8xf32> to vector<8x1xf32>
      %cst_44 = arith.constant 3.200000e+01 : f32
      %84 = vector.broadcast %cst_44 : f32 to vector<8x1xf32>
      %85 = arith.divf %83, %84 : vector<8x1xf32>
      %86 = vector.broadcast %85 : vector<8x1xf32> to vector<8x32xf32>
      %87 = arith.subf %77, %86 : vector<8x32xf32>
      %88 = arith.mulf %87, %87 : vector<8x32xf32>
      %cst_45 = arith.constant dense<0.000000e+00> : vector<8xf32>
      %89 = vector.multi_reduction <add>, %88, %cst_45 [1] : vector<8x32xf32> to vector<8xf32>
      %90 = vector.shape_cast %89 : vector<8xf32> to vector<8x1xf32>
      %cst_46 = arith.constant 3.200000e+01 : f32
      %91 = vector.broadcast %cst_46 : f32 to vector<8x1xf32>
      %92 = arith.divf %90, %91 : vector<8x1xf32>
      %93 = vector.broadcast %85 : vector<8x1xf32> to vector<8x32xf32>
      %94 = arith.subf %77, %93 : vector<8x32xf32>
      %cst_47 = arith.constant 9.99999974E-6 : f32
      %95 = vector.broadcast %cst_47 : f32 to vector<8x1xf32>
      %96 = arith.addf %92, %95 : vector<8x1xf32>
      %97 = math.rsqrt %96 : vector<8x1xf32>
      %98 = vector.broadcast %97 : vector<8x1xf32> to vector<8x32xf32>
      %99 = arith.mulf %94, %98 : vector<8x32xf32>
      %100 = vector.broadcast %79 : vector<1x32xf32> to vector<8x32xf32>
      %101 = arith.mulf %99, %100 : vector<8x32xf32>
      %102 = vector.broadcast %81 : vector<1x32xf32> to vector<8x32xf32>
      %103 = arith.addf %101, %102 : vector<8x32xf32>
      %104 = arith.truncf %103 : vector<8x32xf32> to vector<8x32xbf16>
      %c0_48 = arith.constant 0 : index
      %c0_49 = arith.constant 0 : index
      %c0_50 = arith.constant 0 : index
      %105 = vector.load %arg10[%c0_48, %c0_49, %c0_50] : memref<1x32x2048xbf16, #tpu.memory_space<vmem>>, vector<1x32x2048xbf16>
      %106 = vector.shape_cast %105 : vector<1x32x2048xbf16> to vector<32x2048xbf16>
      %cst_51 = arith.constant dense<0.000000e+00> : vector<8x2048xf32>
      %107 = tpu.matmul %104, %106, %cst_51 {dimension_numbers = #tpu.dot_dimension_numbers<[1], [0], [0], [1], [0, 0, 1, 1], [], []>} : vector<8x32xbf16>, vector<32x2048xbf16>, vector<8x2048xf32> -> vector<8x2048xf32>
      %c0_52 = arith.constant 0 : index
      %c0_53 = arith.constant 0 : index
      %c0_54 = arith.constant 0 : index
      %108 = vector.load %arg11[%c0_52, %c0_53, %c0_54] : memref<1x1x2048xf32, #tpu.memory_space<vmem>>, vector<1x1x2048xf32>
      %109 = vector.shape_cast %108 : vector<1x1x2048xf32> to vector<1x2048xf32>
      %110 = vector.broadcast %109 : vector<1x2048xf32> to vector<8x2048xf32>
      %111 = arith.addf %107, %110 : vector<8x2048xf32>
      %cst_55 = arith.constant 0.000000e+00 : f32
      %112 = vector.broadcast %cst_55 : f32 to vector<8x2048xf32>
      %113 = arith.maximumf %111, %112 : vector<8x2048xf32>
      %114 = arith.truncf %113 : vector<8x2048xf32> to vector<8x2048xbf16>
      %c0_56 = arith.constant 0 : index
      %c0_57 = arith.constant 0 : index
      %c0_58 = arith.constant 0 : index
      %115 = vector.load %arg12[%c0_56, %c0_57, %c0_58] : memref<1x2048x32xbf16, #tpu.memory_space<vmem>>, vector<1x2048x32xbf16>
      %116 = vector.shape_cast %115 : vector<1x2048x32xbf16> to vector<2048x32xbf16>
      %cst_59 = arith.constant dense<0.000000e+00> : vector<8x32xf32>
      %117 = tpu.matmul %114, %116, %cst_59 {dimension_numbers = #tpu.dot_dimension_numbers<[1], [0], [0], [1], [0, 0, 1, 1], [], []>} : vector<8x2048xbf16>, vector<2048x32xbf16>, vector<8x32xf32> -> vector<8x32xf32>
      %c0_60 = arith.constant 0 : index
      %c6 = arith.constant 6 : index
      %c0_61 = arith.constant 0 : index
      %118 = vector.load %arg9[%c0_60, %c6, %c0_61] : memref<1x16x32xf32, #tpu.memory_space<vmem>>, vector<1x1x32xf32>
      %119 = vector.shape_cast %118 : vector<1x1x32xf32> to vector<1x32xf32>
      %120 = vector.broadcast %119 : vector<1x32xf32> to vector<8x32xf32>
      %121 = arith.addf %117, %120 : vector<8x32xf32>
      %122 = arith.addf %103, %121 : vector<8x32xf32>
      %c0_62 = arith.constant 0 : index
      %c7 = arith.constant 7 : index
      %c0_63 = arith.constant 0 : index
      %123 = vector.load %arg9[%c0_62, %c7, %c0_63] : memref<1x16x32xf32, #tpu.memory_space<vmem>>, vector<1x1x32xf32>
      %124 = vector.shape_cast %123 : vector<1x1x32xf32> to vector<1x32xf32>
      %c0_64 = arith.constant 0 : index
      %c8 = arith.constant 8 : index
      %c0_65 = arith.constant 0 : index
      %125 = vector.load %arg9[%c0_64, %c8, %c0_65] : memref<1x16x32xf32, #tpu.memory_space<vmem>>, vector<1x1x32xf32>
      %126 = vector.shape_cast %125 : vector<1x1x32xf32> to vector<1x32xf32>
      %cst_66 = arith.constant dense<0.000000e+00> : vector<8xf32>
      %127 = vector.multi_reduction <add>, %122, %cst_66 [1] : vector<8x32xf32> to vector<8xf32>
      %128 = vector.shape_cast %127 : vector<8xf32> to vector<8x1xf32>
      %cst_67 = arith.constant 3.200000e+01 : f32
      %129 = vector.broadcast %cst_67 : f32 to vector<8x1xf32>
      %130 = arith.divf %128, %129 : vector<8x1xf32>
      %131 = vector.broadcast %130 : vector<8x1xf32> to vector<8x32xf32>
      %132 = arith.subf %122, %131 : vector<8x32xf32>
      %133 = arith.mulf %132, %132 : vector<8x32xf32>
      %cst_68 = arith.constant dense<0.000000e+00> : vector<8xf32>
      %134 = vector.multi_reduction <add>, %133, %cst_68 [1] : vector<8x32xf32> to vector<8xf32>
      %135 = vector.shape_cast %134 : vector<8xf32> to vector<8x1xf32>
      %cst_69 = arith.constant 3.200000e+01 : f32
      %136 = vector.broadcast %cst_69 : f32 to vector<8x1xf32>
      %137 = arith.divf %135, %136 : vector<8x1xf32>
      %138 = vector.broadcast %130 : vector<8x1xf32> to vector<8x32xf32>
      %139 = arith.subf %122, %138 : vector<8x32xf32>
      %cst_70 = arith.constant 9.99999974E-6 : f32
      %140 = vector.broadcast %cst_70 : f32 to vector<8x1xf32>
      %141 = arith.addf %137, %140 : vector<8x1xf32>
      %142 = math.rsqrt %141 : vector<8x1xf32>
      %143 = vector.broadcast %142 : vector<8x1xf32> to vector<8x32xf32>
      %144 = arith.mulf %139, %143 : vector<8x32xf32>
      %145 = vector.broadcast %124 : vector<1x32xf32> to vector<8x32xf32>
      %146 = arith.mulf %144, %145 : vector<8x32xf32>
      %147 = vector.broadcast %126 : vector<1x32xf32> to vector<8x32xf32>
      %148 = arith.addf %146, %147 : vector<8x32xf32>
      %149 = vector.extract_strided_slice %148 {offsets = [7, 0], sizes = [1, 32], strides = [1, 1]} : vector<8x32xf32> to vector<1x32xf32>
      %150 = arith.index_cast %arg2 : i32 to index
      %c0_71 = arith.constant 0 : index
      %c0_72 = arith.constant 0 : index
      %151 = vector.load %arg13[%150, %c0_71, %c0_72] : memref<1x1x32xf32, #tpu.memory_space<vmem>>, vector<1x1x32xf32>
      %152 = vector.shape_cast %151 : vector<1x1x32xf32> to vector<1x32xf32>
      %153 = vector.shape_cast %149 : vector<1x32xf32> to vector<1x1x32xf32>
      tpu.vector_store %arg13[%150, %c0_71, %c0_72], %153 {strides = array<i32>} : memref<1x1x32xf32, #tpu.memory_space<vmem>>, vector<1x1x32xf32>,
    } else {
    }
    return
  }
  func.func @transform_0(%arg0: i32, %arg1: i32, %arg2: i32) -> (i32, i32, i32) {
    %c0_i32 = arith.constant 0 : i32
    %c0_i32_0 = arith.constant 0 : i32
    %c0_i32_1 = arith.constant 0 : i32
    return %arg0, %c0_i32, %c0_i32_0 : i32, i32, i32
  }
  func.func @transform_1(%arg0: i32, %arg1: i32, %arg2: i32) -> (i32, i32) {
    %c0_i32 = arith.constant 0 : i32
    %c0_i32_0 = arith.constant 0 : i32
    %c0_i32_1 = arith.constant 0 : i32
    return %c0_i32, %c0_i32_0 : i32, i32
  }
  func.func @transform_2(%arg0: i32, %arg1: i32, %arg2: i32) -> (i32, i32, i32) {
    %c0_i32 = arith.constant 0 : i32
    %c0_i32_0 = arith.constant 0 : i32
    %c0_i32_1 = arith.constant 0 : i32
    %c0_i32_2 = arith.constant 0 : i32
    return %c0_i32, %c0_i32_0, %c0_i32_1 : i32, i32, i32
  }
  func.func @transform_3(%arg0: i32, %arg1: i32, %arg2: i32) -> (i32, i32) {
    %c0_i32 = arith.constant 0 : i32
    %c0_i32_0 = arith.constant 0 : i32
    %c0_i32_1 = arith.constant 0 : i32
    return %c0_i32, %c0_i32_0 : i32, i32
  }
  func.func @transform_4(%arg0: i32, %arg1: i32, %arg2: i32) -> (i32, i32) {
    %c0_i32 = arith.constant 0 : i32
    %c0_i32_0 = arith.constant 0 : i32
    %c0_i32_1 = arith.constant 0 : i32
    return %c0_i32, %c0_i32_0 : i32, i32
  }
  func.func @transform_5(%arg0: i32, %arg1: i32, %arg2: i32) -> (i32, i32, i32, i32) {
    %c0_i32 = arith.constant 0 : i32
    %c0_i32_0 = arith.constant 0 : i32
    %c0_i32_1 = arith.constant 0 : i32
    %c0_i32_2 = arith.constant 0 : i32
    return %arg1, %c0_i32, %c0_i32_0, %c0_i32_1 : i32, i32, i32, i32
  }
  func.func @transform_6(%arg0: i32, %arg1: i32, %arg2: i32) -> (i32, i32, i32) {
    %c0_i32 = arith.constant 0 : i32
    %c0_i32_0 = arith.constant 0 : i32
    %c0_i32_1 = arith.constant 0 : i32
    return %arg1, %c0_i32, %c0_i32_0 : i32, i32, i32
  }
  func.func @transform_7(%arg0: i32, %arg1: i32, %arg2: i32) -> (i32, i32, i32) {
    %c0_i32 = arith.constant 0 : i32
    %c0_i32_0 = arith.constant 0 : i32
    %c0_i32_1 = arith.constant 0 : i32
    return %arg1, %c0_i32, %c0_i32_0 : i32, i32, i32
  }
  func.func @transform_8(%arg0: i32, %arg1: i32, %arg2: i32) -> (i32, i32, i32) {
    %c0_i32 = arith.constant 0 : i32
    %c0_i32_0 = arith.constant 0 : i32
    %c0_i32_1 = arith.constant 0 : i32
    return %arg1, %c0_i32, %c0_i32_0 : i32, i32, i32
  }
  func.func @transform_9(%arg0: i32, %arg1: i32, %arg2: i32) -> (i32, i32, i32) {
    %c0_i32 = arith.constant 0 : i32
    %c0_i32_0 = arith.constant 0 : i32
    %c0_i32_1 = arith.constant 0 : i32
    return %arg1, %c0_i32, %c0_i32_0 : i32, i32, i32
  }
  func.func @transform_10(%arg0: i32, %arg1: i32, %arg2: i32) -> (i32, i32, i32) {
    %c0_i32 = arith.constant 0 : i32
    %c0_i32_0 = arith.constant 0 : i32
    %c0_i32_1 = arith.constant 0 : i32
    return %arg0, %c0_i32, %c0_i32_0 : i32, i32, i32
  }
}

</mosaic_0001>

<bundles_post_ra>
// kernel: tpu_custom_call.1
= control target key start
LH: loop header
LB: loop body
LE: loop exit
PB: predicated region body
PF: predicated region fallthrough
CT: control target
= control target key end

     0   :  { %s9740_s0 = inlined_call_operand.vmem [shape: f32[2,8,4], index: 0, kind: input, shape index: {}]   ;;  %s9741_s1 = inlined_call_operand.vmem [shape: bf16[4,32], index: 1, kind: input, shape index: {}]   ;;  %s9742_s2 = inlined_call_operand.vmem [shape: bf16[2,32,32], index: 2, kind: input, shape index: {}]   ;;  %s9743_s3 = inlined_call_operand.vmem [shape: f32[3,32], index: 3, kind: input, shape index: {}]   ;;  %s9744_s4 = inlined_call_operand.vmem [shape: f32[8,32], index: 4, kind: input, shape index: {}]   ;;  %s9745_s5 = inlined_call_operand.vmem [shape: bf16[2,4,32,32], index: 5, kind: input, shape index: {}]   ;;  %s9746_s6 = inlined_call_operand.vmem [shape: f32[2,16,32], index: 6, kind: input, shape index: {}]   ;;  %s9747_s7 = inlined_call_operand.vmem [shape: bf16[2,32,2048], index: 7, kind: input, shape index: {}]   ;;  %s9748_s8 = inlined_call_operand.vmem [shape: f32[2,1,2048], index: 8, kind: input, shape index: {}]   ;;  %s9749_s9 = inlined_call_operand.vmem [shape: bf16[2,2048,32], index: 9, kind: input, shape index: {}]   ;;  %s9750_s10 = inlined_call_operand.hbm [shape: f32[2,1,32], index: 10, kind: output, shape index: {}]  }
   0x1   :  { %9760 = sst [smem:[#allocation15_spill]] %s9740_s0 }
   0x2   :  { %9761 = sst [smem:[#allocation16_spill]] %s9750_s10 }
   0x3   :  { %15 = vsyncpa [#allocation4], 0 }
   0x4   :  { %17 = vsyncpa [#allocation4 + $0x1], 0  ;;  %s8684_s13 = smov 0   ;;  %s8686_s14 = smov 0  }
   0x5   :  { %s8688_s15 = smov 0   ;;  %s8690_s16 = smov 0  }
   0x6   :  { %s8692_s17 = smov 0   ;;  %s8694_s18 = smov 0  }
   0x7   :  { %s8696_s19 = smov 0   ;;  %s8698_s20 = smov 0  }
   0x8 LB: > { %9762 = sst [smem:[#allocation6_spill]] %s8571_s13  ;;  %s7066_s21 = sadd.s32 4294967295, %s8599_s20   ;;  %s8599_s20 = sphi %s8698_s20, %s23_s20   ;;  %s8595_s19 = sphi %s8696_s19, %s9785_s19   ;;  %s8591_s18 = sphi %s8694_s18, %s9784_s18   ;;  %s8587_s17 = sphi %s8692_s17, %s9783_s17   ;;  %s8583_s16 = sphi %s8690_s16, %s9782_s16   ;;  %s8579_s15 = sphi %s8688_s15, %s9781_s15   ;;  %s8575_s14 = sphi %s8686_s14, %s9787_s14   ;;  %s8571_s13 = sphi %s8684_s13, %s9786_s13  }
   0x9   : > { %9763 = sst [smem:[#allocation7_spill]] %s8579_s15  ;;  %s7067_s22 = sadd.s32 4294967294, %s8599_s20  }
   0xa   : > { %9764 = sst [smem:[#allocation8_spill]] %s8591_s18  ;;  %s38_s23 = sadd.s32 1, %s8591_s18 }
   0xb   : > { %9765 = sst [smem:[#allocation9_spill]] %s8595_s19  ;;  %p40_p0 = scmp.ge.s32.totalorder %s38_s23, 2 }
   0xc   : > { %9766 = sst [smem:[#allocation10_spill]] %s8599_s20  ;;  %s42_s24 = sadd.s32 1, %s8595_s19 }
   0xd   : > { %p299_p1 = scmp.ne.s32.totalorder %s8579_s15, %s8575_s14  ;;  %p300_p2 = scmp.eq.s32.totalorder %s7066_s21, 3 }
   0xe   : > { %s9789_s23 = smov (%p40_p0, %s38_s23), 0  ;;  %s9791_s24 = smov (!%p40_p0, %s42_s24), %s8595_s19 }
   0xf   : > { %9767 = sst [smem:[#allocation11_spill]] %s9789_s23  ;;  %p8733_p3 = por %p300_p2, %p299_p1 }
  0x10   : > { %p305_p4 = scmp.ne.s32.totalorder %s8575_s14, %s8571_s13  ;;  %p44_p5 = scmp.ge.s32.totalorder %s9791_s24, 2 }
  0x11   : > { %p306_p6 = scmp.eq.s32.totalorder %s7067_s22, 3  ;;  %p7070_p7 = scmp.ge.s32.totalorder %s8599_s20, 1 }
  0x12   : > { %p382_p8 = scmp.lt.s32.totalorder %s8599_s20, 5  ;;  %s9793_s24 = smov (%p44_p5, %s9791_s24), 0 }
  0x13   : > { %9769 = sst [smem:[#allocation12_spill]] %s9793_s24  ;;  %p8743_p9 = por %p306_p6, %p305_p4 }
  0x14   : > { %p383_p10 = pnand %p7070_p7, %p382_p8  ;;  %s286_s27 = ssub.s32 %s8595_s19, %s9793_s24 }
  0x15   : > { %s9770_s26 = scalar_select %p8743_p9, 1, 0 }
  0x16   : > { %s289_s28 = sadd.s32 1, %s8579_s15  ;;  %p287_p11 = scmp.eq.s32.totalorder %s286_s27, 0 }
  0x17   : > { %9771 = sst [smem:[#allocation13_spill]] %s9770_s26  ;;  %386 = sbr.rel (%p383_p10) target bundleno = 6347 (0x18cb), region = 60 }
  0x18   : > { %s8751_s29 = scalar_select %p287_p11, %s8579_s15, %s289_s28  }
  0x19   : > { %p442_p12 = scmp.lt.s32.totalorder (!%p383_p10), %s8587_s17, 1  ;;  %p446_p13 = scmp.lt.s32.totalorder (!%p383_p10), %s8583_s16, 1 }
  0x1a   : > { %9772 = sst [smem:[#allocation14_spill]] %s8751_s29  ;;  %s9773_s0 = sld [smem:[#allocation15_spill]] (!%p383_p10) }
  0x1b   : > { %s9774_s15 = sand.u32 (!%p383_p10), 1, %s8575_s14   ;;  %p7081_p0 = scmp.ne.s32.totalorder (!%p383_p10), %s8583_s16, 0 }
  0x1c   : > { %s8788_s26 = scalar_lea.vmem (!%p383_p10), [#allocation3], %s9774_s15 }
  0x1e   : > { %s443_s11 = scalar_select %p442_p12, %s8587_s17, 1 }
  0x1f   : > { %s447_s12 = scalar_select %p446_p13, %s8583_s16, 1 }
  0x20   : > { %s7071_s21 = sshll.u32 %s443_s11, 3  ;;  %474 = sbr.rel (%p7081_p0) target bundleno = 690 (0x2b2), region = 64  ;;  %v479_v0 = vld [vmem:[%s9741_s1] sm:$0x3] (!%p7081_p0)  ;;  %vm489_vm0 = vcmask (!%p7081_p0), 1041408   ;;  %v8601_v2 = vmov (!%p7081_p0), 0.0  }
  0x21   : > { %s445_s24 = scalar_lea.vmem %s9773_s0, %s7071_s21  ;;  %s7515_s27 = sshll.u32 %s447_s12, 6  ;;  %7929 = vmatprep.subr.bf16.mxu0 (!%p7081_p0), %v8601_v2  ;;  %v491_v3 = vsel (!%p7081_p0), %vm489_vm0, %v479_v0, 0  ;;  %vm8602_vm1 = vmmov (!%p7081_p0), 0   ;;  %vm485_vm2 = vcmask (!%p7081_p0), 31744   ;;  %7935 = vmatprep.subr.bf16.mxu1 (!%p7081_p0), %v8601_v2  ;;  %v8193_v5 = vld [vmem:[%s9742_s2] sm:$0xff] (!%p7081_p0)   ;;  %v8194_v6 = vld [vmem:[%s9742_s2 + $0x8] sm:$0xff] (!%p7081_p0)  }
  0x22   : > { %s8764_s18 = scalar_lea.vmem %s9745_s5, %s7515_s27  ;;  %s7516_s29 = sshll.u32 %s447_s12, 4  ;;  %v477_v1 = vld [vmem:[%s445_s24] sm:$0xff] (!%p7081_p0)  ;;  %7931 = vmatprep.mubr.msk.bf16.mxu0 (!%p7081_p0), %vm8602_vm1, %v8601_v2  ;;  %7930 = vmatpush3.bf16.msra.mxu0 (!%p7081_p0), %v491_v3  ;;  %v8195_v7 = vld [vmem:[%s9742_s2 + $0x10] sm:$0xff] (!%p7081_p0)   ;;  %vm556_vm3 = vcmask (!%p7081_p0), 261120   ;;  %v8196_v16 = vld [vmem:[%s9742_s2 + $0x18] sm:$0xff] (!%p7081_p0)  }
  0x23   : > { %s8769_s30 = scalar_lea.vmem %s9746_s6, %s7516_s29  ;;  %s7517_s13 = sshll.u32 %s447_s12, 8  ;;  %v478_v4 = vpack.c.bf16 (!%p7081_p0), %v477_v1, %v477_v1  ;;  %7939 = vmatprep.mubr.msk.bf16.mxu1 (!%p7081_p0), %vm8602_vm1, %v8601_v2  ;;  %7943 = vmatprep.subr.bf16.mxu0 (!%p7081_p0), %v8601_v2  ;;  %v7082_v8 = vld [vmem:[%s9743_s3] ss:$0 sm:$0xff] (!%p7081_p0)  ;;  %v7084_v17 = vld [vmem:[%s9743_s3 + $0x1] ss:$0 sm:$0xff] (!%p7081_p0) }
  0x24   : > { %s8774_s11 = scalar_lea.vmem %s9747_s7, %s7517_s13  ;;  %s8779_s22 = scalar_lea.vmem %s9748_s8, %s7516_s29  ;;  %7936 = vmatpush3.bf16.msra.mxu1 (!%p7081_p0), %v8193_v5  ;;  %v7092_v25 = vld [vmem:[%s9743_s3 + $0x2] ss:$0 sm:$0xff] (!%p7081_p0) }
  0x25   : > { %s7518_s19 = sshll.u32 %s447_s12, 10  ;;  %7932 = vmatmul.mubr.msk.bf16.vlgmr.msra.gmra.mrb[0].mxu0 (!%p7081_p0), %vm485_vm2, %v478_v4  ;;  %7937 = vmatprep.subr.bf16.mxu1 (!%p7081_p0), %v8601_v2  ;;  %v667_v27 = vld [vmem:[%s9744_s4] sm:$0xff] (!%p7081_p0) }
  0x26   : > { %s8784_s0 = scalar_lea.vmem %s9749_s9, %s7518_s19  ;;  %7947 = vmatprep.mubr.msk.bf16.mxu0 (!%p7081_p0), %vm8602_vm1, %v8601_v2  ;;  %7944 = vmatpush3.bf16.msra.mxu0 (!%p7081_p0), %v8195_v7 }
  0x27   : > { %7945 = vmatprep.subr.bf16.mxu0 %v8601_v2 }
  0x28   : > { %7938 = vmatpush3.bf16.msra.mxu1 %v8194_v6 }
  0x2a   : > { %7946 = vmatpush3.bf16.msra.mxu0 %v8196_v16 }
  0xf8   : > { %v527_v9 = vpop.f32.mrb[0].mxu0 }
  0xf9   : > { %v528_v10 = vadd.f32 %v7082_v8, %v527_v9  ;;  %v7933_v11 = vpop.f32.mrb[1].mxu0 }
  0xfa   : > { %v530_v12 = vpop.f32.mrb[2].mxu0 }
  0xfb   : > { %v533_v13 = vmax.f32 %v528_v10, 0.0  ;;  %v7934_v14 = vpop.f32.mrb[3].mxu0 }
  0xfd   : > { %v534_v15 = vpack.c.bf16 %v533_v13, %v533_v13 }
  0xff   : > { %7940 = vmatmul.mubr.msk.bf16.vlgmr.msra.gmra.mrb[0].mxu1 %vm556_vm3, %v534_v15 }
 0x1d2   : > { %v594_v18 = vpop.f32.mrb[0].mxu1 }
 0x1d3   : > { %v595_v19 = vadd.f32 %v7084_v17, %v594_v18  ;;  %v7941_v20 = vpop.f32.mrb[1].mxu1 }
 0x1d4   : > { %v597_v21 = vpop.f32.mrb[2].mxu1 }
 0x1d5   : > { %v600_v22 = vmax.f32 %v595_v19, 0.0  ;;  %v7942_v23 = vpop.f32.mrb[3].mxu1 }
 0x1d7   : > { %v601_v24 = vpack.c.bf16 %v600_v22, %v600_v22 }
 0x1d9   : > { %7948 = vmatmul.mubr.msk.bf16.vlgmr.msra.gmra.mrb[4].mxu0 %vm556_vm3, %v601_v24 }
 0x2ac   : > { %v661_v26 = vpop.f32.mrb[4].mxu0 }
 0x2ad   : > { %v662_v28 = vadd.f32 %v7092_v25, %v661_v26  ;;  %v7949_v29 = vpop.f32.mrb[5].mxu0 }
 0x2ae   : > { %v664_v30 = vpop.f32.mrb[6].mxu0 }
 0x2af   : > { %v668_v31 = vadd.f32 %v667_v27, %v662_v28  ;;  %v7950_v32 = vpop.f32.mrb[7].mxu0 }
 0x2b1   : > { %670 = vst.msk [vmem:[#allocation2] sm:$0xff] %vm556_vm3, %v668_v31 }
 0x2b2 PF: > { %v8197_v33 = vld [vmem:[%s8764_s18 + $0x10] sm:$0xff]   ;;  %v8603_v34 = vmov 0.0   ;;  %v8198_v35 = vld [vmem:[%s8764_s18 + $0x20] sm:$0xff]   ;;  %v8199_v36 = vld [vmem:[%s8764_s18 + $0x18] sm:$0xff]   ;;  %vm8604_vm4 = vmmov 0   ;;  %vm697_vm5 = vcmask 261120   ;;  %v818_v54 = vlaneseq }
 0x2b3   : > { %7951 = vmatprep.subr.bf16.mxu0 %v8603_v34  ;;  %7959 = vmatprep.subr.bf16.mxu1 %v8603_v34  ;;  %v8200_v37 = vld [vmem:[%s8764_s18 + $0x28] sm:$0xff]   ;;  %v7100_v40 = vld [vmem:[%s8769_s30 + $0x1] ss:$0 sm:$0xff]  ;;  %v7108_v42 = vld [vmem:[%s8769_s30 + $0x2] ss:$0 sm:$0xff]  ;;  %s8605_s23 = smov 104  }
 0x2b4   : > { %7952 = vmatpush3.bf16.msra.mxu0 %v8197_v33  ;;  %7955 = vmatprep.mubr.msk.bf16.mxu0 %vm8604_vm4, %v8603_v34  ;;  %s8606_s21 = smov 120   ;;  %s8607_s19 = smov 112   ;;  %v8608_v52 = vmov 1983009808   ;;  %v8609_v55 = vmov 1934713408  }
 0x2b5   : > { %7960 = vmatpush3.bf16.msra.mxu1 %v8198_v35  ;;  %7953 = vmatprep.subr.bf16.mxu0 %v8603_v34  ;;  %v816_v53 = vunpack.c.l.s4 %v8608_v52  ;;  %v848_v56 = vunpack.c.l.s4 %v8609_v55  ;;  %v8838_v58 = vshrl.u32 %v818_v54, 7  ;;  %p7116_p1 = scmp.ge.s32.totalorder %s8583_s16, 1 }
 0x2b6   : > { %7961 = vmatprep.subr.bf16.mxu1 %v8603_v34  ;;  %7963 = vmatprep.mubr.msk.bf16.mxu1 %vm8604_vm4, %v8603_v34  ;;  %vm8611_vm6 = vmmov (!%p7116_p1), 0   ;;  %s8612_s27 = smov (!%p7116_p1), 104   ;;  %s8613_s28 = smov (!%p7116_p1), 120   ;;  %vm1318_vm7 = vcmask (!%p7116_p1), 64512   ;;  %vm1565_vm9 = vcmask (!%p7116_p1), 1043456   ;;  %vm1896_vm10 = vcmask (!%p7116_p1), 130048  }
 0x2b7   : > { %v817_v57 = vunpack.c.0.s8 %v816_v53  ;;  %v849_v61 = vunpack.c.0.s8 %v848_v56  ;;  %s8614_s15 = smov (!%p7116_p1), 112   ;;  %s8615_s10 = smov (!%p7116_p1), 16   ;;  %vm1898_vm11 = vcmask (!%p7116_p1), 195584  }
 0x2b8   : > { %v8825_v38 = vld [vmem:[#allocation2] sm:$0xff]  ;;  %7954 = vmatpush3.bf16.msra.mxu0 %v8199_v36  ;;  %s8616_s13 = smov (!%p7116_p1), 8   ;;  %s8617_s20 = smov (!%p7116_p1), 24  }
 0x2b9   : > { %v8829_v39 = vpack.c.bf16 %v8825_v38, %v8825_v38  ;;  %7962 = vmatpush3.bf16.msra.mxu1 %v8200_v37  ;;  %v8841_v62 = vsub.s32 %v817_v57, %v8838_v58  ;;  %v8844_v5 = vsub.s32 %v849_v61, %v8838_v58 }
 0x2bb   : > { %7956 = vmatmul.mubr.msk.bf16.vlgmr.msra.gmra.mrb[0].mxu0 %vm697_vm5, %v8829_v39 }
 0x2bc   : > { %7964 = vmatmul.mubr.msk.bf16.vlgmr.msra.gmra.mrb[0].mxu1 %vm697_vm5, %v8829_v39 }
 0x38e   : > { %v735_v41 = vpop.f32.mrb[0].mxu0 }
 0x38f   : > { %v736_v43 = vadd.f32 %v7100_v40, %v735_v41  ;;  %v7957_v44 = vpop.f32.mrb[1].mxu0  ;;  %v797_v45 = vpop.f32.mrb[0].mxu1 }
 0x390   : > { %v738_v46 = vpop.f32.mrb[2].mxu0  ;;  %v7965_v47 = vpop.f32.mrb[1].mxu1  ;;  %v798_v48 = vadd.f32 %v7108_v42, %v797_v45 }
 0x391   : > { %v800_v49 = vpop.f32.mrb[2].mxu1  ;;  %810 = vrot.lane.b32.xlu1 %v736_v43, %s8605_s23  ;;  %804 = vrot.lane.b32.xlu0 %v736_v43, %s8606_s21  ;;  %v7958_v50 = vpop.f32.mrb[3].mxu0 }
 0x392   : > { %v7966_v51 = vpop.f32.mrb[3].mxu1 }
 0x395   : > { %954 = vrot.lane.b32.xlu1 %v798_v48, %s8606_s21  ;;  %807 = vrot.lane.b32.xlu0 %v736_v43, %s8607_s19 }
 0x399   : > { %960 = vrot.lane.b32.xlu1 %v798_v48, %s8605_s23  ;;  %957 = vrot.lane.b32.xlu0 %v798_v48, %s8607_s19 }
 0x403   : > { %v811_v59 = vpop.permute.xlu1 %810  ;;  %v805_v60 = vpop.permute.xlu0 %804 }
 0x404   : > { %v829_v63 = vcombine.low %v805_v60, %v811_v59  ;;  %v830_v0 = vcombine.high %v805_v60, %v811_v59 }
 0x406   : > { %v837_v6 = vrot.slane %v829_v63, %v8841_v62  ;;  %v844_v7 = vrot.slane %v830_v0, %v8841_v62 }
 0x407   : > { %v955_v1 = vpop.permute.xlu1 %954  ;;  %v808_v2 = vpop.permute.xlu0 %807 }
 0x408   : > { %v813_v3 = vcombine.low %v736_v43, %v808_v2  ;;  %v814_v4 = vcombine.high %v736_v43, %v808_v2 }
 0x40a   : > { %v821_v8 = vrot.slane %v813_v3, %v8841_v62  ;;  %v828_v9 = vrot.slane %v814_v4, %v8841_v62 }
 0x40b   : > { %v961_v10 = vpop.permute.xlu1 %960  ;;  %v958_v11 = vpop.permute.xlu0 %957 }
 0x40c   : > { %v845_v12 = vcombine.low %v821_v8, %v837_v6  ;;  %v846_v13 = vcombine.high %v821_v8, %v837_v6  ;;  %v861_v14 = vcombine.low %v828_v9, %v844_v7  ;;  %v862_v15 = vcombine.high %v828_v9, %v844_v7 }
 0x40d   : > { %v979_v16 = vcombine.low %v955_v1, %v961_v10  ;;  %v980_v17 = vcombine.high %v955_v1, %v961_v10  ;;  %v963_v18 = vcombine.low %v798_v48, %v958_v11  ;;  %v964_v19 = vcombine.high %v798_v48, %v958_v11 }
 0x40e   : > { %v853_v20 = vrot.slane %v845_v12, %v8844_v5  ;;  %v860_v21 = vrot.slane %v846_v13, %v8844_v5  ;;  %v869_v22 = vrot.slane %v861_v14, %v8844_v5  ;;  %v876_v23 = vrot.slane %v862_v15, %v8844_v5 }
 0x40f   : > { %v987_v24 = vrot.slane %v979_v16, %v8841_v62  ;;  %v994_v25 = vrot.slane %v980_v17, %v8841_v62  ;;  %v971_v26 = vrot.slane %v963_v18, %v8841_v62  ;;  %v978_v27 = vrot.slane %v964_v19, %v8841_v62 }
 0x410   : > { %v881_v28 = vcombine.low %v853_v20, %v860_v21  ;;  %v7112_v29 = vcombine.high %v853_v20, %v860_v21  ;;  %v897_v30 = vcombine.low %v869_v22, %v876_v23  ;;  %v7113_v31 = vcombine.high %v869_v22, %v876_v23 }
 0x411   : > { %v995_v32 = vcombine.low %v971_v26, %v987_v24  ;;  %v996_v33 = vcombine.high %v971_v26, %v987_v24  ;;  %v1011_v34 = vcombine.low %v978_v27, %v994_v25  ;;  %v1012_v35 = vcombine.high %v978_v27, %v994_v25  ;;  %v8201_v26 = vld [vmem:[%s8764_s18] sm:$0xff] (!%p7116_p1)  }
 0x412   : > { %v888_v36 = vrot.slane %v881_v28, %v8841_v62  ;;  %v896_v37 = vrot.slane %v7112_v29, %v8841_v62  ;;  %v904_v40 = vrot.slane %v897_v30, %v8841_v62  ;;  %v912_v41 = vrot.slane %v7113_v31, %v8841_v62  ;;  %v8202_v28 = vld [vmem:[%s8764_s18 + $0x8] sm:$0xff] (!%p7116_p1)   ;;  %v7117_v29 = vld [vmem:[%s8769_s30] ss:$0 sm:$0xff] (!%p7116_p1) }
 0x413   : > { %v1003_v42 = vrot.slane %v995_v32, %v8844_v5  ;;  %v1010_v43 = vrot.slane %v996_v33, %v8844_v5  ;;  %v1019_v44 = vrot.slane %v1011_v34, %v8844_v5  ;;  %v1026_v45 = vrot.slane %v1012_v35, %v8844_v5 }
 0x414   : > { %v913_v46 = vcombine.low %v888_v36, %v896_v37  ;;  %v914_v47 = vcombine.high %v888_v36, %v896_v37  ;;  %v929_v48 = vcombine.low %v904_v40, %v912_v41  ;;  %v930_v49 = vcombine.high %v904_v40, %v912_v41 }
 0x415   : > { %v1031_v50 = vcombine.low %v1003_v42, %v1010_v43  ;;  %v7114_v51 = vcombine.high %v1003_v42, %v1010_v43  ;;  %v1047_v52 = vcombine.low %v1019_v44, %v1026_v45  ;;  %v7115_v53 = vcombine.high %v1019_v44, %v1026_v45 }
 0x416   : > { %v921_v55 = vrot.slane %v913_v46, %v8844_v5  ;;  %v928_v56 = vrot.slane %v914_v47, %v8844_v5  ;;  %v937_v57 = vrot.slane %v929_v48, %v8844_v5  ;;  %v944_v59 = vrot.slane %v930_v49, %v8844_v5 }
 0x417   : > { %v1038_v60 = vrot.slane %v1031_v50, %v8841_v62  ;;  %v1046_v61 = vrot.slane %v7114_v51, %v8841_v62  ;;  %v1054_v63 = vrot.slane %v1047_v52, %v8841_v62  ;;  %v1062_v0 = vrot.slane %v7115_v53, %v8841_v62 }
 0x418   : > { %v945_v1 = vcombine.low %v921_v55, %v937_v57  ;;  %v946_v2 = vcombine.high %v921_v55, %v937_v57  ;;  %v947_v3 = vcombine.low %v928_v56, %v944_v59  ;;  %v948_v4 = vcombine.high %v928_v56, %v944_v59 }
 0x419   : > { %v1063_v6 = vcombine.low %v1038_v60, %v1046_v61  ;;  %v1064_v7 = vcombine.high %v1038_v60, %v1046_v61  ;;  %v1079_v8 = vcombine.low %v1054_v63, %v1062_v0  ;;  %v1080_v9 = vcombine.high %v1054_v63, %v1062_v0  ;;  %1106 = sbr.rel (%p7116_p1) target bundleno = 3686 (0xe66), region = 68 }
 0x41a   : > { %v8874_v10 = vpack.c.bf16 %v945_v1, %v945_v1  ;;  %v8876_v11 = vpack.c.bf16 %v946_v2, %v946_v2  ;;  %v8878_v12 = vpack.c.bf16 %v947_v3, %v947_v3  ;;  %v8880_v13 = vpack.c.bf16 %v948_v4, %v948_v4 }
 0x41b   : > { %v1071_v14 = vrot.slane %v1063_v6, %v8844_v5  ;;  %v1078_v15 = vrot.slane %v1064_v7, %v8844_v5  ;;  %v1087_v16 = vrot.slane %v1079_v8, %v8844_v5  ;;  %v1094_v17 = vrot.slane %v1080_v9, %v8844_v5 }
 0x41c   : > { %v8610_v27 = vmov (!%p7116_p1), 0.0   ;;  %v1323_v35 = vsel (!%p7116_p1), %vm1318_vm7, %v8874_v10, 0  ;;  %v1369_v36 = vsel (!%p7116_p1), %vm1318_vm7, %v8876_v11, 0 }
 0x41d   : > { %v1095_v18 = vcombine.low %v1071_v14, %v1087_v16  ;;  %v1096_v19 = vcombine.high %v1071_v14, %v1087_v16  ;;  %v1097_v20 = vcombine.low %v1078_v15, %v1094_v17  ;;  %v1098_v21 = vcombine.high %v1078_v15, %v1094_v17  ;;  %7967 = vmatprep.subr.bf16.mxu0 (!%p7116_p1), %v8610_v27 }
 0x41e   : > { %7975 = vmatprep.subr.bf16.mxu1 (!%p7116_p1), %v8610_v27  ;;  %7968 = vmatpush3.bf16.msra.mxu0 (!%p7116_p1), %v8201_v26 }
 0x41f   : > { %v8886_v22 = vpack.c.bf16 %v1095_v18, %v1095_v18  ;;  %v8888_v23 = vpack.c.bf16 %v1096_v19, %v1096_v19  ;;  %v8890_v24 = vpack.c.bf16 %v1097_v20, %v1097_v20  ;;  %v8892_v25 = vpack.c.bf16 %v1098_v21, %v1098_v21  ;;  %7971 = vmatprep.mubr.msk.bf16.mxu0 (!%p7116_p1), %vm8611_vm6, %v8610_v27 }
 0x420   : > { %7969 = vmatprep.subr.bf16.mxu0 %v8610_v27  ;;  %7977 = vmatprep.mubr.msk.bf16.mxu1 %vm8611_vm6, %v8610_v27  ;;  %v1415_v18 = vsel %vm1318_vm7, %v8878_v12, 0  ;;  %v1461_v19 = vsel %vm1318_vm7, %v8880_v13, 0 }
 0x421   : > { %7976 = vmatpush3.bf16.xpose.msra.mxu1 %v1323_v35 }
 0x422   : > { %7970 = vmatpush3.bf16.msra.mxu0 %v8202_v28  ;;  %7987 = vmatprep.subr.bf16.mxu1 %v8610_v27 }
 0x423   : > { %7981 = vmatprep.subr.bf16.mxu0 %v8610_v27 }
 0x425   : > { %7972 = vmatmul.mubr.msk.bf16.vlgmr.msra.gmra.mrb[0].mxu0 %vm697_vm5, %v8829_v39 }
 0x426   : > { %7983 = vmatprep.mubr.msk.bf16.mxu0 %vm8611_vm6, %v8610_v27 }
 0x42b   : > { %7982 = vmatpush3.bf16.xpose.msra.mxu0 %v1369_v36 }
 0x42c   : > { %7993 = vmatprep.subr.bf16.mxu0 %v8610_v27 }
 0x4f8   : > { %v1162_v30 = vpop.f32.mrb[0].mxu0 }
 0x4f9   : > { %v1163_v31 = vadd.f32 %v7117_v29, %v1162_v30  ;;  %v7973_v32 = vpop.f32.mrb[1].mxu0 }
 0x4fa   : > { %v1165_v33 = vpop.f32.mrb[2].mxu0 }
 0x4fb   : > { %1175 = vrot.lane.b32.xlu1 %v1163_v31, %s8612_s27  ;;  %1169 = vrot.lane.b32.xlu0 %v1163_v31, %s8613_s28  ;;  %v7974_v34 = vpop.f32.mrb[3].mxu0  ;;  %v1506_v33 = vand.u32 127, %v818_v54 }
 0x4fd   : > { %vm1507_vm8 = vcmp.le.s32.totalorder %v1506_v33, %v8838_v58 }
 0x4ff   : > { %1172 = vrot.lane.b32.xlu0 %v1163_v31, %s8614_s15 }
 0x56d   : > { %v1176_v37 = vpop.permute.xlu1 %1175  ;;  %v1170_v40 = vpop.permute.xlu0 %1169 }
 0x56e   : > { %v1194_v41 = vcombine.low %v1170_v40, %v1176_v37  ;;  %v1195_v42 = vcombine.high %v1170_v40, %v1176_v37 }
 0x570   : > { %v1202_v46 = vrot.slane %v1194_v41, %v8841_v62  ;;  %v1209_v47 = vrot.slane %v1195_v42, %v8841_v62 }
 0x571   : > { %v1173_v43 = vpop.permute.xlu0 %1172 }
 0x572   : > { %v1178_v44 = vcombine.low %v1163_v31, %v1173_v43  ;;  %v1179_v45 = vcombine.high %v1163_v31, %v1173_v43 }
 0x574   : > { %v1186_v48 = vrot.slane %v1178_v44, %v8841_v62  ;;  %v1193_v49 = vrot.slane %v1179_v45, %v8841_v62 }
 0x576   : > { %v1210_v50 = vcombine.low %v1186_v48, %v1202_v46  ;;  %v1211_v51 = vcombine.high %v1186_v48, %v1202_v46  ;;  %v1226_v52 = vcombine.low %v1193_v49, %v1209_v47  ;;  %v1227_v53 = vcombine.high %v1193_v49, %v1209_v47 }
 0x578   : > { %v1218_v55 = vrot.slane %v1210_v50, %v8844_v5  ;;  %v1225_v56 = vrot.slane %v1211_v51, %v8844_v5  ;;  %v1234_v57 = vrot.slane %v1226_v52, %v8844_v5  ;;  %v1241_v59 = vrot.slane %v1227_v53, %v8844_v5 }
 0x57a   : > { %v1246_v60 = vcombine.low %v1218_v55, %v1225_v56  ;;  %v7121_v61 = vcombine.high %v1218_v55, %v1225_v56  ;;  %v1262_v63 = vcombine.low %v1234_v57, %v1241_v59  ;;  %v7122_v0 = vcombine.high %v1234_v57, %v1241_v59 }
 0x57c   : > { %v1253_v1 = vrot.slane %v1246_v60, %v8841_v62  ;;  %v1261_v2 = vrot.slane %v7121_v61, %v8841_v62  ;;  %v1269_v3 = vrot.slane %v1262_v63, %v8841_v62  ;;  %v1277_v4 = vrot.slane %v7122_v0, %v8841_v62 }
 0x57e   : > { %v1278_v6 = vcombine.low %v1253_v1, %v1261_v2  ;;  %v1294_v7 = vcombine.low %v1269_v3, %v1277_v4  ;;  %v1279_v8 = vcombine.high %v1253_v1, %v1261_v2  ;;  %v1295_v14 = vcombine.high %v1269_v3, %v1277_v4 }
 0x580   : > { %v1286_v9 = vrot.slane %v1278_v6, %v8844_v5  ;;  %v1302_v15 = vrot.slane %v1294_v7, %v8844_v5  ;;  %v1293_v20 = vrot.slane %v1279_v8, %v8844_v5  ;;  %v1309_v21 = vrot.slane %v1295_v14, %v8844_v5 }
 0x582   : > { %v1311_v16 = vcombine.high %v1286_v9, %v1302_v15  ;;  %v1310_v17 = vcombine.low %v1286_v9, %v1302_v15  ;;  %v1312_v29 = vcombine.low %v1293_v20, %v1309_v21  ;;  %v1313_v30 = vcombine.high %v1293_v20, %v1309_v21 }
 0x584   : > { %v1314_v26 = vpack.c.bf16 %v1310_v17, %v1310_v17  ;;  %v1315_v28 = vpack.c.bf16 %v1311_v16, %v1311_v16  ;;  %v1316_v31 = vpack.c.bf16 %v1312_v29, %v1312_v29  ;;  %v1317_v32 = vpack.c.bf16 %v1313_v30, %v1313_v30 }
 0x585   : > { %v1567_v29 = vsel %vm1565_vm9, %v8886_v22, 0  ;;  %v1613_v30 = vsel %vm1565_vm9, %v8888_v23, 0 }
 0x586   : > { %7978 = vmatmul.mubr.msk.bf16.vlgmr.msra.gmra.mrb[0].mxu1 %vm1318_vm7, %v1314_v26  ;;  %7984 = vmatmul.mubr.msk.bf16.vlgmr.msra.gmra.mrb[4].mxu0 %vm1318_vm7, %v1315_v28 }
 0x587   : > { %7988 = vmatpush3.bf16.xpose.msra.mxu1 %v1415_v18  ;;  %7994 = vmatpush3.bf16.xpose.msra.mxu0 %v1461_v19 }
 0x588   : > { %7989 = vmatprep.mubr.msk.bf16.mxu1 %vm8611_vm6, %v8610_v27  ;;  %7995 = vmatprep.mubr.msk.bf16.mxu0 %vm8611_vm6, %v8610_v27 }
 0x589   : > { %7999 = vmatprep.subr.bf16.mxu1 %v8610_v27  ;;  %8005 = vmatprep.subr.bf16.mxu0 %v8610_v27 }
 0x58e   : > { %7990 = vmatmul.mubr.msk.bf16.vlgmr.msra.gmra.mrb[4].mxu1 %vm1318_vm7, %v1316_v31  ;;  %7996 = vmatmul.mubr.msk.bf16.vlgmr.msra.gmra.mrb[8].mxu0 %vm1318_vm7, %v1317_v32 }
 0x58f   : > { %8001 = vmatprep.mubr.msk.bf16.mxu1 %vm8611_vm6, %v8610_v27  ;;  %8007 = vmatprep.mubr.msk.bf16.mxu0 %vm8611_vm6, %v8610_v27 }
 0x590   : > { %8000 = vmatpush3.bf16.msra.mxu1 %v1567_v29  ;;  %8006 = vmatpush3.bf16.msra.mxu0 %v1613_v30 }
 0x591   : > { %8011 = vmatprep.subr.bf16.mxu1 %v8610_v27  ;;  %8017 = vmatprep.subr.bf16.mxu0 %v8610_v27 }
 0x659   : > { %v1359_v34 = vpop.f32.mrb[0].mxu1  ;;  %v1405_v35 = vpop.f32.mrb[4].mxu0 }
 0x65a   : > { %v1510_v36 = vsel %vm1507_vm8, %v1359_v34, -1e+30  ;;  %v1511_v37 = vsel %vm1507_vm8, %v1405_v35, -1e+30  ;;  %v7979_v40 = vpop.f32.mrb[1].mxu1  ;;  %v7985_v41 = vpop.f32.mrb[5].mxu0 }
 0x65b   : > { %v1362_v42 = vpop.f32.mrb[2].mxu1  ;;  %v1408_v43 = vpop.f32.mrb[6].mxu0  ;;  %v1514_v44 = vsel %vm1318_vm7, %v1510_v36, -inf  ;;  %v1517_v45 = vsel %vm1318_vm7, %v1511_v37, -inf }
 0x65c   : > { %1515 = vmax.xlane.f32.xlu1 %v1514_v44  ;;  %v7980_v46 = vpop.f32.mrb[3].mxu1  ;;  %1518 = vmax.xlane.f32.xlu0 %v1517_v45  ;;  %v7986_v47 = vpop.f32.mrb[7].mxu0  ;;  %v1659_v42 = vsel %vm1565_vm9, %v8890_v24, 0  ;;  %v1705_v44 = vsel %vm1565_vm9, %v8892_v25, 0 }
 0x661   : > { %v1451_v48 = vpop.f32.mrb[4].mxu1  ;;  %v1497_v49 = vpop.f32.mrb[8].mxu0 }
 0x662   : > { %v1512_v50 = vsel %vm1507_vm8, %v1451_v48, -1e+30  ;;  %v1513_v51 = vsel %vm1507_vm8, %v1497_v49, -1e+30  ;;  %v7991_v52 = vpop.f32.mrb[5].mxu1  ;;  %v7997_v53 = vpop.f32.mrb[9].mxu0 }
 0x663   : > { %v1454_v55 = vpop.f32.mrb[6].mxu1  ;;  %v1500_v56 = vpop.f32.mrb[10].mxu0  ;;  %v1520_v57 = vsel %vm1318_vm7, %v1512_v50, -inf  ;;  %v1523_v59 = vsel %vm1318_vm7, %v1513_v51, -inf }
 0x664   : > { %v7992_v60 = vpop.f32.mrb[7].mxu1  ;;  %1521 = vmax.xlane.f32.xlu0 %v1520_v57  ;;  %1524 = vmax.xlane.f32.xlu1 %v1523_v59  ;;  %v7998_v61 = vpop.f32.mrb[11].mxu0 }
 0x6e9   : > { %v1516_v63 = vpop.xlane.xlu1 %1515  ;;  %v1519_v0 = vpop.xlane.xlu0 %1518 }
 0x6ea   : > { %v1526_v1 = vsub.f32 %v1510_v36, %v1516_v63  ;;  %v1527_v2 = vsub.f32 %v1511_v37, %v1519_v0 }
 0x6ec   : > { %v1530_v3 = vmul.f32 1.442695, %v1526_v1  ;;  %v1532_v4 = vmul.f32 1.442695, %v1527_v2 }
 0x6ee   : > { %8333 = vpow2.f32 %v1530_v3 }
 0x6ef   : > { %8335 = vpow2.f32 %v1532_v4 }
 0x6f1   : > { %v1522_v6 = vpop.xlane.xlu0 %1521  ;;  %v1525_v7 = vpop.xlane.xlu1 %1524 }
 0x6f2   : > { %v1528_v8 = vsub.f32 %v1512_v50, %v1522_v6  ;;  %v1529_v9 = vsub.f32 %v1513_v51, %v1525_v7  ;;  %v8203_v51 = vld [vmem:[%s8764_s18 + $0x30] sm:$0xff]  }
 0x6f4   : > { %v1534_v14 = vmul.f32 1.442695, %v1528_v8  ;;  %v1536_v15 = vmul.f32 1.442695, %v1529_v9 }
 0x6f6   : > { %8337 = vpow2.f32 %v1534_v14 }
 0x6f7   : > { %8339 = vpow2.f32 %v1536_v15 }
 0x6f8   : > { %v8334_v16 = vpop.eup %8333 }
 0x6f9   : > { %v8336_v17 = vpop.eup %8335  ;;  %v1538_v18 = vsel %vm1318_vm7, %v8334_v16, 0.0 }
 0x6fa   : > { %1539 = vadd.xlane.f32.xlu0 %v1538_v18  ;;  %v1541_v19 = vsel %vm1318_vm7, %v8336_v17, 0.0 }
 0x6fb   : > { %1542 = vadd.xlane.f32.xlu1 %v1541_v19 }
 0x700   : > { %v8338_v20 = vpop.eup %8337 }
 0x701   : > { %v8340_v21 = vpop.eup %8339  ;;  %v1544_v26 = vsel %vm1318_vm7, %v8338_v20, 0.0 }
 0x702   : > { %1545 = vadd.xlane.f32.xlu0 %v1544_v26  ;;  %v1547_v28 = vsel %vm1318_vm7, %v8340_v21, 0.0 }
 0x703   : > { %1548 = vadd.xlane.f32.xlu1 %v1547_v28  ;;  %v8204_v28 = vld [vmem:[%s8764_s18 + $0x38] sm:$0xff]  }
 0x787   : > { %v1540_v31 = vpop.xlane.xlu0 %1539 }
 0x788   : > { %8341 = vrcp.f32 %v1540_v31  ;;  %v1543_v32 = vpop.xlane.xlu1 %1542 }
 0x789   : > { %8343 = vrcp.f32 %v1543_v32 }
 0x78f   : > { %v1546_v33 = vpop.xlane.xlu0 %1545 }
 0x790   : > { %8345 = vrcp.f32 %v1546_v33  ;;  %v1549_v34 = vpop.xlane.xlu1 %1548 }
 0x791   : > { %8347 = vrcp.f32 %v1549_v34 }
 0x792   : > { %v8342_v35 = vpop.eup %8341 }
 0x793   : > { %v8344_v36 = vpop.eup %8343  ;;  %v1554_v37 = vmul.f32 %v8342_v35, %v8334_v16 }
 0x794   : > { %v1555_v40 = vmul.f32 %v8344_v36, %v8336_v17 }
 0x795   : > { %v1558_v41 = vpack.c.bf16 %v1554_v37, %v1554_v37 }
 0x796   : > { %v1559_v43 = vpack.c.bf16 %v1555_v40, %v1555_v40 }
 0x797   : > { %8002 = vmatmul.mubr.msk.bf16.vlgmr.msra.gmra.mrb[8].mxu1 %vm1318_vm7, %v1558_v41 }
 0x798   : > { %8008 = vmatmul.mubr.msk.bf16.vlgmr.msra.gmra.mrb[12].mxu0 %vm1318_vm7, %v1559_v43  ;;  %8012 = vmatpush3.bf16.msra.mxu1 %v1659_v42 }
 0x799   : > { %8018 = vmatpush3.bf16.msra.mxu0 %v1705_v44  ;;  %8013 = vmatprep.mubr.msk.bf16.mxu1 %vm8611_vm6, %v8610_v27 }
 0x79a   : > { %v8346_v45 = vpop.eup %8345  ;;  %8019 = vmatprep.mubr.msk.bf16.mxu0 %vm8611_vm6, %v8610_v27  ;;  %8023 = vmatprep.subr.bf16.mxu1 %v8610_v27 }
 0x79b   : > { %v8348_v46 = vpop.eup %8347  ;;  %v1556_v47 = vmul.f32 %v8346_v45, %v8338_v20 }
 0x79c   : > { %v1557_v48 = vmul.f32 %v8348_v46, %v8340_v21 }
 0x79d   : > { %v1560_v49 = vpack.c.bf16 %v1556_v47, %v1556_v47 }
 0x79e   : > { %v1561_v50 = vpack.c.bf16 %v1557_v48, %v1557_v48 }
 0x79f   : > { %8014 = vmatmul.mubr.msk.bf16.vlgmr.msra.gmra.mrb[12].mxu1 %vm1318_vm7, %v1560_v49 }
 0x7a0   : > { %8020 = vmatmul.mubr.msk.bf16.vlgmr.msra.gmra.mrb[16].mxu0 %vm1318_vm7, %v1561_v50  ;;  %8027 = vmatprep.mubr.msk.bf16.mxu1 %vm8611_vm6, %v8610_v27 }
 0x7a1   : > { %8024 = vmatpush3.bf16.msra.mxu1 %v8203_v51 }
 0x7a2   : > { %8025 = vmatprep.subr.bf16.mxu1 %v8610_v27 }
 0x7a5   : > { %8026 = vmatpush3.bf16.msra.mxu1 %v8204_v28 }
 0x86a   : > { %v1603_v52 = vpop.f32.mrb[8].mxu1 }
 0x86b   : > { %v1649_v53 = vpop.f32.mrb[12].mxu0  ;;  %v8003_v55 = vpop.f32.mrb[9].mxu1 }
 0x86c   : > { %v8009_v56 = vpop.f32.mrb[13].mxu0  ;;  %v1606_v57 = vpop.f32.mrb[10].mxu1 }
 0x86d   : > { %v1652_v59 = vpop.f32.mrb[14].mxu0  ;;  %v8004_v60 = vpop.f32.mrb[11].mxu1 }
 0x86e   : > { %v8010_v61 = vpop.f32.mrb[15].mxu0 }
 0x872   : > { %v1695_v63 = vpop.f32.mrb[12].mxu1 }
 0x873   : > { %v1747_v0 = vcombine.low %v1603_v52, %v1695_v63  ;;  %v1748_v1 = vcombine.high %v1603_v52, %v1695_v63  ;;  %v1741_v2 = vpop.f32.mrb[16].mxu0  ;;  %v8015_v3 = vpop.f32.mrb[13].mxu1 }
 0x874   : > { %v1763_v4 = vcombine.low %v1649_v53, %v1741_v2  ;;  %v1764_v6 = vcombine.high %v1649_v53, %v1741_v2  ;;  %v8021_v7 = vpop.f32.mrb[17].mxu0  ;;  %v1698_v8 = vpop.f32.mrb[14].mxu1 }
 0x875   : > { %v1755_v27 = vrot.slane %v1747_v0, %v8841_v62  ;;  %v1762_v9 = vrot.slane %v1748_v1, %v8841_v62  ;;  %v1744_v14 = vpop.f32.mrb[18].mxu0  ;;  %v8016_v15 = vpop.f32.mrb[15].mxu1  ;;  %v7137_v1 = vld [vmem:[%s8769_s30 + $0x3] ss:$0 sm:$0xff] }
 0x876   : > { %v1771_v16 = vrot.slane %v1763_v4, %v8841_v62  ;;  %v1778_v17 = vrot.slane %v1764_v6, %v8841_v62  ;;  %v8022_v18 = vpop.f32.mrb[19].mxu0 }
 0x877   : > { %v1994_v18 = vld [vmem:[%s8774_s11] sm:$0xff] }
 0x878   : > { %v1779_v19 = vcombine.low %v1755_v27, %v1771_v16  ;;  %v1780_v20 = vcombine.high %v1755_v27, %v1771_v16  ;;  %v1795_v21 = vcombine.low %v1762_v9, %v1778_v17  ;;  %v1796_v26 = vcombine.high %v1762_v9, %v1778_v17 }
 0x87a   : > { %v1787_v29 = vrot.slane %v1779_v19, %v8844_v5  ;;  %v1794_v30 = vrot.slane %v1780_v20, %v8844_v5  ;;  %v1803_v31 = vrot.slane %v1795_v21, %v8844_v5  ;;  %v1810_v32 = vrot.slane %v1796_v26, %v8844_v5  ;;  %v2002_v19 = vld [vmem:[%s8774_s11 + $0x40] sm:$0xff]  ;;  %v1995_v20 = vld [vmem:[%s8774_s11 + $0x8] sm:$0xff] }
 0x87b   : > { %v7144_v21 = vcombine.high %v1994_v18, %v2002_v19  ;;  %v2003_v26 = vld [vmem:[%s8774_s11 + $0x48] sm:$0xff]  ;;  %v7143_v28 = vcombine.low %v1994_v18, %v2002_v19  ;;  %v2022_v18 = vld [vmem:[%s8774_s11 + $0xe0] sm:$0xff] }
 0x87c   : > { %v1815_v33 = vcombine.low %v1787_v29, %v1794_v30  ;;  %v7131_v34 = vcombine.high %v1787_v29, %v1794_v30  ;;  %v1831_v35 = vcombine.low %v1803_v31, %v1810_v32  ;;  %v7132_v36 = vcombine.high %v1803_v31, %v1810_v32  ;;  %v2010_v31 = vld [vmem:[%s8774_s11 + $0x80] sm:$0xff]  ;;  %v2015_v19 = vld [vmem:[%s8774_s11 + $0xa8] sm:$0xff] }
 0x87d   : > { %v7145_v29 = vcombine.low %v1995_v20, %v2003_v26  ;;  %v7146_v30 = vcombine.high %v1995_v20, %v2003_v26  ;;  %2273 = vmatprep.subr.bf16.mxu0 %v7144_v21  ;;  %v2018_v32 = vld [vmem:[%s8774_s11 + $0xc0] sm:$0xff]  ;;  %v2023_v20 = vld [vmem:[%s8774_s11 + $0xe8] sm:$0xff] }
 0x87e   : > { %v1822_v37 = vrot.slane %v1815_v33, %v8841_v62  ;;  %v1830_v40 = vrot.slane %v7131_v34, %v8841_v62  ;;  %v1838_v41 = vrot.slane %v1831_v35, %v8841_v62  ;;  %v1846_v42 = vrot.slane %v7132_v36, %v8841_v62  ;;  %2274 = vmatpush1.bf16.msra.mxu0 %v7143_v28  ;;  %v2011_v33 = vld [vmem:[%s8774_s11 + $0x88] sm:$0xff] }
 0x87f   : > { %2314 = vmatprep.subr.bf16.mxu1 %v7146_v30  ;;  %v7160_v34 = vcombine.high %v2010_v31, %v2018_v32  ;;  %v2019_v35 = vld [vmem:[%s8774_s11 + $0xc8] sm:$0xff]  ;;  %v7159_v36 = vcombine.low %v2010_v31, %v2018_v32  ;;  %v2000_v30 = vld [vmem:[%s8774_s11 + $0x30] sm:$0xff]  ;;  %v2001_v32 = vld [vmem:[%s8774_s11 + $0x38] sm:$0xff] }
 0x880   : > { %v1848_v43 = vcombine.high %v1822_v37, %v1830_v40  ;;  %v1864_v44 = vcombine.high %v1838_v41, %v1846_v42  ;;  %v1847_v45 = vcombine.low %v1822_v37, %v1830_v40  ;;  %v1863_v46 = vcombine.low %v1838_v41, %v1846_v42  ;;  %v1996_v41 = vld [vmem:[%s8774_s11 + $0x10] sm:$0xff] }
 0x881   : > { %v7161_v37 = vcombine.low %v2011_v33, %v2019_v35  ;;  %v7162_v40 = vcombine.high %v2011_v33, %v2019_v35  ;;  %2275 = vmatprep.subr.bf16.mxu0 %v7160_v34  ;;  %v2004_v42 = vld [vmem:[%s8774_s11 + $0x50] sm:$0xff]  ;;  %v2009_v33 = vld [vmem:[%s8774_s11 + $0x78] sm:$0xff]  ;;  %v7169_v35 = vcombine.low %v2015_v19, %v2023_v20 }
 0x882   : > { %v1862_v47 = vrot.slane %v1848_v43, %v8844_v5  ;;  %v1878_v48 = vrot.slane %v1864_v44, %v8844_v5  ;;  %v1855_v49 = vrot.slane %v1847_v45, %v8844_v5  ;;  %v1871_v50 = vrot.slane %v1863_v46, %v8844_v5  ;;  %2276 = vmatpush1.bf16.msra.mxu0 %v7159_v36  ;;  %v1997_v43 = vld [vmem:[%s8774_s11 + $0x18] sm:$0xff]  ;;  %v2008_v31 = vld [vmem:[%s8774_s11 + $0x70] sm:$0xff] }
 0x883   : > { %v7148_v44 = vcombine.high %v1996_v41, %v2004_v42  ;;  %v2005_v45 = vld [vmem:[%s8774_s11 + $0x58] sm:$0xff]  ;;  %v8618_v46 = vmov 0   ;;  %v7156_v36 = vcombine.high %v2000_v30, %v2008_v31 }
 0x884   : > { %v1881_v51 = vcombine.low %v1862_v47, %v1878_v48  ;;  %v1880_v52 = vcombine.high %v1855_v49, %v1871_v50  ;;  %v1882_v53 = vcombine.high %v1862_v47, %v1878_v48  ;;  %v1879_v55 = vcombine.low %v1855_v49, %v1871_v50  ;;  %2305 = vmatprep.mubr.bf16.mxu0 %v8618_v46 }
 0x885   : > { %v7147_v47 = vcombine.low %v1996_v41, %v2004_v42  ;;  %v7149_v48 = vcombine.low %v1997_v43, %v2005_v45  ;;  %v7150_v49 = vcombine.high %v1997_v43, %v2005_v45  ;;  %2355 = vmatprep.subr.bf16.mxu0 %v7148_v44  ;;  %v2024_v41 = vld [vmem:[%s8774_s11 + $0xf0] sm:$0xff]  ;;  %v2017_v42 = vld [vmem:[%s8774_s11 + $0xb8] sm:$0xff]  ;;  %v7155_v44 = vcombine.low %v2000_v30, %v2008_v31  ;;  %v8237_v31 = vld [vmem:[%s8784_s0 + $0x140] sm:$0xff]  }
 0x886   : > { %1888 = vrot.lane.b32.xlu1 %v1881_v51, %s8615_s10  ;;  %1884 = vrot.lane.b32.xlu0 %v1880_v52, %s8616_s13  ;;  %v2025_v43 = vld [vmem:[%s8774_s11 + $0xf8] sm:$0xff]  ;;  %v7157_v45 = vcombine.low %v2001_v32, %v2009_v33 }
 0x887   : > { %v8236_v30 = vld [vmem:[%s8784_s0 + $0xb8] sm:$0xff]  }
 0x88a   : > { %1892 = vrot.lane.b32.xlu1 %v1882_v53, %s8617_s20 }
 0x8f8   : > { %v1889_v56 = vpop.permute.xlu1 %1888  ;;  %v1885_v57 = vpop.permute.xlu0 %1884 }
 0x8f9   : > { %v1895_v59 = vsel %vm1318_vm7, %v1879_v55, %v1885_v57  ;;  %v7141_v55 = vld [vmem:[%s8769_s30 + $0x4] ss:$0 sm:$0xff]  ;;  %v7142_v57 = vld [vmem:[%s8769_s30 + $0x5] ss:$0 sm:$0xff] }
 0x8fa   : > { %v1897_v61 = vsel %vm1896_vm10, %v1895_v59, %v1889_v56 }
 0x8fc   : > { %v1893_v60 = vpop.permute.xlu1 %1892 }
 0x8fd   : > { %v1899_v63 = vsel %vm1898_vm11, %v1897_v61, %v1893_v60  ;;  %v2012_v60 = vld [vmem:[%s8774_s11 + $0x90] sm:$0xff] }
 0x8fe   : > { %v1900_v0 = vpack.c.bf16 %v1899_v63, %v1899_v63  ;;  %v2020_v61 = vld [vmem:[%s8774_s11 + $0xd0] sm:$0xff]  ;;  %v2013_v63 = vld [vmem:[%s8774_s11 + $0x98] sm:$0xff] }
 0x900   : > { %8028 = vmatmul.mubr.msk.bf16.vlgmr.msra.gmra.mrb[16].mxu1 %vm697_vm5, %v1900_v0  ;;  %v2021_v0 = vld [vmem:[%s8774_s11 + $0xd8] sm:$0xff] }
 0x901   : > { %2315 = vmatpush1.bf16.msra.mxu1 %v7145_v29  ;;  %2346 = vmatprep.mubr.bf16.mxu1 %v8618_v46  ;;  %v7170_v29 = vcombine.high %v2015_v19, %v2023_v20  ;;  %v8230_v19 = vld [vmem:[%s8784_s0 + $0xf0] sm:$0xff]  }
 0x902   : > { %2316 = vmatprep.subr.bf16.mxu1 %v7162_v40  ;;  %v2016_v40 = vld [vmem:[%s8774_s11 + $0xb0] sm:$0xff] }
 0x903   : > { %v8231_v20 = vld [vmem:[%s8784_s0 + $0x30] sm:$0xff]  }
 0x905   : > { %2317 = vmatpush1.bf16.msra.mxu1 %v7161_v37  ;;  %v7158_v37 = vcombine.high %v2001_v32, %v2009_v33  ;;  %v8238_v32 = vld [vmem:[%s8784_s0 + $0x1c0] sm:$0xff]   ;;  %v2056_v33 = vsub.s32 6, %v8838_v58 }
 0x906   : > { %2396 = vmatprep.subr.bf16.mxu1 %v7150_v49  ;;  %v7171_v49 = vcombine.low %v2016_v40, %v2024_v41 }
 0x9d3   : > { %v1960_v2 = vpop.f32.mrb[16].mxu1 }
 0x9d4   : > { %v1961_v3 = vadd.f32 %v7137_v1, %v1960_v2  ;;  %v8029_v4 = vpop.f32.mrb[17].mxu1 }
 0x9d5   : > { %v1963_v6 = vpop.f32.mrb[18].mxu1  ;;  %v7166_v4 = vcombine.high %v2013_v63, %v2021_v0 }
 0x9d6   : > { %v1966_v7 = vadd.f32 %v1961_v3, %v8825_v38  ;;  %v8030_v8 = vpop.f32.mrb[19].mxu1  ;;  %v7164_v3 = vcombine.high %v2012_v60, %v2020_v61  ;;  %v1998_v6 = vld [vmem:[%s8774_s11 + $0x20] sm:$0xff] }
 0x9d7   : > { %v1999_v8 = vld [vmem:[%s8774_s11 + $0x28] sm:$0xff] }
 0x9d8   : > { %v1969_v27 = vsel %vm697_vm5, %v1966_v7, 0.0 }
 0x9d9   : > { %1970 = vadd.xlane.f32.xlu0 %v1969_v27  ;;  %v2007_v27 = vld [vmem:[%s8774_s11 + $0x68] sm:$0xff] }
 0x9da   : > { %v7153_v26 = vcombine.low %v1999_v8, %v2007_v27 }
 0xa66   : > { %v1971_v9 = vpop.xlane.xlu0 %1970 }
 0xa67   : > { %v1973_v14 = vmul.f32 0.03125, %v1971_v9  ;;  %v7163_v9 = vcombine.low %v2012_v60, %v2020_v61  ;;  %v8213_v60 = vld [vmem:[%s8784_s0 + $0x50] sm:$0xff]  }
 0xa68   : > { %v8214_v61 = vld [vmem:[%s8784_s0 + $0xd0] sm:$0xff]  }
 0xa69   : > { %v1974_v15 = vsub.f32 %v1966_v7, %v1973_v14  ;;  %v2006_v7 = vld [vmem:[%s8774_s11 + $0x60] sm:$0xff]  ;;  %v7165_v14 = vcombine.low %v2013_v63, %v2021_v0  ;;  %v8215_v63 = vld [vmem:[%s8784_s0 + $0x10] sm:$0xff]  }
 0xa6a   : > { %v7151_v21 = vcombine.low %v1998_v6, %v2006_v7  ;;  %v8216_v0 = vld [vmem:[%s8784_s0 + $0x90] sm:$0xff]  }
 0xa6b   : > { %v1975_v16 = vmul.f32 %v1974_v15, %v1974_v15 }
 0xa6d   : > { %v1976_v17 = vsel %vm697_vm5, %v1975_v16, 0.0  ;;  %v7154_v16 = vcombine.high %v1999_v8, %v2007_v27  ;;  %v8222_v8 = vld [vmem:[%s8784_s0 + $0xe0] sm:$0xff]  }
 0xa6e   : > { %1977 = vadd.xlane.f32.xlu1 %v1976_v17  ;;  %v2014_v17 = vld [vmem:[%s8774_s11 + $0xa0] sm:$0xff] }
 0xa6f   : > { %v7168_v28 = vcombine.high %v2014_v17, %v2022_v18  ;;  %v7167_v34 = vcombine.low %v2014_v17, %v2022_v18  ;;  %v8223_v27 = vld [vmem:[%s8784_s0 + $0x20] sm:$0xff]   ;;  %v8228_v17 = vld [vmem:[%s8784_s0 + $0xa8] sm:$0xff]   ;;  %v8229_v18 = vld [vmem:[%s8784_s0 + $0x70] sm:$0xff]  }
 0xafb   : > { %v1978_v50 = vpop.xlane.xlu1 %1977 }
 0xafc   : > { %v1979_v51 = vmul.f32 0.03125, %v1978_v50  ;;  %v7173_v50 = vcombine.low %v2017_v42, %v2025_v43 }
 0xafe   : > { %v1980_v52 = vadd.f32 1e-05, %v1979_v51  ;;  %v8205_v51 = vld [vmem:[%s8784_s0 + $0x40] sm:$0xff]  }
 0xb00   : > { %8349 = vrsqrt.f32 %v1980_v52  ;;  %v8206_v52 = vld [vmem:[%s8784_s0 + $0xc0] sm:$0xff]  }
 0xb0a   : > { %v8350_v53 = vpop.eup %8349 }
 0xb0b   : > { %v1982_v56 = vmul.f32 %v8350_v53, %v1974_v15  ;;  %v7152_v15 = vcombine.high %v1998_v6, %v2006_v7  ;;  %v8207_v53 = vld [vmem:[%s8784_s0] sm:$0xff]   ;;  %v8220_v6 = vld [vmem:[%s8784_s0 + $0x98] sm:$0xff]  }
 0xb0c   : > { %v8221_v7 = vld [vmem:[%s8784_s0 + $0x60] sm:$0xff]  }
 0xb0d   : > { %v1987_v59 = vmul.f32 %v7141_v55, %v1982_v56  ;;  %v8208_v55 = vld [vmem:[%s8784_s0 + $0x80] sm:$0xff]   ;;  %v8209_v56 = vld [vmem:[%s8784_s0 + $0x48] sm:$0xff]  }
 0xb0f   : > { %v9034_v1 = vadd.f32 %v7142_v57, %v1987_v59  ;;  %v8210_v57 = vld [vmem:[%s8784_s0 + $0xc8] sm:$0xff]  }
 0xb10   : > { %v8212_v59 = vld [vmem:[%s8784_s0 + $0x88] sm:$0xff]  }
 0xb11   : > { %v9038_v2 = vpack.c.bf16 %v9034_v1, %v9034_v1 }
 0xb13   : > { %7175 = vmatmul.mubr.msk.bf16.vlgmr.msra.gmra.mrb[20].mxu0 %vm697_vm5, %v9038_v2  ;;  %7176 = vmatmul.mubr.msk.bf16.vlgmr.msra.gmra.mrb[20].mxu1 %vm697_vm5, %v9038_v2 }
 0xb14   : > { %2356 = vmatpush1.bf16.msra.mxu0 %v7147_v47  ;;  %2397 = vmatpush1.bf16.msra.mxu1 %v7149_v48  ;;  %v7172_v47 = vcombine.high %v2016_v40, %v2024_v41  ;;  %v7174_v48 = vcombine.high %v2017_v42, %v2025_v43  ;;  %v9124_v40 = vld [vmem:[%s8779_s22] sm:$0xff]  ;;  %v2036_v41 = vsub.s32 1, %v8838_v58  ;;  %v2044_v42 = vsub.s32 3, %v8838_v58 }
 0xb15   : > { %2357 = vmatprep.subr.bf16.mxu0 %v7164_v3  ;;  %2398 = vmatprep.subr.bf16.mxu1 %v7166_v4  ;;  %v8218_v3 = vld [vmem:[%s8784_s0 + $0xd8] sm:$0xff]  }
 0xb16   : > { %2387 = vmatprep.mubr.bf16.mxu0 %v8618_v46  ;;  %2428 = vmatprep.mubr.bf16.mxu1 %v8618_v46  ;;  %v8219_v4 = vld [vmem:[%s8784_s0 + $0x18] sm:$0xff]  }
 0xb18   : > { %2358 = vmatpush1.bf16.msra.mxu0 %v7163_v9  ;;  %2399 = vmatpush1.bf16.msra.mxu1 %v7165_v14  ;;  %v8224_v9 = vld [vmem:[%s8784_s0 + $0xa0] sm:$0xff]   ;;  %v8225_v14 = vld [vmem:[%s8784_s0 + $0x68] sm:$0xff]  }
 0xb19   : > { %2437 = vmatprep.subr.bf16.mxu0 %v7152_v15  ;;  %2478 = vmatprep.subr.bf16.mxu1 %v7154_v16  ;;  %v8226_v15 = vld [vmem:[%s8784_s0 + $0xe8] sm:$0xff]  }
 0xb1a   : > { %v8227_v16 = vld [vmem:[%s8784_s0 + $0x28] sm:$0xff]  }
 0xb1b   : > { %7177 = vmatmul.mubr.msk.bf16.vlgmr.msra.gmra.mrb[24].mxu0 %vm697_vm5, %v9038_v2  ;;  %7178 = vmatmul.mubr.msk.bf16.vlgmr.msra.gmra.mrb[24].mxu1 %vm697_vm5, %v9038_v2 }
 0xb1c   : > { %2438 = vmatpush1.bf16.msra.mxu0 %v7151_v21  ;;  %2479 = vmatpush1.bf16.msra.mxu1 %v7153_v26  ;;  %v8232_v21 = vld [vmem:[%s8784_s0 + $0xb0] sm:$0xff]   ;;  %v8233_v26 = vld [vmem:[%s8784_s0 + $0x78] sm:$0xff]  }
 0xb1d   : > { %2439 = vmatprep.subr.bf16.mxu0 %v7168_v28  ;;  %2480 = vmatprep.subr.bf16.mxu1 %v7170_v29  ;;  %v8234_v28 = vld [vmem:[%s8784_s0 + $0xf8] sm:$0xff]  }
 0xb1e   : > { %2469 = vmatprep.mubr.bf16.mxu0 %v8618_v46  ;;  %2510 = vmatprep.mubr.bf16.mxu1 %v8618_v46  ;;  %v8235_v29 = vld [vmem:[%s8784_s0 + $0x38] sm:$0xff]  }
 0xb20   : > { %2440 = vmatpush1.bf16.msra.mxu0 %v7167_v34  ;;  %2481 = vmatpush1.bf16.msra.mxu1 %v7169_v35  ;;  %v9114_v34 = vld [vmem:[%s8779_s22 + $0x8] sm:$0xff] }
 0xb21   : > { %2519 = vmatprep.subr.bf16.mxu0 %v7156_v36  ;;  %2560 = vmatprep.subr.bf16.mxu1 %v7158_v37  ;;  %v9119_v35 = vrot.slane %v9114_v34, %v2056_v33  ;;  %v2032_v36 = vsub.s32 0, %v8838_v58  ;;  %v2040_v37 = vsub.s32 2, %v8838_v58 }
 0xb23   : > { %7179 = vmatmul.mubr.msk.bf16.vlgmr.msra.gmra.mrb[28].mxu0 %vm697_vm5, %v9038_v2  ;;  %7180 = vmatmul.mubr.msk.bf16.vlgmr.msra.gmra.mrb[28].mxu1 %vm697_vm5, %v9038_v2  ;;  %v2033_v43 = vrot.slane %v9124_v40, %v2032_v36 }
 0xb24   : > { %2520 = vmatpush1.bf16.msra.mxu0 %v7155_v44  ;;  %2561 = vmatpush1.bf16.msra.mxu1 %v7157_v45  ;;  %v2041_v44 = vrot.slane %v9124_v40, %v2040_v37  ;;  %v2037_v45 = vrot.slane %v9124_v40, %v2036_v41 }
 0xb25   : > { %2521 = vmatprep.subr.bf16.mxu0 %v7172_v47  ;;  %2562 = vmatprep.subr.bf16.mxu1 %v7174_v48  ;;  %v2045_v47 = vrot.slane %v9124_v40, %v2044_v42 }
 0xb26   : > { %2551 = vmatprep.mubr.bf16.mxu0 %v8618_v46  ;;  %2592 = vmatprep.mubr.bf16.mxu1 %v8618_v46  ;;  %v8211_v46 = vld [vmem:[%s8784_s0 + $0x8] sm:$0xff]  }
 0xb28   : > { %2522 = vmatpush1.bf16.msra.mxu0 %v7171_v49  ;;  %2563 = vmatpush1.bf16.msra.mxu1 %v7173_v50 }
 0xb29   : > { %7555 = vmatprep.subr.bf16.mxu0 %v8205_v51  ;;  %7577 = vmatprep.subr.bf16.mxu1 %v8206_v52 }
 0xb2b   : > { %7181 = vmatmul.mubr.msk.bf16.vlgmr.msra.gmra.mrb[32].mxu0 %vm697_vm5, %v9038_v2  ;;  %7182 = vmatmul.mubr.msk.bf16.vlgmr.msra.gmra.mrb[32].mxu1 %vm697_vm5, %v9038_v2  ;;  %v8217_v2 = vld [vmem:[%s8784_s0 + $0x58] sm:$0xff]  }
 0xb2c   : > { %7556 = vmatpush3.bf16.msra.mxu0 %v8207_v53  ;;  %7578 = vmatpush3.bf16.msra.mxu1 %v8208_v55 }
 0xb2d   : > { %7557 = vmatprep.subr.bf16.mxu0 %v8209_v56  ;;  %7579 = vmatprep.subr.bf16.mxu1 %v8210_v57 }
 0xb30   : > { %7558 = vmatpush3.bf16.msra.mxu0 %v8211_v46  ;;  %7580 = vmatpush3.bf16.msra.mxu1 %v8212_v59  ;;  %v2052_v59 = vsub.s32 5, %v8838_v58 }
 0xb31   : > { %7559 = vmatprep.subr.bf16.mxu0 %v8213_v60  ;;  %7581 = vmatprep.subr.bf16.mxu1 %v8214_v61  ;;  %v2060_v60 = vsub.s32 7, %v8838_v58 }
 0xb34   : > { %7560 = vmatpush3.bf16.msra.mxu0 %v8215_v63  ;;  %7582 = vmatpush3.bf16.msra.mxu1 %v8216_v0 }
 0xb35   : > { %7561 = vmatprep.subr.bf16.mxu0 %v8217_v2  ;;  %7583 = vmatprep.subr.bf16.mxu1 %v8218_v3 }
 0xb38   : > { %7562 = vmatpush3.bf16.msra.mxu0 %v8219_v4  ;;  %7584 = vmatpush3.bf16.msra.mxu1 %v8220_v6 }
 0xb39   : > { %7563 = vmatprep.subr.bf16.mxu0 %v8221_v7  ;;  %7585 = vmatprep.subr.bf16.mxu1 %v8222_v8  ;;  %v2053_v8 = vrot.slane %v9124_v40, %v2052_v59 }
 0xb3c   : > { %7564 = vmatpush3.bf16.msra.mxu0 %v8223_v27  ;;  %7586 = vmatpush3.bf16.msra.mxu1 %v8224_v9  ;;  %v2061_v27 = vrot.slane %v9124_v40, %v2060_v60  ;;  %v8239_v9 = vld [vmem:[%s8784_s0 + $0x100] sm:$0xff]  }
 0xb3d   : > { %7565 = vmatprep.subr.bf16.mxu0 %v8225_v14  ;;  %7587 = vmatprep.subr.bf16.mxu1 %v8226_v15  ;;  %v8240_v14 = vld [vmem:[%s8784_s0 + $0x180] sm:$0xff]  }
 0xb40   : > { %7566 = vmatpush3.bf16.msra.mxu0 %v8227_v16  ;;  %7588 = vmatpush3.bf16.msra.mxu1 %v8228_v17  ;;  %v8241_v17 = vld [vmem:[%s8784_s0 + $0x148] sm:$0xff]  }
 0xb41   : > { %7567 = vmatprep.subr.bf16.mxu0 %v8229_v18  ;;  %7589 = vmatprep.subr.bf16.mxu1 %v8230_v19  ;;  %v8242_v18 = vld [vmem:[%s8784_s0 + $0x1c8] sm:$0xff]  }
 0xb44   : > { %7568 = vmatpush3.bf16.msra.mxu0 %v8231_v20  ;;  %7590 = vmatpush3.bf16.msra.mxu1 %v8232_v21 }
 0xb45   : > { %7569 = vmatprep.subr.bf16.mxu0 %v8233_v26  ;;  %7591 = vmatprep.subr.bf16.mxu1 %v8234_v28 }
 0xb48   : > { %7570 = vmatpush3.bf16.msra.mxu0 %v8235_v29  ;;  %7592 = vmatpush3.bf16.msra.mxu1 %v8236_v30 }
 0xb49   : > { %7599 = vmatprep.subr.bf16.mxu0 %v8237_v31  ;;  %7621 = vmatprep.subr.bf16.mxu1 %v8238_v32  ;;  %v8243_v32 = vld [vmem:[%s8784_s0 + $0x108] sm:$0xff]  }
 0xbe6   : > { %v2307_v48 = vpop.f32.mrb[20].mxu0  ;;  %v2348_v49 = vpop.f32.mrb[20].mxu1 }
 0xbe7   : > { %v2308_v50 = vadd.f32 %v2307_v48, %v2033_v43  ;;  %v2349_v51 = vadd.f32 %v2348_v49, %v2041_v44  ;;  %v2309_v52 = vpop.f32.mrb[21].mxu0  ;;  %v2350_v53 = vpop.f32.mrb[21].mxu1  ;;  %v8244_v43 = vld [vmem:[%s8784_s0 + $0x188] sm:$0xff]   ;;  %v8246_v48 = vld [vmem:[%s8784_s0 + $0x1d0] sm:$0xff]  }
 0xbe8   : > { %v2310_v55 = vadd.f32 %v2309_v52, %v2037_v45  ;;  %v2351_v56 = vadd.f32 %v2350_v53, %v2045_v47  ;;  %v2311_v57 = vpop.f32.mrb[22].mxu0  ;;  %v2352_v46 = vpop.f32.mrb[22].mxu1  ;;  %v8245_v47 = vld [vmem:[%s8784_s0 + $0x150] sm:$0xff]   ;;  %v2073_v52 = vrot.slane %v9114_v34, %v2040_v37 }
 0xbe9   : > { %v2601_v61 = vmax.f32 %v2308_v50, 0.0  ;;  %v2603_v63 = vmax.f32 %v2349_v51, 0.0  ;;  %v2312_v0 = vpop.f32.mrb[23].mxu0  ;;  %v2353_v2 = vpop.f32.mrb[23].mxu1  ;;  %v2065_v51 = vrot.slane %v9114_v34, %v2032_v36  ;;  %v8248_v57 = vld [vmem:[%s8784_s0 + $0x190] sm:$0xff]   ;;  %v8249_v46 = vld [vmem:[%s8784_s0 + $0x158] sm:$0xff]  }
 0xbea   : > { %v2602_v3 = vmax.f32 %v2310_v55, 0.0  ;;  %v2604_v4 = vmax.f32 %v2351_v56, 0.0  ;;  %v8247_v56 = vld [vmem:[%s8784_s0 + $0x110] sm:$0xff]  }
 0xbeb   : > { %v2617_v15 = vpack.c.bf16 %v2601_v61, %v2601_v61  ;;  %v2619_v16 = vpack.c.bf16 %v2603_v63, %v2603_v63  ;;  %v8250_v61 = vld [vmem:[%s8784_s0 + $0x1d8] sm:$0xff]  }
 0xbec   : > { %v2618_v6 = vpack.c.bf16 %v2602_v3, %v2602_v3  ;;  %v2620_v7 = vpack.c.bf16 %v2604_v4, %v2604_v4 }
 0xbee   : > { %v9148_v19 = vpop.f32.mrb[24].mxu0  ;;  %v9150_v20 = vpop.f32.mrb[24].mxu1  ;;  %3694 = vmatprep.mubr.bf16.mxu0 %v2618_v6  ;;  %3734 = vmatprep.mubr.bf16.mxu1 %v2620_v7  ;;  %v8251_v7 = vld [vmem:[%s8784_s0 + $0x118] sm:$0xff]  }
 0xbef   : > { %v2391_v21 = vpop.f32.mrb[25].mxu0  ;;  %v2432_v26 = vpop.f32.mrb[25].mxu1  ;;  %3695 = vmatmul.mubr.bf16.vlgmr.msra.gmra.mrb[36].mxu0 %v2617_v15  ;;  %3735 = vmatmul.mubr.bf16.vlgmr.msra.gmra.mrb[36].mxu1 %v2619_v16  ;;  %v8253_v15 = vld [vmem:[%s8784_s0 + $0x160] sm:$0xff]  }
 0xbf0   : > { %v2392_v28 = vadd.f32 %v2391_v21, %v2053_v8  ;;  %v2433_v29 = vadd.f32 %v2432_v26, %v2061_v27  ;;  %7600 = vmatpush3.bf16.msra.mxu0 %v8239_v9  ;;  %7622 = vmatpush3.bf16.msra.mxu1 %v8240_v14  ;;  %v2393_v30 = vpop.f32.mrb[26].mxu0  ;;  %v2434_v31 = vpop.f32.mrb[26].mxu1  ;;  %v8252_v8 = vld [vmem:[%s8784_s0 + $0x198] sm:$0xff]   ;;  %v2048_v27 = vsub.s32 4, %v8838_v58  ;;  %v8254_v16 = vld [vmem:[%s8784_s0 + $0x1e0] sm:$0xff]   ;;  %v8257_v26 = vld [vmem:[%s8784_s0 + $0x168] sm:$0xff]  }
 0xbf1   : > { %v2394_v44 = vpop.f32.mrb[27].mxu0  ;;  %v2435_v45 = vpop.f32.mrb[27].mxu1  ;;  %7601 = vmatprep.subr.bf16.mxu0 %v8241_v17  ;;  %7623 = vmatprep.subr.bf16.mxu1 %v8242_v18  ;;  %v8255_v18 = vld [vmem:[%s8784_s0 + $0x120] sm:$0xff]  }
 0xbf2   : > { %v2606_v49 = vmax.f32 %v2392_v28, 0.0  ;;  %v2608_v50 = vmax.f32 %v2433_v29, 0.0  ;;  %v2081_v17 = vrot.slane %v9114_v34, %v2048_v27  ;;  %v8256_v21 = vld [vmem:[%s8784_s0 + $0x1a0] sm:$0xff]   ;;  %v8258_v28 = vld [vmem:[%s8784_s0 + $0x1e8] sm:$0xff]  }
 0xbf4   : > { %v2622_v53 = vpack.c.bf16 %v2606_v49, %v2606_v49  ;;  %v2624_v55 = vpack.c.bf16 %v2608_v50, %v2608_v50  ;;  %7602 = vmatpush3.bf16.msra.mxu0 %v8243_v32  ;;  %7624 = vmatpush3.bf16.msra.mxu1 %v8244_v43  ;;  %v8260_v49 = vld [vmem:[%s8784_s0 + $0x1a8] sm:$0xff]   ;;  %v2049_v50 = vrot.slane %v9124_v40, %v2048_v27 }
 0xbf5   : > { %7603 = vmatprep.subr.bf16.mxu0 %v8245_v47  ;;  %7625 = vmatprep.subr.bf16.mxu1 %v8246_v48  ;;  %v8259_v48 = vld [vmem:[%s8784_s0 + $0x128] sm:$0xff]  }
 0xbf6   : > { %v2471_v63 = vpop.f32.mrb[28].mxu0  ;;  %v2512_v0 = vpop.f32.mrb[28].mxu1  ;;  %3774 = vmatprep.mubr.bf16.mxu0 %v2622_v53  ;;  %3814 = vmatprep.mubr.bf16.mxu1 %v2624_v55  ;;  %v8261_v53 = vld [vmem:[%s8784_s0 + $0x170] sm:$0xff]  }
 0xbf7   : > { %v9162_v36 = vadd.f32 %v2471_v63, %v2065_v51  ;;  %v9164_v37 = vadd.f32 %v2512_v0, %v2073_v52  ;;  %v2473_v2 = vpop.f32.mrb[29].mxu0  ;;  %v2514_v3 = vpop.f32.mrb[29].mxu1  ;;  %v8262_v55 = vld [vmem:[%s8784_s0 + $0x1f0] sm:$0xff]   ;;  %v8265_v63 = vld [vmem:[%s8784_s0 + $0x178] sm:$0xff]  }
 0xbf8   : > { %7604 = vmatpush3.bf16.msra.mxu0 %v8247_v56  ;;  %7626 = vmatpush3.bf16.msra.mxu1 %v8248_v57  ;;  %v2475_v4 = vpop.f32.mrb[30].mxu0  ;;  %v2516_v6 = vpop.f32.mrb[30].mxu1  ;;  %v2069_v56 = vrot.slane %v9114_v34, %v2036_v41  ;;  %v2077_v57 = vrot.slane %v9114_v34, %v2044_v42  ;;  %v8266_v41 = vld [vmem:[%s8784_s0 + $0x1f8] sm:$0xff]  }
 0xbf9   : > { %v2476_v9 = vpop.f32.mrb[31].mxu0  ;;  %v2517_v14 = vpop.f32.mrb[31].mxu1  ;;  %7605 = vmatprep.subr.bf16.mxu0 %v8249_v46  ;;  %7627 = vmatprep.subr.bf16.mxu1 %v8250_v61  ;;  %v2390_v46 = vadd.f32 %v9148_v19, %v2049_v50  ;;  %v8267_v42 = vld [vmem:[%s8784_s0 + $0x138] sm:$0xff]   ;;  %v8269_v19 = vld [vmem:[%s8784_s0 + $0x240] sm:$0xff]  }
 0xbfa   : > { %v2474_v0 = vadd.f32 %v2473_v2, %v2069_v56  ;;  %v2515_v4 = vadd.f32 %v2514_v3, %v2077_v57  ;;  %v8268_v6 = vld [vmem:[%s8784_s0 + $0x1b8] sm:$0xff]   ;;  %v8271_v2 = vld [vmem:[%s8784_s0 + $0x200] sm:$0xff]   ;;  %v8289_v56 = vld [vmem:[%s8784_s0 + $0x268] sm:$0xff]  }
 0xbfb   : > { %v8283_v50 = vld [vmem:[%s8784_s0 + $0x218] sm:$0xff]   ;;  %v8290_v57 = vld [vmem:[%s8784_s0 + $0x2e8] sm:$0xff]  }
 0xbfc   : > { %7606 = vmatpush3.bf16.msra.mxu0 %v8251_v7  ;;  %7628 = vmatpush3.bf16.msra.mxu1 %v8252_v8  ;;  %v2605_v7 = vmax.f32 %v2390_v46, 0.0  ;;  %v2610_v27 = vmax.f32 %v2474_v0, 0.0  ;;  %v2612_v9 = vmax.f32 %v2515_v4, 0.0  ;;  %v8293_v46 = vld [vmem:[%s8784_s0 + $0x270] sm:$0xff]  }
 0xbfd   : > { %7607 = vmatprep.subr.bf16.mxu0 %v8253_v15  ;;  %7629 = vmatprep.subr.bf16.mxu1 %v8254_v16  ;;  %v8272_v15 = vld [vmem:[%s8784_s0 + $0x280] sm:$0xff]   ;;  %v8295_v0 = vld [vmem:[%s8784_s0 + $0x230] sm:$0xff]  }
 0xbfe   : > { %v2553_v29 = vpop.f32.mrb[32].mxu0  ;;  %v2594_v30 = vpop.f32.mrb[32].mxu1  ;;  %v2621_v3 = vpack.c.bf16 %v2605_v7, %v2605_v7  ;;  %v2626_v16 = vpack.c.bf16 %v2610_v27, %v2610_v27  ;;  %v8296_v4 = vld [vmem:[%s8784_s0 + $0x2b0] sm:$0xff]   ;;  %v8302_v27 = vld [vmem:[%s8784_s0 + $0x3c0] sm:$0xff]  }
 0xbff   : > { %v9176_v31 = vadd.f32 %v2553_v29, %v2081_v17  ;;  %v9179_v32 = vadd.f32 %v2594_v30, %v9119_v35  ;;  %v9181_v43 = vpop.f32.mrb[33].mxu0  ;;  %v9183_v44 = vpop.f32.mrb[33].mxu1  ;;  %v2057_v35 = vrot.slane %v9124_v40, %v2056_v33  ;;  %v8263_v33 = vld [vmem:[%s8784_s0 + $0x130] sm:$0xff]   ;;  %v8273_v17 = vld [vmem:[%s8784_s0 + $0x248] sm:$0xff]  }
 0xc00   : > { %7608 = vmatpush3.bf16.msra.mxu0 %v8255_v18  ;;  %7630 = vmatpush3.bf16.msra.mxu1 %v8256_v21  ;;  %v2557_v45 = vpop.f32.mrb[34].mxu0  ;;  %v2598_v47 = vpop.f32.mrb[34].mxu1  ;;  %v8264_v40 = vld [vmem:[%s8784_s0 + $0x1b0] sm:$0xff]   ;;  %v8274_v18 = vld [vmem:[%s8784_s0 + $0x2c8] sm:$0xff]   ;;  %v2628_v21 = vpack.c.bf16 %v2612_v9, %v2612_v9 }
 0xc01   : > { %v2558_v51 = vpop.f32.mrb[35].mxu0  ;;  %v2599_v52 = vpop.f32.mrb[35].mxu1  ;;  %7609 = vmatprep.subr.bf16.mxu0 %v8257_v26  ;;  %7631 = vmatprep.subr.bf16.mxu1 %v8258_v28  ;;  %v2431_v61 = vadd.f32 %v9150_v20, %v2057_v35  ;;  %v8270_v20 = vld [vmem:[%s8784_s0 + $0x2c0] sm:$0xff]   ;;  %v8275_v26 = vld [vmem:[%s8784_s0 + $0x208] sm:$0xff]   ;;  %v8277_v29 = vld [vmem:[%s8784_s0 + $0x250] sm:$0xff]  }
 0xc02   : > { %v8276_v28 = vld [vmem:[%s8784_s0 + $0x288] sm:$0xff]   ;;  %v8278_v30 = vld [vmem:[%s8784_s0 + $0x2d0] sm:$0xff]   ;;  %v8284_v35 = vld [vmem:[%s8784_s0 + $0x298] sm:$0xff]  }
 0xc03   : > { %v2607_v8 = vmax.f32 %v2431_v61, 0.0  ;;  %v8279_v45 = vld [vmem:[%s8784_s0 + $0x210] sm:$0xff]   ;;  %v8285_v51 = vld [vmem:[%s8784_s0 + $0x260] sm:$0xff]  }
 0xc04   : > { %7610 = vmatpush3.bf16.msra.mxu0 %v8259_v48  ;;  %7632 = vmatpush3.bf16.msra.mxu1 %v8260_v49  ;;  %v8280_v47 = vld [vmem:[%s8784_s0 + $0x290] sm:$0xff]   ;;  %v8281_v48 = vld [vmem:[%s8784_s0 + $0x258] sm:$0xff]   ;;  %v8286_v52 = vld [vmem:[%s8784_s0 + $0x2e0] sm:$0xff]  }
 0xc05   : > { %7611 = vmatprep.subr.bf16.mxu0 %v8261_v53  ;;  %7633 = vmatprep.subr.bf16.mxu1 %v8262_v55  ;;  %v2623_v14 = vpack.c.bf16 %v2607_v8, %v2607_v8  ;;  %v8282_v49 = vld [vmem:[%s8784_s0 + $0x2d8] sm:$0xff]   ;;  %v8287_v53 = vld [vmem:[%s8784_s0 + $0x220] sm:$0xff]   ;;  %v8294_v61 = vld [vmem:[%s8784_s0 + $0x2f0] sm:$0xff]  }
 0xc06   : > { %v8288_v55 = vld [vmem:[%s8784_s0 + $0x2a0] sm:$0xff]   ;;  %v8299_v8 = vld [vmem:[%s8784_s0 + $0x238] sm:$0xff]  }
 0xc08   : > { %7612 = vmatpush3.bf16.msra.mxu0 %v8263_v33  ;;  %7634 = vmatpush3.bf16.msra.mxu1 %v8264_v40  ;;  %v8291_v33 = vld [vmem:[%s8784_s0 + $0x228] sm:$0xff]  }
 0xc09   : > { %7613 = vmatprep.subr.bf16.mxu0 %v8265_v63  ;;  %7635 = vmatprep.subr.bf16.mxu1 %v8266_v41  ;;  %v8292_v40 = vld [vmem:[%s8784_s0 + $0x2a8] sm:$0xff]   ;;  %v2085_v63 = vrot.slane %v9114_v34, %v2052_v59  ;;  %v2093_v41 = vrot.slane %v9114_v34, %v2060_v60  ;;  %v2609_v34 = vmax.f32 %v9162_v36, 0.0  ;;  %v8300_v60 = vld [vmem:[%s8784_s0 + $0x2b8] sm:$0xff]   ;;  %v8304_v36 = vld [vmem:[%s8784_s0 + $0x380] sm:$0xff]  }
 0xc0b   : > { %v2556_v7 = vadd.f32 %v9181_v43, %v2085_v63  ;;  %v2597_v59 = vadd.f32 %v9183_v44, %v2093_v41  ;;  %v8303_v43 = vld [vmem:[%s8784_s0 + $0x300] sm:$0xff]   ;;  %v2625_v44 = vpack.c.bf16 %v2609_v34, %v2609_v34  ;;  %v8330_v63 = vld [vmem:[%s8784_s0 + $0x3f8] sm:$0xff]  }
 0xc0c   : > { %7614 = vmatpush3.bf16.msra.mxu0 %v8267_v42  ;;  %7636 = vmatpush3.bf16.msra.mxu1 %v8268_v6  ;;  %v8297_v42 = vld [vmem:[%s8784_s0 + $0x278] sm:$0xff]   ;;  %v7183_v34 = vld [vmem:[%s8769_s30 + $0x6] ss:$0 sm:$0xff] }
 0xc0d   : > { %7643 = vmatprep.subr.bf16.mxu0 %v8269_v19  ;;  %7665 = vmatprep.subr.bf16.mxu1 %v8270_v20  ;;  %v8298_v6 = vld [vmem:[%s8784_s0 + $0x2f8] sm:$0xff]   ;;  %v8301_v19 = vld [vmem:[%s8784_s0 + $0x340] sm:$0xff]   ;;  %v2611_v20 = vmax.f32 %v9164_v37, 0.0  ;;  %v2614_v9 = vmax.f32 %v2556_v7, 0.0  ;;  %v8306_v37 = vld [vmem:[%s8784_s0 + $0x3c8] sm:$0xff]  }
 0xc0e   : > { %v8331_v41 = vld [vmem:[%s8784_s0 + $0x338] sm:$0xff]  }
 0xc0f   : > { %3775 = vmatmul.mubr.bf16.vlgmr.msra.gmra.mrb[40].mxu0 %v2621_v3  ;;  %3815 = vmatmul.mubr.bf16.vlgmr.msra.gmra.mrb[40].mxu1 %v2623_v14  ;;  %v2627_v3 = vpack.c.bf16 %v2611_v20, %v2611_v20  ;;  %v8305_v14 = vld [vmem:[%s8784_s0 + $0x348] sm:$0xff]  }
 0xc10   : > { %7644 = vmatpush3.bf16.msra.mxu0 %v8271_v2  ;;  %3854 = vmatprep.mubr.bf16.mxu0 %v2626_v16  ;;  %v2616_v2 = vmax.f32 %v2597_v59, 0.0 }
 0xc11   : > { %7666 = vmatpush3.bf16.msra.mxu1 %v8272_v15  ;;  %3894 = vmatprep.mubr.bf16.mxu1 %v2628_v21  ;;  %v2630_v15 = vpack.c.bf16 %v2614_v9, %v2614_v9  ;;  %v8309_v21 = vld [vmem:[%s8784_s0 + $0x350] sm:$0xff]  }
 0xc12   : > { %7645 = vmatprep.subr.bf16.mxu0 %v8273_v17  ;;  %7667 = vmatprep.subr.bf16.mxu1 %v8274_v18  ;;  %v2632_v16 = vpack.c.bf16 %v2616_v2, %v2616_v2  ;;  %v8307_v17 = vld [vmem:[%s8784_s0 + $0x308] sm:$0xff]  }
 0xc13   : > { %v8308_v18 = vld [vmem:[%s8784_s0 + $0x388] sm:$0xff]  }
 0xc14   : > { %7646 = vmatpush3.bf16.msra.mxu0 %v8275_v26  ;;  %v8310_v26 = vld [vmem:[%s8784_s0 + $0x3d0] sm:$0xff]  }
 0xc15   : > { %7668 = vmatpush3.bf16.msra.mxu1 %v8276_v28  ;;  %7647 = vmatprep.subr.bf16.mxu0 %v8277_v29  ;;  %v8311_v28 = vld [vmem:[%s8784_s0 + $0x310] sm:$0xff]  }
 0xc16   : > { %7669 = vmatprep.subr.bf16.mxu1 %v8278_v30  ;;  %v8312_v29 = vld [vmem:[%s8784_s0 + $0x390] sm:$0xff]   ;;  %v8313_v30 = vld [vmem:[%s8784_s0 + $0x358] sm:$0xff]  }
 0xc18   : > { %7648 = vmatpush3.bf16.msra.mxu0 %v8279_v45  ;;  %v8314_v45 = vld [vmem:[%s8784_s0 + $0x3d8] sm:$0xff]  }
 0xc19   : > { %7670 = vmatpush3.bf16.msra.mxu1 %v8280_v47  ;;  %7649 = vmatprep.subr.bf16.mxu0 %v8281_v48  ;;  %v8315_v47 = vld [vmem:[%s8784_s0 + $0x318] sm:$0xff]  }
 0xc1a   : > { %7671 = vmatprep.subr.bf16.mxu1 %v8282_v49  ;;  %v8316_v48 = vld [vmem:[%s8784_s0 + $0x398] sm:$0xff]   ;;  %v8317_v49 = vld [vmem:[%s8784_s0 + $0x360] sm:$0xff]  }
 0xc1c   : > { %7650 = vmatpush3.bf16.msra.mxu0 %v8283_v50  ;;  %v8318_v50 = vld [vmem:[%s8784_s0 + $0x3e0] sm:$0xff]  }
 0xc1d   : > { %7672 = vmatpush3.bf16.msra.mxu1 %v8284_v35  ;;  %7651 = vmatprep.subr.bf16.mxu0 %v8285_v51  ;;  %v8319_v35 = vld [vmem:[%s8784_s0 + $0x320] sm:$0xff]  }
 0xc1e   : > { %7673 = vmatprep.subr.bf16.mxu1 %v8286_v52  ;;  %v8320_v51 = vld [vmem:[%s8784_s0 + $0x3a0] sm:$0xff]   ;;  %v8321_v52 = vld [vmem:[%s8784_s0 + $0x368] sm:$0xff]  }
 0xc20   : > { %7652 = vmatpush3.bf16.msra.mxu0 %v8287_v53  ;;  %v8322_v53 = vld [vmem:[%s8784_s0 + $0x3e8] sm:$0xff]  }
 0xc21   : > { %7674 = vmatpush3.bf16.msra.mxu1 %v8288_v55  ;;  %7653 = vmatprep.subr.bf16.mxu0 %v8289_v56  ;;  %v8323_v55 = vld [vmem:[%s8784_s0 + $0x328] sm:$0xff]  }
 0xc22   : > { %7675 = vmatprep.subr.bf16.mxu1 %v8290_v57  ;;  %v8324_v56 = vld [vmem:[%s8784_s0 + $0x3a8] sm:$0xff]   ;;  %v8325_v57 = vld [vmem:[%s8784_s0 + $0x370] sm:$0xff]  }
 0xc24   : > { %7654 = vmatpush3.bf16.msra.mxu0 %v8291_v33  ;;  %v8326_v33 = vld [vmem:[%s8784_s0 + $0x3f0] sm:$0xff]  }
 0xc25   : > { %7676 = vmatpush3.bf16.msra.mxu1 %v8292_v40  ;;  %7655 = vmatprep.subr.bf16.mxu0 %v8293_v46  ;;  %v8327_v40 = vld [vmem:[%s8784_s0 + $0x330] sm:$0xff]  }
 0xc26   : > { %7677 = vmatprep.subr.bf16.mxu1 %v8294_v61  ;;  %v8328_v46 = vld [vmem:[%s8784_s0 + $0x3b0] sm:$0xff]   ;;  %v8329_v61 = vld [vmem:[%s8784_s0 + $0x378] sm:$0xff]  }
 0xc28   : > { %7656 = vmatpush3.bf16.msra.mxu0 %v8295_v0  ;;  %v2613_v0 = vmax.f32 %v9176_v31, 0.0 }
 0xc29   : > { %7678 = vmatpush3.bf16.msra.mxu1 %v8296_v4  ;;  %7657 = vmatprep.subr.bf16.mxu0 %v8297_v42  ;;  %v8332_v4 = vld [vmem:[%s8784_s0 + $0x3b8] sm:$0xff]   ;;  %v2615_v42 = vmax.f32 %v9179_v32, 0.0 }
 0xc2a   : > { %7679 = vmatprep.subr.bf16.mxu1 %v8298_v6  ;;  %v2629_v6 = vpack.c.bf16 %v2613_v0, %v2613_v0 }
 0xc2b   : > { %v2631_v7 = vpack.c.bf16 %v2615_v42, %v2615_v42 }
 0xc2c   : > { %7658 = vmatpush3.bf16.msra.mxu0 %v8299_v8 }
 0xc2d   : > { %7680 = vmatpush3.bf16.msra.mxu1 %v8300_v60  ;;  %7687 = vmatprep.subr.bf16.mxu0 %v8301_v19 }
 0xc2e   : > { %7709 = vmatprep.subr.bf16.mxu1 %v8302_v27 }
 0xc2f   : > { %3855 = vmatmul.mubr.bf16.vlgmr.msra.gmra.mrb[44].mxu0 %v2625_v44 }
 0xc30   : > { %3895 = vmatmul.mubr.bf16.vlgmr.msra.gmra.mrb[44].mxu1 %v2627_v3  ;;  %7688 = vmatpush3.bf16.msra.mxu0 %v8303_v43 }
 0xc31   : > { %3934 = vmatprep.mubr.bf16.mxu0 %v2630_v15  ;;  %7710 = vmatpush3.bf16.msra.mxu1 %v8304_v36 }
 0xc32   : > { %3974 = vmatprep.mubr.bf16.mxu1 %v2632_v16  ;;  %7689 = vmatprep.subr.bf16.mxu0 %v8305_v14 }
 0xc33   : > { %7711 = vmatprep.subr.bf16.mxu1 %v8306_v37 }
 0xc34   : > { %7690 = vmatpush3.bf16.msra.mxu0 %v8307_v17 }
 0xc35   : > { %7712 = vmatpush3.bf16.msra.mxu1 %v8308_v18  ;;  %7691 = vmatprep.subr.bf16.mxu0 %v8309_v21 }
 0xc36   : > { %7713 = vmatprep.subr.bf16.mxu1 %v8310_v26 }
 0xc38   : > { %7692 = vmatpush3.bf16.msra.mxu0 %v8311_v28 }
 0xc39   : > { %7714 = vmatpush3.bf16.msra.mxu1 %v8312_v29  ;;  %7693 = vmatprep.subr.bf16.mxu0 %v8313_v30 }
 0xc3a   : > { %7715 = vmatprep.subr.bf16.mxu1 %v8314_v45 }
 0xc3c   : > { %7694 = vmatpush3.bf16.msra.mxu0 %v8315_v47 }
 0xc3d   : > { %7716 = vmatpush3.bf16.msra.mxu1 %v8316_v48  ;;  %7695 = vmatprep.subr.bf16.mxu0 %v8317_v49 }
 0xc3e   : > { %7717 = vmatprep.subr.bf16.mxu1 %v8318_v50 }
 0xc40   : > { %7696 = vmatpush3.bf16.msra.mxu0 %v8319_v35 }
 0xc41   : > { %7718 = vmatpush3.bf16.msra.mxu1 %v8320_v51  ;;  %7697 = vmatprep.subr.bf16.mxu0 %v8321_v52 }
 0xc42   : > { %7719 = vmatprep.subr.bf16.mxu1 %v8322_v53 }
 0xc44   : > { %7698 = vmatpush3.bf16.msra.mxu0 %v8323_v55 }
 0xc45   : > { %7720 = vmatpush3.bf16.msra.mxu1 %v8324_v56  ;;  %7699 = vmatprep.subr.bf16.mxu0 %v8325_v57 }
 0xc46   : > { %7721 = vmatprep.subr.bf16.mxu1 %v8326_v33 }
 0xc48   : > { %7700 = vmatpush3.bf16.msra.mxu0 %v8327_v40 }
 0xc49   : > { %7722 = vmatpush3.bf16.msra.mxu1 %v8328_v46  ;;  %7701 = vmatprep.subr.bf16.mxu0 %v8329_v61 }
 0xc4a   : > { %7723 = vmatprep.subr.bf16.mxu1 %v8330_v63 }
 0xc4c   : > { %7702 = vmatpush3.bf16.msra.mxu0 %v8331_v41 }
 0xc4d   : > { %7724 = vmatpush3.bf16.msra.mxu1 %v8332_v4 }
 0xc4f   : > { %3935 = vmatmul.mubr.bf16.vlgmr.msra.gmra.mrb[48].mxu0 %v2629_v6 }
 0xc50   : > { %3975 = vmatmul.mubr.bf16.vlgmr.msra.gmra.mrb[48].mxu1 %v2631_v7 }
 0xcc2   : > { %v7571_v59 = vpop.f32.mrb[36].mxu0  ;;  %v7593_v8 = vpop.f32.mrb[36].mxu1 }
 0xcc3   : > { %v7572_v60 = vpop.f32.mrb[37].mxu0  ;;  %v7594_v19 = vpop.f32.mrb[37].mxu1 }
 0xcc4   : > { %v7573_v20 = vadd.f32 %v7572_v60, %v7571_v59  ;;  %v7595_v27 = vadd.f32 %v7594_v19, %v7593_v8  ;;  %v7574_v31 = vpop.f32.mrb[38].mxu0  ;;  %v7596_v9 = vpop.f32.mrb[38].mxu1 }
 0xcc5   : > { %v7575_v2 = vpop.f32.mrb[39].mxu0  ;;  %v7597_v43 = vpop.f32.mrb[39].mxu1 }
 0xcc6   : > { %v3697_v44 = vadd.f32 %v7573_v20, %v7183_v34 }
 0xcc8   : > { %v3737_v32 = vadd.f32 %v7595_v27, %v3697_v44  ;;  %v7312_v44 = vld [vmem:[%s8769_s30 + $0x7] ss:$0 sm:$0xff] }
 0xce2   : > { %v7615_v36 = vpop.f32.mrb[40].mxu0  ;;  %v7637_v3 = vpop.f32.mrb[40].mxu1 }
 0xce3   : > { %v7616_v14 = vpop.f32.mrb[41].mxu0  ;;  %v7638_v15 = vpop.f32.mrb[41].mxu1 }
 0xce4   : > { %v7617_v37 = vadd.f32 %v7616_v14, %v7615_v36  ;;  %v7639_v16 = vadd.f32 %v7638_v15, %v7637_v3  ;;  %v7618_v17 = vpop.f32.mrb[42].mxu0  ;;  %v7640_v18 = vpop.f32.mrb[42].mxu1  ;;  %v7313_v36 = vld [vmem:[%s8769_s30 + $0x8] ss:$0 sm:$0xff] }
 0xce5   : > { %v7619_v21 = vpop.f32.mrb[43].mxu0  ;;  %v7641_v26 = vpop.f32.mrb[43].mxu1 }
 0xce6   : > { %v3777_v28 = vadd.f32 %v7617_v37, %v3737_v32 }
 0xce8   : > { %v3817_v29 = vadd.f32 %v7639_v16, %v3777_v28 }
 0xd02   : > { %v7659_v30 = vpop.f32.mrb[44].mxu0 }
 0xd03   : > { %v7681_v45 = vpop.f32.mrb[44].mxu1  ;;  %v7660_v47 = vpop.f32.mrb[45].mxu0 }
 0xd04   : > { %v7661_v48 = vadd.f32 %v7660_v47, %v7659_v30  ;;  %v7682_v49 = vpop.f32.mrb[45].mxu1  ;;  %v7662_v50 = vpop.f32.mrb[46].mxu0 }
 0xd05   : > { %v7683_v35 = vadd.f32 %v7682_v49, %v7681_v45  ;;  %v7684_v51 = vpop.f32.mrb[46].mxu1  ;;  %v7663_v52 = vpop.f32.mrb[47].mxu0 }
 0xd06   : > { %v3857_v53 = vadd.f32 %v7661_v48, %v3817_v29  ;;  %v7685_v55 = vpop.f32.mrb[47].mxu1 }
 0xd08   : > { %v3897_v56 = vadd.f32 %v7683_v35, %v3857_v53 }
 0xd22   : > { %v7703_v57 = vpop.f32.mrb[48].mxu0 }
 0xd23   : > { %v7725_v33 = vpop.f32.mrb[48].mxu1  ;;  %v7704_v40 = vpop.f32.mrb[49].mxu0 }
 0xd24   : > { %v7705_v46 = vadd.f32 %v7704_v40, %v7703_v57  ;;  %v7726_v61 = vpop.f32.mrb[49].mxu1  ;;  %v7706_v63 = vpop.f32.mrb[50].mxu0 }
 0xd25   : > { %v7727_v41 = vadd.f32 %v7726_v61, %v7725_v33  ;;  %v7728_v0 = vpop.f32.mrb[50].mxu1  ;;  %v7707_v4 = vpop.f32.mrb[51].mxu0 }
 0xd26   : > { %v3937_v42 = vadd.f32 %v7705_v46, %v3897_v56  ;;  %v7729_v6 = vpop.f32.mrb[51].mxu1 }
 0xd28   : > { %v3977_v7 = vadd.f32 %v7727_v41, %v3937_v42 }
 0xd2a   : > { %v3982_v59 = vadd.f32 %v3977_v7, %v9034_v1 }
 0xd2c   : > { %v3985_v8 = vsel %vm697_vm5, %v3982_v59, 0.0 }
 0xd2d   : > { %3986 = vadd.xlane.f32.xlu0 %v3985_v8 }
 0xdba   : > { %v3987_v34 = vpop.xlane.xlu0 %3986 }
 0xdbb   : > { %v3988_v60 = vmul.f32 0.03125, %v3987_v34 }
 0xdbd   : > { %v3989_v19 = vsub.f32 %v3982_v59, %v3988_v60 }
 0xdbf   : > { %v3990_v20 = vmul.f32 %v3989_v19, %v3989_v19 }
 0xdc1   : > { %v3991_v27 = vsel %vm697_vm5, %v3990_v20, 0.0 }
 0xdc2   : > { %3992 = vadd.xlane.f32.xlu0 %v3991_v27 }
 0xe4f   : > { %v3993_v31 = vpop.xlane.xlu0 %3992 }
 0xe50   : > { %v3994_v9 = vmul.f32 0.03125, %v3993_v31 }
 0xe52   : > { %v3995_v2 = vadd.f32 1e-05, %v3994_v9 }
 0xe54   : > { %8351 = vrsqrt.f32 %v3995_v2 }
 0xe5e   : > { %v8352_v43 = vpop.eup %8351 }
 0xe5f   : > { %v3997_v32 = vmul.f32 %v8352_v43, %v3989_v19 }
 0xe61   : > { %v4002_v1 = vmul.f32 %v7312_v44, %v3997_v32 }
 0xe63   : > { %v4007_v3 = vadd.f32 %v7313_v36, %v4002_v1 }
 0xe65   : > { %4008 = vst.msk [vmem:[#allocation2] sm:$0xff] %vm697_vm5, %v4007_v3 }
 0xe66 PF: > { %p7314_p2 = scmp.ne.s32.totalorder %s8583_s16, 1 }
 0xe67   : > { %v8353_v14 = vld [vmem:[%s8764_s18] sm:$0xff] (!%p7314_p2)   ;;  %v8619_v15 = vmov (!%p7314_p2), 0.0   ;;  %v8354_v37 = vld [vmem:[%s8764_s18 + $0x8] sm:$0xff] (!%p7314_p2)   ;;  %vm8620_vm12 = vmmov (!%p7314_p2), 0   ;;  %s8621_s16 = smov (!%p7314_p2), 104   ;;  %s8622_s29 = smov (!%p7314_p2), 120  }
 0xe68   : > { %4012 = sbr.rel (%p7314_p2) target bundleno = 6321 (0x18b1), region = 72  ;;  %8031 = vmatprep.subr.bf16.mxu0 (!%p7314_p2), %v8619_v15  ;;  %8039 = vmatprep.subr.bf16.mxu1 (!%p7314_p2), %v8619_v15  ;;  %v7315_v16 = vld [vmem:[%s8769_s30] ss:$0 sm:$0xff] (!%p7314_p2)  ;;  %vm4224_vm13 = vcmask (!%p7314_p2), 64512   ;;  %s8623_s24 = smov (!%p7314_p2), 112   ;;  %vm4471_vm15 = vcmask (!%p7314_p2), 1043456  }
 0xe69   : > { %8032 = vmatpush3.bf16.msra.mxu0 (!%p7314_p2), %v8353_v14  ;;  %8035 = vmatprep.mubr.msk.bf16.mxu0 (!%p7314_p2), %vm8620_vm12, %v8619_v15  ;;  %v4229_v29 = vsel (!%p7314_p2), %vm4224_vm13, %v8874_v10, 0  ;;  %v4321_v2 = vsel (!%p7314_p2), %vm4224_vm13, %v8878_v12, 0  ;;  %v4367_v43 = vsel (!%p7314_p2), %vm4224_vm13, %v8880_v13, 0  ;;  %s8625_s12 = smov (!%p7314_p2), 8   ;;  %s8626_s23 = smov (!%p7314_p2), 24   ;;  %vm4802_vm0 = vcmask (!%p7314_p2), 130048  }
 0xe6a   : > { %8033 = vmatprep.subr.bf16.mxu0 (!%p7314_p2), %v8619_v15  ;;  %8041 = vmatprep.mubr.msk.bf16.mxu1 (!%p7314_p2), %vm8620_vm12, %v8619_v15  ;;  %vm4804_vm1 = vcmask (!%p7314_p2), 195584   ;;  %vm6915_vm2 = vcmask (!%p7314_p2), 261127  }
 0xe6b   : > { %8040 = vmatpush3.bf16.xpose.msra.mxu1 (!%p7314_p2), %v4229_v29 }
 0xe6c   : > { %8051 = vmatprep.subr.bf16.mxu1 (!%p7314_p2), %v8619_v15 }
 0xe6d   : > { %8034 = vmatpush3.bf16.msra.mxu0 (!%p7314_p2), %v8354_v37  ;;  %v4412_v37 = vand.u32 (!%p7314_p2), 127, %v818_v54 }
 0xe6e   : > { %8045 = vmatprep.subr.bf16.mxu0 (!%p7314_p2), %v8619_v15 }
 0xe6f   : > { %vm4413_vm14 = vcmp.le.s32.totalorder %v4412_v37, %v8838_v58 }
 0xe70   : > { %8036 = vmatmul.mubr.msk.bf16.vlgmr.msra.gmra.mrb[0].mxu0 %vm697_vm5, %v8829_v39  ;;  %v4275_v39 = vsel %vm4224_vm13, %v8876_v11, 0 }
 0xe71   : > { %8047 = vmatprep.mubr.msk.bf16.mxu0 %vm8620_vm12, %v8619_v15 }
 0xe76   : > { %8046 = vmatpush3.bf16.xpose.msra.mxu0 %v4275_v39 }
 0xe77   : > { %8057 = vmatprep.subr.bf16.mxu0 %v8619_v15 }
 0xf43   : > { %v4068_v17 = vpop.f32.mrb[0].mxu0 }
 0xf44   : > { %v4069_v18 = vadd.f32 %v7315_v16, %v4068_v17  ;;  %v8037_v21 = vpop.f32.mrb[1].mxu0 }
 0xf45   : > { %v4071_v26 = vpop.f32.mrb[2].mxu0 }
 0xf46   : > { %4081 = vrot.lane.b32.xlu1 %v4069_v18, %s8621_s16  ;;  %4075 = vrot.lane.b32.xlu0 %v4069_v18, %s8622_s29  ;;  %v8038_v28 = vpop.f32.mrb[3].mxu0 }
 0xf4a   : > { %4078 = vrot.lane.b32.xlu0 %v4069_v18, %s8623_s24 }
 0xfb8   : > { %v4082_v30 = vpop.permute.xlu1 %4081  ;;  %v4076_v45 = vpop.permute.xlu0 %4075 }
 0xfb9   : > { %v4100_v47 = vcombine.low %v4076_v45, %v4082_v30  ;;  %v4101_v48 = vcombine.high %v4076_v45, %v4082_v30 }
 0xfbb   : > { %v4108_v10 = vrot.slane %v4100_v47, %v8841_v62  ;;  %v4115_v51 = vrot.slane %v4101_v48, %v8841_v62 }
 0xfbc   : > { %v4079_v49 = vpop.permute.xlu0 %4078 }
 0xfbd   : > { %v4084_v50 = vcombine.low %v4069_v18, %v4079_v49  ;;  %v4085_v35 = vcombine.high %v4069_v18, %v4079_v49 }
 0xfbf   : > { %v4092_v11 = vrot.slane %v4084_v50, %v8841_v62  ;;  %v4099_v52 = vrot.slane %v4085_v35, %v8841_v62 }
 0xfc1   : > { %v4116_v53 = vcombine.low %v4092_v11, %v4108_v10  ;;  %v4117_v55 = vcombine.high %v4092_v11, %v4108_v10  ;;  %v4132_v56 = vcombine.low %v4099_v52, %v4115_v51  ;;  %v4133_v57 = vcombine.high %v4099_v52, %v4115_v51 }
 0xfc3   : > { %v4124_v33 = vrot.slane %v4116_v53, %v8844_v5  ;;  %v4131_v40 = vrot.slane %v4117_v55, %v8844_v5  ;;  %v4140_v46 = vrot.slane %v4132_v56, %v8844_v5  ;;  %v4147_v61 = vrot.slane %v4133_v57, %v8844_v5 }
 0xfc5   : > { %v4152_v63 = vcombine.low %v4124_v33, %v4131_v40  ;;  %v7319_v41 = vcombine.high %v4124_v33, %v4131_v40  ;;  %v4168_v0 = vcombine.low %v4140_v46, %v4147_v61  ;;  %v7320_v4 = vcombine.high %v4140_v46, %v4147_v61 }
 0xfc7   : > { %v4159_v42 = vrot.slane %v4152_v63, %v8841_v62  ;;  %v4167_v6 = vrot.slane %v7319_v41, %v8841_v62  ;;  %v4175_v7 = vrot.slane %v4168_v0, %v8841_v62  ;;  %v4183_v59 = vrot.slane %v7320_v4, %v8841_v62 }
 0xfc9   : > { %v4184_v8 = vcombine.low %v4159_v42, %v4167_v6  ;;  %v4200_v34 = vcombine.low %v4175_v7, %v4183_v59  ;;  %v4185_v60 = vcombine.high %v4159_v42, %v4167_v6  ;;  %v4201_v20 = vcombine.high %v4175_v7, %v4183_v59 }
 0xfcb   : > { %v4192_v19 = vrot.slane %v4184_v8, %v8844_v5  ;;  %v4208_v27 = vrot.slane %v4200_v34, %v8844_v5  ;;  %v4199_v44 = vrot.slane %v4185_v60, %v8844_v5  ;;  %v4215_v32 = vrot.slane %v4201_v20, %v8844_v5 }
 0xfcd   : > { %v4217_v31 = vcombine.high %v4192_v19, %v4208_v27  ;;  %v4216_v9 = vcombine.low %v4192_v19, %v4208_v27  ;;  %v4218_v3 = vcombine.low %v4199_v44, %v4215_v32  ;;  %v4219_v14 = vcombine.high %v4199_v44, %v4215_v32 }
 0xfcf   : > { %v4220_v36 = vpack.c.bf16 %v4216_v9, %v4216_v9  ;;  %v4221_v1 = vpack.c.bf16 %v4217_v31, %v4217_v31  ;;  %v4222_v12 = vpack.c.bf16 %v4218_v3, %v4218_v3  ;;  %v4223_v13 = vpack.c.bf16 %v4219_v14, %v4219_v14 }
 0xfd1   : > { %8042 = vmatmul.mubr.msk.bf16.vlgmr.msra.gmra.mrb[0].mxu1 %vm4224_vm13, %v4220_v36  ;;  %8048 = vmatmul.mubr.msk.bf16.vlgmr.msra.gmra.mrb[4].mxu0 %vm4224_vm13, %v4221_v1 }
 0xfd2   : > { %8052 = vmatpush3.bf16.xpose.msra.mxu1 %v4321_v2  ;;  %8058 = vmatpush3.bf16.xpose.msra.mxu0 %v4367_v43  ;;  %v4473_v2 = vsel %vm4471_vm15, %v8886_v22, 0  ;;  %v4519_v43 = vsel %vm4471_vm15, %v8888_v23, 0  ;;  %v4565_v23 = vsel %vm4471_vm15, %v8890_v24, 0 }
 0xfd3   : > { %8053 = vmatprep.mubr.msk.bf16.mxu1 %vm8620_vm12, %v8619_v15  ;;  %8059 = vmatprep.mubr.msk.bf16.mxu0 %vm8620_vm12, %v8619_v15 }
 0xfd4   : > { %8063 = vmatprep.subr.bf16.mxu1 %v8619_v15  ;;  %8069 = vmatprep.subr.bf16.mxu0 %v8619_v15 }
 0xfd9   : > { %8054 = vmatmul.mubr.msk.bf16.vlgmr.msra.gmra.mrb[4].mxu1 %vm4224_vm13, %v4222_v12  ;;  %8060 = vmatmul.mubr.msk.bf16.vlgmr.msra.gmra.mrb[8].mxu0 %vm4224_vm13, %v4223_v13 }
 0xfda   : > { %8065 = vmatprep.mubr.msk.bf16.mxu1 %vm8620_vm12, %v8619_v15  ;;  %8071 = vmatprep.mubr.msk.bf16.mxu0 %vm8620_vm12, %v8619_v15 }
 0xfdb   : > { %8064 = vmatpush3.bf16.msra.mxu1 %v4473_v2  ;;  %8070 = vmatpush3.bf16.msra.mxu0 %v4519_v43 }
 0xfdc   : > { %8075 = vmatprep.subr.bf16.mxu1 %v8619_v15  ;;  %8081 = vmatprep.subr.bf16.mxu0 %v8619_v15 }
0x10a4   : > { %v4265_v16 = vpop.f32.mrb[0].mxu1  ;;  %v4311_v17 = vpop.f32.mrb[4].mxu0 }
0x10a5   : > { %v4416_v18 = vsel %vm4413_vm14, %v4265_v16, -1e+30  ;;  %v4417_v21 = vsel %vm4413_vm14, %v4311_v17, -1e+30  ;;  %v8043_v26 = vpop.f32.mrb[1].mxu1  ;;  %v8049_v28 = vpop.f32.mrb[5].mxu0 }
0x10a6   : > { %v4268_v29 = vpop.f32.mrb[2].mxu1  ;;  %v4314_v39 = vpop.f32.mrb[6].mxu0  ;;  %v4420_v30 = vsel %vm4224_vm13, %v4416_v18, -inf  ;;  %v4423_v45 = vsel %vm4224_vm13, %v4417_v21, -inf  ;;  %v4611_v16 = vsel %vm4471_vm15, %v8892_v25, 0  ;;  %v8355_v28 = vld [vmem:[%s8764_s18 + $0x30] sm:$0xff]  }
0x10a7   : > { %4421 = vmax.xlane.f32.xlu1 %v4420_v30  ;;  %v8044_v54 = vpop.f32.mrb[3].mxu1  ;;  %4424 = vmax.xlane.f32.xlu0 %v4423_v45  ;;  %v8050_v47 = vpop.f32.mrb[7].mxu0 }
0x10ac   : > { %v4357_v48 = vpop.f32.mrb[4].mxu1  ;;  %v4403_v49 = vpop.f32.mrb[8].mxu0 }
0x10ad   : > { %v4418_v50 = vsel %vm4413_vm14, %v4357_v48, -1e+30  ;;  %v4419_v35 = vsel %vm4413_vm14, %v4403_v49, -1e+30  ;;  %v8055_v10 = vpop.f32.mrb[5].mxu1  ;;  %v8061_v51 = vpop.f32.mrb[9].mxu0 }
0x10ae   : > { %v4360_v11 = vpop.f32.mrb[6].mxu1  ;;  %v4406_v52 = vpop.f32.mrb[10].mxu0  ;;  %v4426_v53 = vsel %vm4224_vm13, %v4418_v50, -inf  ;;  %v4429_v55 = vsel %vm4224_vm13, %v4419_v35, -inf }
0x10af   : > { %v8056_v56 = vpop.f32.mrb[7].mxu1  ;;  %4427 = vmax.xlane.f32.xlu0 %v4426_v53  ;;  %4430 = vmax.xlane.f32.xlu1 %v4429_v55  ;;  %v8062_v57 = vpop.f32.mrb[11].mxu0 }
0x1134   : > { %v4422_v33 = vpop.xlane.xlu1 %4421  ;;  %v4425_v40 = vpop.xlane.xlu0 %4424 }
0x1135   : > { %v4432_v46 = vsub.f32 %v4416_v18, %v4422_v33  ;;  %v4433_v61 = vsub.f32 %v4417_v21, %v4425_v40 }
0x1137   : > { %v4436_v63 = vmul.f32 1.442695, %v4432_v46  ;;  %v4438_v41 = vmul.f32 1.442695, %v4433_v61 }
0x1139   : > { %8485 = vpow2.f32 %v4436_v63 }
0x113a   : > { %8487 = vpow2.f32 %v4438_v41 }
0x113c   : > { %v4428_v0 = vpop.xlane.xlu0 %4427  ;;  %v4431_v4 = vpop.xlane.xlu1 %4430 }
0x113d   : > { %v4434_v42 = vsub.f32 %v4418_v50, %v4428_v0  ;;  %v4435_v6 = vsub.f32 %v4419_v35, %v4431_v4 }
0x113f   : > { %v4440_v7 = vmul.f32 1.442695, %v4434_v42  ;;  %v4442_v59 = vmul.f32 1.442695, %v4435_v6  ;;  %v8356_v6 = vld [vmem:[%s8764_s18 + $0x38] sm:$0xff]   ;;  %s8624_s18 = smov 16  }
0x1141   : > { %8489 = vpow2.f32 %v4440_v7 }
0x1142   : > { %8491 = vpow2.f32 %v4442_v59 }
0x1143   : > { %v8486_v8 = vpop.eup %8485 }
0x1144   : > { %v8488_v34 = vpop.eup %8487  ;;  %v4444_v60 = vsel %vm4224_vm13, %v8486_v8, 0.0 }
0x1145   : > { %4445 = vadd.xlane.f32.xlu0 %v4444_v60  ;;  %v4447_v19 = vsel %vm4224_vm13, %v8488_v34, 0.0 }
0x1146   : > { %4448 = vadd.xlane.f32.xlu1 %v4447_v19 }
0x114b   : > { %v8490_v20 = vpop.eup %8489 }
0x114c   : > { %v8492_v27 = vpop.eup %8491  ;;  %v4450_v31 = vsel %vm4224_vm13, %v8490_v20, 0.0 }
0x114d   : > { %4451 = vadd.xlane.f32.xlu0 %v4450_v31  ;;  %v4453_v9 = vsel %vm4224_vm13, %v8492_v27, 0.0 }
0x114e   : > { %4454 = vadd.xlane.f32.xlu1 %v4453_v9 }
0x11d2   : > { %v4446_v44 = vpop.xlane.xlu0 %4445 }
0x11d3   : > { %8493 = vrcp.f32 %v4446_v44  ;;  %v4449_v32 = vpop.xlane.xlu1 %4448 }
0x11d4   : > { %8495 = vrcp.f32 %v4449_v32 }
0x11da   : > { %v4452_v36 = vpop.xlane.xlu0 %4451 }
0x11db   : > { %8497 = vrcp.f32 %v4452_v36  ;;  %v4455_v1 = vpop.xlane.xlu1 %4454 }
0x11dc   : > { %8499 = vrcp.f32 %v4455_v1 }
0x11dd   : > { %v8494_v3 = vpop.eup %8493 }
0x11de   : > { %v8496_v14 = vpop.eup %8495  ;;  %v4460_v22 = vmul.f32 %v8494_v3, %v8486_v8 }
0x11df   : > { %v4461_v12 = vmul.f32 %v8496_v14, %v8488_v34 }
0x11e0   : > { %v4464_v13 = vpack.c.bf16 %v4460_v22, %v4460_v22 }
0x11e1   : > { %v4465_v37 = vpack.c.bf16 %v4461_v12, %v4461_v12 }
0x11e2   : > { %8066 = vmatmul.mubr.msk.bf16.vlgmr.msra.gmra.mrb[8].mxu1 %vm4224_vm13, %v4464_v13 }
0x11e3   : > { %8072 = vmatmul.mubr.msk.bf16.vlgmr.msra.gmra.mrb[12].mxu0 %vm4224_vm13, %v4465_v37  ;;  %8076 = vmatpush3.bf16.msra.mxu1 %v4565_v23 }
0x11e4   : > { %8082 = vmatpush3.bf16.msra.mxu0 %v4611_v16  ;;  %8077 = vmatprep.mubr.msk.bf16.mxu1 %vm8620_vm12, %v8619_v15 }
0x11e5   : > { %v8498_v17 = vpop.eup %8497  ;;  %8083 = vmatprep.mubr.msk.bf16.mxu0 %vm8620_vm12, %v8619_v15  ;;  %8087 = vmatprep.subr.bf16.mxu1 %v8619_v15 }
0x11e6   : > { %v8500_v24 = vpop.eup %8499  ;;  %v4462_v18 = vmul.f32 %v8498_v17, %v8490_v20 }
0x11e7   : > { %v4463_v21 = vmul.f32 %v8500_v24, %v8492_v27 }
0x11e8   : > { %v4466_v25 = vpack.c.bf16 %v4462_v18, %v4462_v18 }
0x11e9   : > { %v4467_v26 = vpack.c.bf16 %v4463_v21, %v4463_v21 }
0x11ea   : > { %8078 = vmatmul.mubr.msk.bf16.vlgmr.msra.gmra.mrb[12].mxu1 %vm4224_vm13, %v4466_v25 }
0x11eb   : > { %8084 = vmatmul.mubr.msk.bf16.vlgmr.msra.gmra.mrb[16].mxu0 %vm4224_vm13, %v4467_v26  ;;  %8091 = vmatprep.mubr.msk.bf16.mxu1 %vm8620_vm12, %v8619_v15  ;;  %v7335_v26 = vld [vmem:[%s8769_s30 + $0x3] ss:$0 sm:$0xff] }
0x11ec   : > { %8088 = vmatpush3.bf16.msra.mxu1 %v8355_v28 }
0x11ed   : > { %8089 = vmatprep.subr.bf16.mxu1 %v8619_v15 }
0x11f0   : > { %8090 = vmatpush3.bf16.msra.mxu1 %v8356_v6  ;;  %v4903_v6 = vld [vmem:[%s8774_s11 + $0x18] sm:$0xff] }
0x12b5   : > { %v4509_v29 = vpop.f32.mrb[8].mxu1 }
0x12b6   : > { %v4555_v39 = vpop.f32.mrb[12].mxu0  ;;  %v8067_v30 = vpop.f32.mrb[9].mxu1 }
0x12b7   : > { %v8073_v45 = vpop.f32.mrb[13].mxu0  ;;  %v4512_v54 = vpop.f32.mrb[10].mxu1 }
0x12b8   : > { %v4558_v47 = vpop.f32.mrb[14].mxu0  ;;  %v8068_v48 = vpop.f32.mrb[11].mxu1 }
0x12b9   : > { %v8074_v49 = vpop.f32.mrb[15].mxu0 }
0x12bd   : > { %v4601_v50 = vpop.f32.mrb[12].mxu1 }
0x12be   : > { %v4653_v35 = vcombine.low %v4509_v29, %v4601_v50  ;;  %v4654_v10 = vcombine.high %v4509_v29, %v4601_v50  ;;  %v4647_v51 = vpop.f32.mrb[16].mxu0  ;;  %v8079_v11 = vpop.f32.mrb[13].mxu1 }
0x12bf   : > { %v4669_v52 = vcombine.low %v4555_v39, %v4647_v51  ;;  %v4670_v53 = vcombine.high %v4555_v39, %v4647_v51  ;;  %v8085_v55 = vpop.f32.mrb[17].mxu0  ;;  %v4604_v56 = vpop.f32.mrb[14].mxu1  ;;  %v4900_v51 = vld [vmem:[%s8774_s11] sm:$0xff] }
0x12c0   : > { %v4661_v15 = vrot.slane %v4653_v35, %v8841_v62  ;;  %v4668_v57 = vrot.slane %v4654_v10, %v8841_v62  ;;  %v4650_v33 = vpop.f32.mrb[18].mxu0  ;;  %v8080_v40 = vpop.f32.mrb[15].mxu1  ;;  %v4908_v11 = vld [vmem:[%s8774_s11 + $0x40] sm:$0xff] }
0x12c1   : > { %v4677_v46 = vrot.slane %v4669_v52, %v8841_v62  ;;  %v4684_v61 = vrot.slane %v4670_v53, %v8841_v62  ;;  %v8086_v63 = vpop.f32.mrb[19].mxu0  ;;  %v4901_v52 = vld [vmem:[%s8774_s11 + $0x8] sm:$0xff]  ;;  %v7342_v53 = vcombine.high %v4900_v51, %v4908_v11  ;;  %v7341_v55 = vcombine.low %v4900_v51, %v4908_v11  ;;  %v4924_v33 = vld [vmem:[%s8774_s11 + $0xc0] sm:$0xff] }
0x12c2   : > { %v4917_v40 = vld [vmem:[%s8774_s11 + $0x88] sm:$0xff] }
0x12c3   : > { %v4685_v41 = vcombine.low %v4661_v15, %v4677_v46  ;;  %v4686_v0 = vcombine.high %v4661_v15, %v4677_v46  ;;  %v4701_v4 = vcombine.low %v4668_v57, %v4684_v61  ;;  %v4702_v42 = vcombine.high %v4668_v57, %v4684_v61  ;;  %5179 = vmatprep.subr.bf16.mxu0 %v7342_v53  ;;  %v4916_v57 = vld [vmem:[%s8774_s11 + $0x80] sm:$0xff]  ;;  %v4925_v61 = vld [vmem:[%s8774_s11 + $0xc8] sm:$0xff]  ;;  %v4930_v53 = vld [vmem:[%s8774_s11 + $0xf0] sm:$0xff] }
0x12c4   : > { %5180 = vmatpush1.bf16.msra.mxu0 %v7341_v55  ;;  %v7358_v46 = vcombine.high %v4916_v57, %v4924_v33  ;;  %v7357_v63 = vcombine.low %v4916_v57, %v4924_v33  ;;  %v4931_v55 = vld [vmem:[%s8774_s11 + $0xf8] sm:$0xff] }
0x12c5   : > { %v4693_v7 = vrot.slane %v4685_v41, %v8844_v5  ;;  %v4700_v59 = vrot.slane %v4686_v0, %v8844_v5  ;;  %v4709_v8 = vrot.slane %v4701_v4, %v8844_v5  ;;  %v4716_v34 = vrot.slane %v4702_v42, %v8844_v5  ;;  %v4902_v4 = vld [vmem:[%s8774_s11 + $0x10] sm:$0xff] }
0x12c6   : > { %v7359_v41 = vcombine.low %v4917_v40, %v4925_v61  ;;  %v7360_v0 = vcombine.high %v4917_v40, %v4925_v61  ;;  %5181 = vmatprep.subr.bf16.mxu0 %v7358_v46  ;;  %v4910_v42 = vld [vmem:[%s8774_s11 + $0x50] sm:$0xff]  ;;  %v8357_v61 = vld [vmem:[%s8784_s0 + $0x40] sm:$0xff]  }
0x12c7   : > { %v4721_v60 = vcombine.low %v4693_v7, %v4700_v59  ;;  %v7329_v19 = vcombine.high %v4693_v7, %v4700_v59  ;;  %v4737_v20 = vcombine.low %v4709_v8, %v4716_v34  ;;  %v7330_v27 = vcombine.high %v4709_v8, %v4716_v34  ;;  %v4911_v59 = vld [vmem:[%s8774_s11 + $0x58] sm:$0xff] }
0x12c8   : > { %5182 = vmatpush1.bf16.msra.mxu0 %v7357_v63  ;;  %v7346_v7 = vcombine.high %v4902_v4, %v4910_v42  ;;  %v8627_v8 = vmov 0   ;;  %v7345_v34 = vcombine.low %v4902_v4, %v4910_v42  ;;  %v8358_v63 = vld [vmem:[%s8784_s0 + $0xc0] sm:$0xff]   ;;  %v8361_v4 = vld [vmem:[%s8784_s0 + $0x48] sm:$0xff]  }
0x12c9   : > { %v4728_v31 = vrot.slane %v4721_v60, %v8841_v62  ;;  %v4736_v9 = vrot.slane %v7329_v19, %v8841_v62  ;;  %v4744_v2 = vrot.slane %v4737_v20, %v8841_v62  ;;  %v4752_v43 = vrot.slane %v7330_v27, %v8841_v62  ;;  %5211 = vmatprep.mubr.bf16.mxu0 %v8627_v8  ;;  %v8362_v42 = vld [vmem:[%s8784_s0 + $0xc8] sm:$0xff]  }
0x12ca   : > { %v7347_v60 = vcombine.low %v4903_v6, %v4911_v59  ;;  %v7348_v19 = vcombine.high %v4903_v6, %v4911_v59  ;;  %5261 = vmatprep.subr.bf16.mxu0 %v7346_v7  ;;  %v8363_v6 = vld [vmem:[%s8784_s0 + $0x8] sm:$0xff]   ;;  %v8365_v59 = vld [vmem:[%s8784_s0 + $0x50] sm:$0xff]  }
0x12cb   : > { %v4754_v44 = vcombine.high %v4728_v31, %v4736_v9  ;;  %v4770_v32 = vcombine.high %v4744_v2, %v4752_v43  ;;  %v4753_v36 = vcombine.low %v4728_v31, %v4736_v9  ;;  %v4769_v1 = vcombine.low %v4744_v2, %v4752_v43  ;;  %v7339_v2 = vld [vmem:[%s8769_s30 + $0x4] ss:$0 sm:$0xff]  ;;  %v8364_v7 = vld [vmem:[%s8784_s0 + $0x88] sm:$0xff]  }
0x12cd   : > { %v4768_v3 = vrot.slane %v4754_v44, %v8844_v5  ;;  %v4784_v14 = vrot.slane %v4770_v32, %v8844_v5  ;;  %v4761_v22 = vrot.slane %v4753_v36, %v8844_v5  ;;  %v4777_v12 = vrot.slane %v4769_v1, %v8844_v5  ;;  %v7340_v44 = vld [vmem:[%s8769_s30 + $0x5] ss:$0 sm:$0xff]  ;;  %v4918_v36 = vld [vmem:[%s8774_s11 + $0x90] sm:$0xff] }
0x12ce   : > { %v4926_v1 = vld [vmem:[%s8774_s11 + $0xd0] sm:$0xff] }
0x12cf   : > { %v4787_v13 = vcombine.low %v4768_v3, %v4784_v14  ;;  %v4786_v23 = vcombine.high %v4761_v22, %v4777_v12  ;;  %v4788_v37 = vcombine.high %v4768_v3, %v4784_v14  ;;  %v4785_v16 = vcombine.low %v4761_v22, %v4777_v12  ;;  %v4919_v3 = vld [vmem:[%s8774_s11 + $0x98] sm:$0xff] }
0x12d0   : > { %v4927_v14 = vld [vmem:[%s8774_s11 + $0xd8] sm:$0xff] }
0x12d1   : > { %4794 = vrot.lane.b32.xlu1 %v4787_v13, %s8624_s18  ;;  %4790 = vrot.lane.b32.xlu0 %v4786_v23, %s8625_s12  ;;  %v7362_v13 = vcombine.high %v4918_v36, %v4926_v1  ;;  %v7364_v23 = vcombine.high %v4919_v3, %v4927_v14 }
0x12d5   : > { %4798 = vrot.lane.b32.xlu1 %v4788_v37, %s8626_s23  ;;  %v4904_v37 = vld [vmem:[%s8774_s11 + $0x20] sm:$0xff] }
0x1343   : > { %v4795_v62 = vpop.permute.xlu1 %4794  ;;  %v4791_v17 = vpop.permute.xlu0 %4790 }
0x1344   : > { %v4801_v24 = vsel %vm4224_vm13, %v4785_v16, %v4791_v17  ;;  %v4912_v16 = vld [vmem:[%s8774_s11 + $0x60] sm:$0xff]  ;;  %v4913_v17 = vld [vmem:[%s8774_s11 + $0x68] sm:$0xff] }
0x1345   : > { %v4803_v21 = vsel %vm4802_vm0, %v4801_v24, %v4795_v62  ;;  %v4905_v62 = vld [vmem:[%s8774_s11 + $0x28] sm:$0xff]  ;;  %v7361_v24 = vcombine.low %v4918_v36, %v4926_v1 }
0x1346   : > { %v8378_v36 = vld [vmem:[%s8784_s0 + $0xe8] sm:$0xff]  }
0x1347   : > { %v4799_v18 = vpop.permute.xlu1 %4798  ;;  %v8379_v1 = vld [vmem:[%s8784_s0 + $0x28] sm:$0xff]  }
0x1348   : > { %v4805_v5 = vsel %vm4804_vm1, %v4803_v21, %v4799_v18  ;;  %v7363_v18 = vcombine.low %v4919_v3, %v4927_v14  ;;  %v7350_v21 = vcombine.high %v4904_v37, %v4912_v16  ;;  %v8380_v3 = vld [vmem:[%s8784_s0 + $0xa8] sm:$0xff]   ;;  %v8381_v14 = vld [vmem:[%s8784_s0 + $0x70] sm:$0xff]  }
0x1349   : > { %v4806_v25 = vpack.c.bf16 %v4805_v5, %v4805_v5  ;;  %v7352_v5 = vcombine.high %v4905_v62, %v4913_v17 }
0x134b   : > { %8092 = vmatmul.mubr.msk.bf16.vlgmr.msra.gmra.mrb[16].mxu1 %vm697_vm5, %v4806_v25  ;;  %v4920_v25 = vld [vmem:[%s8774_s11 + $0xa0] sm:$0xff] }
0x134c   : > { %5252 = vmatprep.mubr.bf16.mxu1 %v8627_v8 }
0x141e   : > { %v4866_v28 = vpop.f32.mrb[16].mxu1 }
0x141f   : > { %v4867_v29 = vadd.f32 %v7335_v26, %v4866_v28  ;;  %v8093_v39 = vpop.f32.mrb[17].mxu1  ;;  %v4928_v26 = vld [vmem:[%s8774_s11 + $0xe0] sm:$0xff]  ;;  %v4921_v28 = vld [vmem:[%s8774_s11 + $0xa8] sm:$0xff] }
0x1420   : > { %v4869_v30 = vpop.f32.mrb[18].mxu1  ;;  %v7349_v39 = vcombine.low %v4904_v37, %v4912_v16  ;;  %v8385_v37 = vld [vmem:[%s8784_s0 + $0x78] sm:$0xff]  }
0x1421   : > { %v4872_v45 = vadd.f32 %v4867_v29, %v8825_v38  ;;  %v8094_v54 = vpop.f32.mrb[19].mxu1  ;;  %v4909_v38 = vld [vmem:[%s8774_s11 + $0x48] sm:$0xff]  ;;  %v7351_v30 = vcombine.low %v4905_v62, %v4913_v17  ;;  %v8386_v16 = vld [vmem:[%s8784_s0 + $0xf8] sm:$0xff]  }
0x1422   : > { %v7343_v56 = vcombine.low %v4901_v52, %v4909_v38  ;;  %v7344_v15 = vcombine.high %v4901_v52, %v4909_v38  ;;  %v4929_v29 = vld [vmem:[%s8774_s11 + $0xe8] sm:$0xff]  ;;  %v4922_v52 = vld [vmem:[%s8774_s11 + $0xb0] sm:$0xff]  ;;  %v4923_v38 = vld [vmem:[%s8774_s11 + $0xb8] sm:$0xff] }
0x1423   : > { %v4875_v47 = vsel %vm697_vm5, %v4872_v45, 0.0  ;;  %v7368_v54 = vcombine.high %v4921_v28, %v4929_v29  ;;  %v7370_v57 = vcombine.high %v4922_v52, %v4930_v53  ;;  %v7372_v33 = vcombine.high %v4923_v38, %v4931_v55  ;;  %v8387_v62 = vld [vmem:[%s8784_s0 + $0x38] sm:$0xff]  }
0x1424   : > { %4876 = vadd.xlane.f32.xlu0 %v4875_v47  ;;  %5220 = vmatprep.subr.bf16.mxu1 %v7344_v15  ;;  %v4906_v47 = vld [vmem:[%s8774_s11 + $0x30] sm:$0xff]  ;;  %v7369_v40 = vcombine.low %v4922_v52, %v4930_v53  ;;  %v7371_v46 = vcombine.low %v4923_v38, %v4931_v55  ;;  %v8388_v17 = vld [vmem:[%s8784_s0 + $0xb8] sm:$0xff]  }
0x1425   : > { %5221 = vmatpush1.bf16.msra.mxu1 %v7343_v56 }
0x1426   : > { %5222 = vmatprep.subr.bf16.mxu1 %v7360_v0  ;;  %v8360_v0 = vld [vmem:[%s8784_s0 + $0x80] sm:$0xff]  }
0x1429   : > { %5223 = vmatpush1.bf16.msra.mxu1 %v7359_v41  ;;  %v8359_v41 = vld [vmem:[%s8784_s0] sm:$0xff]  }
0x142a   : > { %5302 = vmatprep.subr.bf16.mxu1 %v7348_v19  ;;  %v8369_v19 = vld [vmem:[%s8784_s0 + $0x58] sm:$0xff]  }
0x14b1   : > { %v4877_v48 = vpop.xlane.xlu0 %4876 }
0x14b2   : > { %v4879_v49 = vmul.f32 0.03125, %v4877_v48  ;;  %v4914_v48 = vld [vmem:[%s8774_s11 + $0x70] sm:$0xff] }
0x14b3   : > { %v7354_v51 = vcombine.high %v4906_v47, %v4914_v48  ;;  %v7353_v56 = vcombine.low %v4906_v47, %v4914_v48 }
0x14b4   : > { %v4880_v50 = vsub.f32 %v4872_v45, %v4879_v49  ;;  %v7366_v45 = vcombine.high %v4920_v25, %v4928_v26  ;;  %v4907_v49 = vld [vmem:[%s8774_s11 + $0x38] sm:$0xff] }
0x14b6   : > { %v4881_v35 = vmul.f32 %v4880_v50, %v4880_v50 }
0x14b8   : > { %v4882_v10 = vsel %vm697_vm5, %v4881_v35, 0.0  ;;  %v7365_v35 = vcombine.low %v4920_v25, %v4928_v26  ;;  %v4938_v26 = vsub.s32 0, %v8838_v58 }
0x14b9   : > { %4883 = vadd.xlane.f32.xlu1 %v4882_v10  ;;  %v7367_v10 = vcombine.low %v4921_v28, %v4929_v29  ;;  %v4946_v28 = vsub.s32 2, %v8838_v58  ;;  %v9520_v29 = vld [vmem:[%s8779_s22] sm:$0xff] }
0x1546   : > { %v4884_v20 = vpop.xlane.xlu1 %4883 }
0x1547   : > { %v4885_v27 = vmul.f32 0.03125, %v4884_v20  ;;  %v8370_v20 = vld [vmem:[%s8784_s0 + $0xd8] sm:$0xff]  }
0x1549   : > { %v4886_v31 = vadd.f32 1e-05, %v4885_v27  ;;  %v8371_v27 = vld [vmem:[%s8784_s0 + $0x18] sm:$0xff]  }
0x154b   : > { %8501 = vrsqrt.f32 %v4886_v31  ;;  %v8372_v31 = vld [vmem:[%s8784_s0 + $0x98] sm:$0xff]  }
0x1555   : > { %v8502_v9 = vpop.eup %8501 }
0x1556   : > { %v4888_v43 = vmul.f32 %v8502_v9, %v4880_v50  ;;  %v4915_v50 = vld [vmem:[%s8774_s11 + $0x78] sm:$0xff]  ;;  %v8373_v9 = vld [vmem:[%s8784_s0 + $0x60] sm:$0xff]  }
0x1557   : > { %v7356_v11 = vcombine.high %v4907_v49, %v4915_v50  ;;  %v7355_v15 = vcombine.low %v4907_v49, %v4915_v50 }
0x1558   : > { %v4893_v32 = vmul.f32 %v7339_v2, %v4888_v43  ;;  %v8374_v2 = vld [vmem:[%s8784_s0 + $0xe0] sm:$0xff]  }
0x1559   : > { %v8375_v43 = vld [vmem:[%s8784_s0 + $0x20] sm:$0xff]  }
0x155a   : > { %v9430_v22 = vadd.f32 %v7340_v44, %v4893_v32  ;;  %v8376_v44 = vld [vmem:[%s8784_s0 + $0xa0] sm:$0xff]   ;;  %v8377_v32 = vld [vmem:[%s8784_s0 + $0x68] sm:$0xff]  }
0x155c   : > { %v9434_v12 = vpack.c.bf16 %v9430_v22, %v9430_v22 }
0x155e   : > { %7373 = vmatmul.mubr.msk.bf16.vlgmr.msra.gmra.mrb[20].mxu0 %vm697_vm5, %v9434_v12  ;;  %7374 = vmatmul.mubr.msk.bf16.vlgmr.msra.gmra.mrb[20].mxu1 %vm697_vm5, %v9434_v12 }
0x155f   : > { %5262 = vmatpush1.bf16.msra.mxu0 %v7345_v34  ;;  %5303 = vmatpush1.bf16.msra.mxu1 %v7347_v60  ;;  %v8367_v34 = vld [vmem:[%s8784_s0 + $0x10] sm:$0xff]  }
0x1560   : > { %5263 = vmatprep.subr.bf16.mxu0 %v7362_v13  ;;  %5304 = vmatprep.subr.bf16.mxu1 %v7364_v23  ;;  %v8368_v60 = vld [vmem:[%s8784_s0 + $0x90] sm:$0xff]  }
0x1561   : > { %5293 = vmatprep.mubr.bf16.mxu0 %v8627_v8  ;;  %5334 = vmatprep.mubr.bf16.mxu1 %v8627_v8  ;;  %v8383_v13 = vld [vmem:[%s8784_s0 + $0x30] sm:$0xff]  }
0x1562   : > { %v8384_v23 = vld [vmem:[%s8784_s0 + $0xb0] sm:$0xff]  }
0x1563   : > { %5264 = vmatpush1.bf16.msra.mxu0 %v7361_v24  ;;  %5305 = vmatpush1.bf16.msra.mxu1 %v7363_v18  ;;  %v8389_v24 = vld [vmem:[%s8784_s0 + $0x140] sm:$0xff]  }
0x1564   : > { %5343 = vmatprep.subr.bf16.mxu0 %v7350_v21  ;;  %5384 = vmatprep.subr.bf16.mxu1 %v7352_v5  ;;  %v8390_v18 = vld [vmem:[%s8784_s0 + $0x1c0] sm:$0xff]   ;;  %v4962_v21 = vsub.s32 6, %v8838_v58  ;;  %v9510_v5 = vld [vmem:[%s8779_s22 + $0x8] sm:$0xff] }
0x1566   : > { %7375 = vmatmul.mubr.msk.bf16.vlgmr.msra.gmra.mrb[24].mxu0 %vm697_vm5, %v9434_v12  ;;  %7376 = vmatmul.mubr.msk.bf16.vlgmr.msra.gmra.mrb[24].mxu1 %vm697_vm5, %v9434_v12  ;;  %v9515_v25 = vrot.slane %v9510_v5, %v4962_v21 }
0x1567   : > { %5344 = vmatpush1.bf16.msra.mxu0 %v7349_v39  ;;  %5385 = vmatpush1.bf16.msra.mxu1 %v7351_v30  ;;  %v4942_v39 = vsub.s32 1, %v8838_v58  ;;  %v4950_v30 = vsub.s32 3, %v8838_v58 }
0x1568   : > { %5345 = vmatprep.subr.bf16.mxu0 %v7366_v45  ;;  %5386 = vmatprep.subr.bf16.mxu1 %v7368_v54  ;;  %v4939_v45 = vrot.slane %v9520_v29, %v4938_v26  ;;  %v4947_v54 = vrot.slane %v9520_v29, %v4946_v28 }
0x1569   : > { %5375 = vmatprep.mubr.bf16.mxu0 %v8627_v8  ;;  %5416 = vmatprep.mubr.bf16.mxu1 %v8627_v8  ;;  %v4943_v47 = vrot.slane %v9520_v29, %v4942_v39  ;;  %v4951_v48 = vrot.slane %v9520_v29, %v4950_v30 }
0x156b   : > { %5346 = vmatpush1.bf16.msra.mxu0 %v7365_v35  ;;  %5387 = vmatpush1.bf16.msra.mxu1 %v7367_v10 }
0x156c   : > { %5425 = vmatprep.subr.bf16.mxu0 %v7354_v51  ;;  %5466 = vmatprep.subr.bf16.mxu1 %v7356_v11 }
0x156e   : > { %7377 = vmatmul.mubr.msk.bf16.vlgmr.msra.gmra.mrb[28].mxu0 %vm697_vm5, %v9434_v12  ;;  %7378 = vmatmul.mubr.msk.bf16.vlgmr.msra.gmra.mrb[28].mxu1 %vm697_vm5, %v9434_v12 }
0x156f   : > { %5426 = vmatpush1.bf16.msra.mxu0 %v7353_v56  ;;  %5467 = vmatpush1.bf16.msra.mxu1 %v7355_v15  ;;  %v4958_v56 = vsub.s32 5, %v8838_v58  ;;  %v4966_v15 = vsub.s32 7, %v8838_v58 }
0x1570   : > { %5427 = vmatprep.subr.bf16.mxu0 %v7370_v57  ;;  %5468 = vmatprep.subr.bf16.mxu1 %v7372_v33 }
0x1571   : > { %5457 = vmatprep.mubr.bf16.mxu0 %v8627_v8  ;;  %5498 = vmatprep.mubr.bf16.mxu1 %v8627_v8  ;;  %v8366_v8 = vld [vmem:[%s8784_s0 + $0xd0] sm:$0xff]  }
0x1573   : > { %5428 = vmatpush1.bf16.msra.mxu0 %v7369_v40  ;;  %5469 = vmatpush1.bf16.msra.mxu1 %v7371_v46 }
0x1574   : > { %7753 = vmatprep.subr.bf16.mxu0 %v8357_v61  ;;  %7775 = vmatprep.subr.bf16.mxu1 %v8358_v63 }
0x1576   : > { %7379 = vmatmul.mubr.msk.bf16.vlgmr.msra.gmra.mrb[32].mxu0 %vm697_vm5, %v9434_v12  ;;  %7380 = vmatmul.mubr.msk.bf16.vlgmr.msra.gmra.mrb[32].mxu1 %vm697_vm5, %v9434_v12  ;;  %v8382_v12 = vld [vmem:[%s8784_s0 + $0xf0] sm:$0xff]  }
0x1577   : > { %7754 = vmatpush3.bf16.msra.mxu0 %v8359_v41  ;;  %7776 = vmatpush3.bf16.msra.mxu1 %v8360_v0 }
0x1578   : > { %7755 = vmatprep.subr.bf16.mxu0 %v8361_v4  ;;  %7777 = vmatprep.subr.bf16.mxu1 %v8362_v42  ;;  %v4959_v4 = vrot.slane %v9520_v29, %v4958_v56  ;;  %v4967_v42 = vrot.slane %v9520_v29, %v4966_v15 }
0x157b   : > { %7756 = vmatpush3.bf16.msra.mxu0 %v8363_v6  ;;  %7778 = vmatpush3.bf16.msra.mxu1 %v8364_v7  ;;  %v8391_v6 = vld [vmem:[%s8784_s0 + $0x100] sm:$0xff]  }
0x157c   : > { %7757 = vmatprep.subr.bf16.mxu0 %v8365_v59  ;;  %7779 = vmatprep.subr.bf16.mxu1 %v8366_v8  ;;  %v8392_v7 = vld [vmem:[%s8784_s0 + $0x180] sm:$0xff]  }
0x157f   : > { %7758 = vmatpush3.bf16.msra.mxu0 %v8367_v34  ;;  %7780 = vmatpush3.bf16.msra.mxu1 %v8368_v60  ;;  %v8393_v34 = vld [vmem:[%s8784_s0 + $0x148] sm:$0xff]  }
0x1580   : > { %7759 = vmatprep.subr.bf16.mxu0 %v8369_v19  ;;  %7781 = vmatprep.subr.bf16.mxu1 %v8370_v20  ;;  %v8394_v60 = vld [vmem:[%s8784_s0 + $0x1c8] sm:$0xff]  }
0x1583   : > { %7760 = vmatpush3.bf16.msra.mxu0 %v8371_v27  ;;  %7782 = vmatpush3.bf16.msra.mxu1 %v8372_v31 }
0x1584   : > { %7761 = vmatprep.subr.bf16.mxu0 %v8373_v9  ;;  %7783 = vmatprep.subr.bf16.mxu1 %v8374_v2 }
0x1587   : > { %7762 = vmatpush3.bf16.msra.mxu0 %v8375_v43  ;;  %7784 = vmatpush3.bf16.msra.mxu1 %v8376_v44 }
0x1588   : > { %7763 = vmatprep.subr.bf16.mxu0 %v8377_v32  ;;  %7785 = vmatprep.subr.bf16.mxu1 %v8378_v36  ;;  %v8395_v32 = vld [vmem:[%s8784_s0 + $0x108] sm:$0xff]  }
0x1589   : > { %v8396_v36 = vld [vmem:[%s8784_s0 + $0x188] sm:$0xff]  }
0x158b   : > { %7764 = vmatpush3.bf16.msra.mxu0 %v8379_v1  ;;  %7786 = vmatpush3.bf16.msra.mxu1 %v8380_v3 }
0x158c   : > { %7765 = vmatprep.subr.bf16.mxu0 %v8381_v14  ;;  %7787 = vmatprep.subr.bf16.mxu1 %v8382_v12  ;;  %v8397_v14 = vld [vmem:[%s8784_s0 + $0x150] sm:$0xff]  }
0x158d   : > { %v8398_v12 = vld [vmem:[%s8784_s0 + $0x1d0] sm:$0xff]  }
0x158f   : > { %7766 = vmatpush3.bf16.msra.mxu0 %v8383_v13  ;;  %7788 = vmatpush3.bf16.msra.mxu1 %v8384_v23 }
0x1590   : > { %7767 = vmatprep.subr.bf16.mxu0 %v8385_v37  ;;  %7789 = vmatprep.subr.bf16.mxu1 %v8386_v16  ;;  %v4971_v37 = vrot.slane %v9510_v5, %v4938_v26  ;;  %v4979_v16 = vrot.slane %v9510_v5, %v4946_v28 }
0x1593   : > { %7768 = vmatpush3.bf16.msra.mxu0 %v8387_v62  ;;  %7790 = vmatpush3.bf16.msra.mxu1 %v8388_v17 }
0x1594   : > { %7797 = vmatprep.subr.bf16.mxu0 %v8389_v24  ;;  %7819 = vmatprep.subr.bf16.mxu1 %v8390_v18  ;;  %v8399_v24 = vld [vmem:[%s8784_s0 + $0x110] sm:$0xff]  }
0x1595   : > { %v8400_v18 = vld [vmem:[%s8784_s0 + $0x190] sm:$0xff]  }
0x1631   : > { %v5213_v49 = vpop.f32.mrb[20].mxu0  ;;  %v5254_v50 = vpop.f32.mrb[20].mxu1 }
0x1632   : > { %v5214_v35 = vadd.f32 %v5213_v49, %v4939_v45  ;;  %v5255_v10 = vadd.f32 %v5254_v50, %v4947_v54  ;;  %v5215_v51 = vpop.f32.mrb[21].mxu0  ;;  %v5256_v11 = vpop.f32.mrb[21].mxu1  ;;  %v8401_v45 = vld [vmem:[%s8784_s0 + $0x158] sm:$0xff]  }
0x1633   : > { %v5216_v52 = vadd.f32 %v5215_v51, %v4943_v47  ;;  %v5257_v53 = vadd.f32 %v5256_v11, %v4951_v48  ;;  %v5217_v38 = vpop.f32.mrb[22].mxu0  ;;  %v5258_v55 = vpop.f32.mrb[22].mxu1  ;;  %v8402_v54 = vld [vmem:[%s8784_s0 + $0x1d8] sm:$0xff]  }
0x1634   : > { %v5507_v57 = vmax.f32 %v5214_v35, 0.0  ;;  %v5509_v33 = vmax.f32 %v5255_v10, 0.0  ;;  %v5218_v40 = vpop.f32.mrb[23].mxu0  ;;  %v5259_v46 = vpop.f32.mrb[23].mxu1  ;;  %v8403_v51 = vld [vmem:[%s8784_s0 + $0x118] sm:$0xff]   ;;  %v8405_v55 = vld [vmem:[%s8784_s0 + $0x160] sm:$0xff]  }
0x1635   : > { %v5508_v61 = vmax.f32 %v5216_v52, 0.0  ;;  %v5510_v63 = vmax.f32 %v5257_v53, 0.0  ;;  %v8404_v11 = vld [vmem:[%s8784_s0 + $0x198] sm:$0xff]   ;;  %v4954_v52 = vsub.s32 4, %v8838_v58  ;;  %v8407_v40 = vld [vmem:[%s8784_s0 + $0x120] sm:$0xff]  }
0x1636   : > { %v5523_v59 = vpack.c.bf16 %v5507_v57, %v5507_v57  ;;  %v5525_v8 = vpack.c.bf16 %v5509_v33, %v5509_v33  ;;  %v8406_v57 = vld [vmem:[%s8784_s0 + $0x1e0] sm:$0xff]   ;;  %v8451_v58 = vld [vmem:[%s8784_s0 + $0x238] sm:$0xff]  }
0x1637   : > { %v5524_v41 = vpack.c.bf16 %v5508_v61, %v5508_v61  ;;  %v5526_v0 = vpack.c.bf16 %v5510_v63, %v5510_v63  ;;  %v4987_v33 = vrot.slane %v9510_v5, %v4954_v52  ;;  %v8408_v46 = vld [vmem:[%s8784_s0 + $0x1a0] sm:$0xff]   ;;  %v8409_v61 = vld [vmem:[%s8784_s0 + $0x168] sm:$0xff]  }
0x1638   : > { %v8410_v63 = vld [vmem:[%s8784_s0 + $0x1e8] sm:$0xff]  }
0x1639   : > { %v9544_v19 = vpop.f32.mrb[24].mxu0  ;;  %v9546_v20 = vpop.f32.mrb[24].mxu1  ;;  %6600 = vmatprep.mubr.bf16.mxu0 %v5524_v41  ;;  %6640 = vmatprep.mubr.bf16.mxu1 %v5526_v0 }
0x163a   : > { %v5297_v27 = vpop.f32.mrb[25].mxu0  ;;  %v5338_v31 = vpop.f32.mrb[25].mxu1  ;;  %6601 = vmatmul.mubr.bf16.vlgmr.msra.gmra.mrb[36].mxu0 %v5523_v59  ;;  %6641 = vmatmul.mubr.bf16.vlgmr.msra.gmra.mrb[36].mxu1 %v5525_v8 }
0x163b   : > { %v5298_v9 = vadd.f32 %v5297_v27, %v4959_v4  ;;  %v5339_v2 = vadd.f32 %v5338_v31, %v4967_v42  ;;  %7798 = vmatpush3.bf16.msra.mxu0 %v8391_v6  ;;  %7820 = vmatpush3.bf16.msra.mxu1 %v8392_v7  ;;  %v5299_v43 = vpop.f32.mrb[26].mxu0  ;;  %v5340_v44 = vpop.f32.mrb[26].mxu1  ;;  %v4955_v27 = vrot.slane %v9520_v29, %v4954_v52  ;;  %v8432_v52 = vld [vmem:[%s8784_s0 + $0x290] sm:$0xff]  }
0x163c   : > { %v5300_v1 = vpop.f32.mrb[27].mxu0  ;;  %v5341_v3 = vpop.f32.mrb[27].mxu1  ;;  %7799 = vmatprep.subr.bf16.mxu0 %v8393_v34  ;;  %7821 = vmatprep.subr.bf16.mxu1 %v8394_v60  ;;  %v8411_v34 = vld [vmem:[%s8784_s0 + $0x128] sm:$0xff]   ;;  %v8414_v43 = vld [vmem:[%s8784_s0 + $0x1f0] sm:$0xff]   ;;  %v4975_v44 = vrot.slane %v9510_v5, %v4942_v39  ;;  %v8418_v39 = vld [vmem:[%s8784_s0 + $0x1f8] sm:$0xff]  }
0x163d   : > { %v5512_v13 = vmax.f32 %v5298_v9, 0.0  ;;  %v5514_v23 = vmax.f32 %v5339_v2, 0.0  ;;  %v8412_v60 = vld [vmem:[%s8784_s0 + $0x1a8] sm:$0xff]   ;;  %v8413_v2 = vld [vmem:[%s8784_s0 + $0x170] sm:$0xff]   ;;  %v8417_v3 = vld [vmem:[%s8784_s0 + $0x178] sm:$0xff]  }
0x163f   : > { %v5528_v62 = vpack.c.bf16 %v5512_v13, %v5512_v13  ;;  %v5530_v17 = vpack.c.bf16 %v5514_v23, %v5514_v23  ;;  %7800 = vmatpush3.bf16.msra.mxu0 %v8395_v32  ;;  %7822 = vmatpush3.bf16.msra.mxu1 %v8396_v36  ;;  %v4983_v32 = vrot.slane %v9510_v5, %v4950_v30  ;;  %v8419_v30 = vld [vmem:[%s8784_s0 + $0x138] sm:$0xff]  }
0x1640   : > { %7801 = vmatprep.subr.bf16.mxu0 %v8397_v14  ;;  %7823 = vmatprep.subr.bf16.mxu1 %v8398_v12  ;;  %v5296_v36 = vadd.f32 %v9544_v19, %v4955_v27  ;;  %v8420_v13 = vld [vmem:[%s8784_s0 + $0x1b8] sm:$0xff]   ;;  %v8421_v19 = vld [vmem:[%s8784_s0 + $0x240] sm:$0xff]   ;;  %v4999_v27 = vrot.slane %v9510_v5, %v4966_v15 }
0x1641   : > { %v5377_v47 = vpop.f32.mrb[28].mxu0  ;;  %v5418_v48 = vpop.f32.mrb[28].mxu1  ;;  %6680 = vmatprep.mubr.bf16.mxu0 %v5528_v62  ;;  %6720 = vmatprep.mubr.bf16.mxu1 %v5530_v17  ;;  %v8423_v17 = vld [vmem:[%s8784_s0 + $0x200] sm:$0xff]   ;;  %v8452_v15 = vld [vmem:[%s8784_s0 + $0x2b8] sm:$0xff]  }
0x1642   : > { %v9558_v26 = vadd.f32 %v5377_v47, %v4971_v37  ;;  %v9560_v28 = vadd.f32 %v5418_v48, %v4979_v16  ;;  %v5379_v49 = vpop.f32.mrb[29].mxu0  ;;  %v5420_v50 = vpop.f32.mrb[29].mxu1  ;;  %v5511_v23 = vmax.f32 %v5296_v36, 0.0  ;;  %v8425_v47 = vld [vmem:[%s8784_s0 + $0x248] sm:$0xff]  }
0x1643   : > { %7802 = vmatpush3.bf16.msra.mxu0 %v8399_v24  ;;  %7824 = vmatpush3.bf16.msra.mxu1 %v8400_v18  ;;  %v5381_v35 = vpop.f32.mrb[30].mxu0  ;;  %v5422_v10 = vpop.f32.mrb[30].mxu1  ;;  %v5380_v14 = vadd.f32 %v5379_v49, %v4975_v44  ;;  %v5421_v12 = vadd.f32 %v5420_v50, %v4983_v32  ;;  %v8426_v48 = vld [vmem:[%s8784_s0 + $0x2c8] sm:$0xff]   ;;  %v8453_v44 = vld [vmem:[%s8784_s0 + $0x340] sm:$0xff]  }
0x1644   : > { %v5382_v53 = vpop.f32.mrb[31].mxu0  ;;  %v5423_v38 = vpop.f32.mrb[31].mxu1  ;;  %7803 = vmatprep.subr.bf16.mxu0 %v8401_v45  ;;  %7825 = vmatprep.subr.bf16.mxu1 %v8402_v54  ;;  %v5527_v24 = vpack.c.bf16 %v5511_v23, %v5511_v23  ;;  %v8424_v45 = vld [vmem:[%s8784_s0 + $0x280] sm:$0xff]   ;;  %v8427_v50 = vld [vmem:[%s8784_s0 + $0x208] sm:$0xff]   ;;  %v8429_v10 = vld [vmem:[%s8784_s0 + $0x250] sm:$0xff]   ;;  %v5517_v32 = vmax.f32 %v9560_v28, 0.0 }
0x1645   : > { %v5516_v16 = vmax.f32 %v5380_v14, 0.0  ;;  %v5518_v62 = vmax.f32 %v5421_v12, 0.0  ;;  %v8428_v35 = vld [vmem:[%s8784_s0 + $0x288] sm:$0xff]   ;;  %v8433_v53 = vld [vmem:[%s8784_s0 + $0x258] sm:$0xff]   ;;  %v8462_v23 = vld [vmem:[%s8784_s0 + $0x3d0] sm:$0xff]  }
0x1646   : > { %v8434_v38 = vld [vmem:[%s8784_s0 + $0x2d8] sm:$0xff]   ;;  %v8458_v28 = vld [vmem:[%s8784_s0 + $0x3c8] sm:$0xff]  }
0x1647   : > { %7804 = vmatpush3.bf16.msra.mxu0 %v8403_v51  ;;  %7826 = vmatpush3.bf16.msra.mxu1 %v8404_v11  ;;  %v5532_v54 = vpack.c.bf16 %v5516_v16, %v5516_v16  ;;  %v5534_v49 = vpack.c.bf16 %v5518_v62, %v5518_v62  ;;  %v8430_v51 = vld [vmem:[%s8784_s0 + $0x2d0] sm:$0xff]   ;;  %v8459_v12 = vld [vmem:[%s8784_s0 + $0x308] sm:$0xff]   ;;  %v8466_v16 = vld [vmem:[%s8784_s0 + $0x3d8] sm:$0xff]  }
0x1648   : > { %7805 = vmatprep.subr.bf16.mxu0 %v8405_v55  ;;  %7827 = vmatprep.subr.bf16.mxu1 %v8406_v57  ;;  %v8431_v11 = vld [vmem:[%s8784_s0 + $0x210] sm:$0xff]   ;;  %v8435_v55 = vld [vmem:[%s8784_s0 + $0x218] sm:$0xff]  }
0x1649   : > { %v5459_v41 = vpop.f32.mrb[32].mxu0  ;;  %v5500_v0 = vpop.f32.mrb[32].mxu1  ;;  %v8436_v57 = vld [vmem:[%s8784_s0 + $0x298] sm:$0xff]  }
0x164a   : > { %v9572_v4 = vadd.f32 %v5459_v41, %v4987_v33  ;;  %v9575_v42 = vadd.f32 %v5500_v0, %v9515_v25  ;;  %v9577_v6 = vpop.f32.mrb[33].mxu0  ;;  %v9579_v7 = vpop.f32.mrb[33].mxu1  ;;  %v4963_v25 = vrot.slane %v9520_v29, %v4962_v21  ;;  %v8415_v21 = vld [vmem:[%s8784_s0 + $0x130] sm:$0xff]   ;;  %v8437_v33 = vld [vmem:[%s8784_s0 + $0x260] sm:$0xff]   ;;  %v8442_v41 = vld [vmem:[%s8784_s0 + $0x2e8] sm:$0xff]  }
0x164b   : > { %7806 = vmatpush3.bf16.msra.mxu0 %v8407_v40  ;;  %7828 = vmatpush3.bf16.msra.mxu1 %v8408_v46  ;;  %v5463_v59 = vpop.f32.mrb[34].mxu0  ;;  %v5504_v8 = vpop.f32.mrb[34].mxu1  ;;  %v8416_v29 = vld [vmem:[%s8784_s0 + $0x1b0] sm:$0xff]   ;;  %v8438_v40 = vld [vmem:[%s8784_s0 + $0x2e0] sm:$0xff]   ;;  %v8443_v0 = vld [vmem:[%s8784_s0 + $0x228] sm:$0xff]  }
0x164c   : > { %v5464_v31 = vpop.f32.mrb[35].mxu0  ;;  %v5505_v9 = vpop.f32.mrb[35].mxu1  ;;  %7807 = vmatprep.subr.bf16.mxu0 %v8409_v61  ;;  %7829 = vmatprep.subr.bf16.mxu1 %v8410_v63  ;;  %v5337_v1 = vadd.f32 %v9546_v20, %v4963_v25  ;;  %v8422_v20 = vld [vmem:[%s8784_s0 + $0x2c0] sm:$0xff]   ;;  %v8441_v63 = vld [vmem:[%s8784_s0 + $0x268] sm:$0xff]   ;;  %v8445_v8 = vld [vmem:[%s8784_s0 + $0x270] sm:$0xff]  }
0x164d   : > { %v8439_v46 = vld [vmem:[%s8784_s0 + $0x220] sm:$0xff]   ;;  %v8444_v59 = vld [vmem:[%s8784_s0 + $0x2a8] sm:$0xff]   ;;  %v8447_v25 = vld [vmem:[%s8784_s0 + $0x230] sm:$0xff]  }
0x164e   : > { %v5513_v37 = vmax.f32 %v5337_v1, 0.0  ;;  %v8440_v61 = vld [vmem:[%s8784_s0 + $0x2a0] sm:$0xff]   ;;  %v8448_v31 = vld [vmem:[%s8784_s0 + $0x2b0] sm:$0xff]   ;;  %v8449_v9 = vld [vmem:[%s8784_s0 + $0x278] sm:$0xff]   ;;  %v5533_v1 = vpack.c.bf16 %v5517_v32, %v5517_v32 }
0x164f   : > { %7808 = vmatpush3.bf16.msra.mxu0 %v8411_v34  ;;  %7830 = vmatpush3.bf16.msra.mxu1 %v8412_v60  ;;  %v8446_v34 = vld [vmem:[%s8784_s0 + $0x2f0] sm:$0xff]   ;;  %v4991_v60 = vrot.slane %v9510_v5, %v4958_v56  ;;  %v5503_v56 = vadd.f32 %v9579_v7, %v4999_v27  ;;  %v5515_v5 = vmax.f32 %v9558_v26, 0.0  ;;  %v8456_v26 = vld [vmem:[%s8784_s0 + $0x380] sm:$0xff]   ;;  %v8467_v62 = vld [vmem:[%s8784_s0 + $0x318] sm:$0xff]  }
0x1650   : > { %7809 = vmatprep.subr.bf16.mxu0 %v8413_v2  ;;  %7831 = vmatprep.subr.bf16.mxu1 %v8414_v43  ;;  %v5529_v18 = vpack.c.bf16 %v5513_v37, %v5513_v37  ;;  %v8450_v2 = vld [vmem:[%s8784_s0 + $0x2f8] sm:$0xff]   ;;  %v8463_v37 = vld [vmem:[%s8784_s0 + $0x310] sm:$0xff]  }
0x1651   : > { %v5462_v43 = vadd.f32 %v9577_v6, %v4991_v60  ;;  %v5522_v36 = vmax.f32 %v5503_v56, 0.0  ;;  %v8455_v6 = vld [vmem:[%s8784_s0 + $0x300] sm:$0xff]   ;;  %v5531_v7 = vpack.c.bf16 %v5515_v5, %v5515_v5 }
0x1653   : > { %7810 = vmatpush3.bf16.msra.mxu0 %v8415_v21  ;;  %7832 = vmatpush3.bf16.msra.mxu1 %v8416_v29  ;;  %v8454_v21 = vld [vmem:[%s8784_s0 + $0x3c0] sm:$0xff]   ;;  %v5520_v29 = vmax.f32 %v5462_v43, 0.0  ;;  %v5538_v14 = vpack.c.bf16 %v5522_v36, %v5522_v36 }
0x1654   : > { %7811 = vmatprep.subr.bf16.mxu0 %v8417_v3  ;;  %7833 = vmatprep.subr.bf16.mxu1 %v8418_v39  ;;  %v8457_v3 = vld [vmem:[%s8784_s0 + $0x348] sm:$0xff]  }
0x1655   : > { %v5536_v39 = vpack.c.bf16 %v5520_v29, %v5520_v29 }
0x1657   : > { %7812 = vmatpush3.bf16.msra.mxu0 %v8419_v30  ;;  %7834 = vmatpush3.bf16.msra.mxu1 %v8420_v13  ;;  %v8460_v30 = vld [vmem:[%s8784_s0 + $0x388] sm:$0xff]   ;;  %v8461_v13 = vld [vmem:[%s8784_s0 + $0x350] sm:$0xff]  }
0x1658   : > { %7841 = vmatprep.subr.bf16.mxu0 %v8421_v19  ;;  %7863 = vmatprep.subr.bf16.mxu1 %v8422_v20  ;;  %v8464_v19 = vld [vmem:[%s8784_s0 + $0x390] sm:$0xff]   ;;  %v8465_v20 = vld [vmem:[%s8784_s0 + $0x358] sm:$0xff]  }
0x165a   : > { %6681 = vmatmul.mubr.bf16.vlgmr.msra.gmra.mrb[40].mxu0 %v5527_v24  ;;  %6721 = vmatmul.mubr.bf16.vlgmr.msra.gmra.mrb[40].mxu1 %v5529_v18  ;;  %v8469_v24 = vld [vmem:[%s8784_s0 + $0x360] sm:$0xff]  }
0x165b   : > { %7842 = vmatpush3.bf16.msra.mxu0 %v8423_v17  ;;  %6760 = vmatprep.mubr.bf16.mxu0 %v5532_v54  ;;  %v8468_v17 = vld [vmem:[%s8784_s0 + $0x398] sm:$0xff]   ;;  %v8470_v18 = vld [vmem:[%s8784_s0 + $0x3e0] sm:$0xff]  }
0x165c   : > { %7864 = vmatpush3.bf16.msra.mxu1 %v8424_v45  ;;  %6800 = vmatprep.mubr.bf16.mxu1 %v5534_v49  ;;  %v8471_v45 = vld [vmem:[%s8784_s0 + $0x320] sm:$0xff]   ;;  %v8475_v49 = vld [vmem:[%s8784_s0 + $0x328] sm:$0xff]  }
0x165d   : > { %7843 = vmatprep.subr.bf16.mxu0 %v8425_v47  ;;  %7865 = vmatprep.subr.bf16.mxu1 %v8426_v48  ;;  %v8472_v54 = vld [vmem:[%s8784_s0 + $0x3a0] sm:$0xff]   ;;  %v8473_v47 = vld [vmem:[%s8784_s0 + $0x368] sm:$0xff]  }
0x165e   : > { %v8474_v48 = vld [vmem:[%s8784_s0 + $0x3e8] sm:$0xff]  }
0x165f   : > { %7844 = vmatpush3.bf16.msra.mxu0 %v8427_v50  ;;  %v8476_v50 = vld [vmem:[%s8784_s0 + $0x3a8] sm:$0xff]  }
0x1660   : > { %7866 = vmatpush3.bf16.msra.mxu1 %v8428_v35  ;;  %7845 = vmatprep.subr.bf16.mxu0 %v8429_v10  ;;  %v8477_v35 = vld [vmem:[%s8784_s0 + $0x370] sm:$0xff]  }
0x1661   : > { %7867 = vmatprep.subr.bf16.mxu1 %v8430_v51  ;;  %v8478_v10 = vld [vmem:[%s8784_s0 + $0x3f0] sm:$0xff]  }
0x1662   : > { %v8479_v51 = vld [vmem:[%s8784_s0 + $0x330] sm:$0xff]  }
0x1663   : > { %7846 = vmatpush3.bf16.msra.mxu0 %v8431_v11  ;;  %v8480_v11 = vld [vmem:[%s8784_s0 + $0x3b0] sm:$0xff]  }
0x1664   : > { %7868 = vmatpush3.bf16.msra.mxu1 %v8432_v52  ;;  %7847 = vmatprep.subr.bf16.mxu0 %v8433_v53  ;;  %v8481_v52 = vld [vmem:[%s8784_s0 + $0x378] sm:$0xff]  }
0x1665   : > { %7869 = vmatprep.subr.bf16.mxu1 %v8434_v38  ;;  %v8482_v53 = vld [vmem:[%s8784_s0 + $0x3f8] sm:$0xff]  }
0x1666   : > { %v8483_v38 = vld [vmem:[%s8784_s0 + $0x338] sm:$0xff]  }
0x1667   : > { %7848 = vmatpush3.bf16.msra.mxu0 %v8435_v55  ;;  %v5519_v55 = vmax.f32 %v9572_v4, 0.0 }
0x1668   : > { %7870 = vmatpush3.bf16.msra.mxu1 %v8436_v57  ;;  %7849 = vmatprep.subr.bf16.mxu0 %v8437_v33  ;;  %v8484_v57 = vld [vmem:[%s8784_s0 + $0x3b8] sm:$0xff]   ;;  %v5521_v33 = vmax.f32 %v9575_v42, 0.0 }
0x1669   : > { %7871 = vmatprep.subr.bf16.mxu1 %v8438_v40  ;;  %v5535_v40 = vpack.c.bf16 %v5519_v55, %v5519_v55 }
0x166b   : > { %7850 = vmatpush3.bf16.msra.mxu0 %v8439_v46  ;;  %v5537_v46 = vpack.c.bf16 %v5521_v33, %v5521_v33  ;;  %v7510_v33 = vld [vmem:[%s8769_s30 + $0x7] ss:$0 sm:$0xff] }
0x166c   : > { %7872 = vmatpush3.bf16.msra.mxu1 %v8440_v61  ;;  %7851 = vmatprep.subr.bf16.mxu0 %v8441_v63 }
0x166d   : > { %7873 = vmatprep.subr.bf16.mxu1 %v8442_v41  ;;  %v7381_v41 = vld [vmem:[%s8769_s30 + $0x6] ss:$0 sm:$0xff] }
0x166f   : > { %7852 = vmatpush3.bf16.msra.mxu0 %v8443_v0 }
0x1670   : > { %7874 = vmatpush3.bf16.msra.mxu1 %v8444_v59  ;;  %7853 = vmatprep.subr.bf16.mxu0 %v8445_v8 }
0x1671   : > { %7875 = vmatprep.subr.bf16.mxu1 %v8446_v34 }
0x1673   : > { %7854 = vmatpush3.bf16.msra.mxu0 %v8447_v25 }
0x1674   : > { %7876 = vmatpush3.bf16.msra.mxu1 %v8448_v31  ;;  %7855 = vmatprep.subr.bf16.mxu0 %v8449_v9 }
0x1675   : > { %7877 = vmatprep.subr.bf16.mxu1 %v8450_v2 }
0x1677   : > { %7856 = vmatpush3.bf16.msra.mxu0 %v8451_v58 }
0x1678   : > { %7878 = vmatpush3.bf16.msra.mxu1 %v8452_v15  ;;  %7885 = vmatprep.subr.bf16.mxu0 %v8453_v44 }
0x1679   : > { %7907 = vmatprep.subr.bf16.mxu1 %v8454_v21 }
0x167a   : > { %6761 = vmatmul.mubr.bf16.vlgmr.msra.gmra.mrb[44].mxu0 %v5531_v7 }
0x167b   : > { %6801 = vmatmul.mubr.bf16.vlgmr.msra.gmra.mrb[44].mxu1 %v5533_v1  ;;  %7886 = vmatpush3.bf16.msra.mxu0 %v8455_v6 }
0x167c   : > { %6840 = vmatprep.mubr.bf16.mxu0 %v5536_v39  ;;  %7908 = vmatpush3.bf16.msra.mxu1 %v8456_v26 }
0x167d   : > { %6880 = vmatprep.mubr.bf16.mxu1 %v5538_v14  ;;  %7887 = vmatprep.subr.bf16.mxu0 %v8457_v3 }
0x167e   : > { %7909 = vmatprep.subr.bf16.mxu1 %v8458_v28 }
0x167f   : > { %7888 = vmatpush3.bf16.msra.mxu0 %v8459_v12 }
0x1680   : > { %7910 = vmatpush3.bf16.msra.mxu1 %v8460_v30  ;;  %7889 = vmatprep.subr.bf16.mxu0 %v8461_v13 }
0x1681   : > { %7911 = vmatprep.subr.bf16.mxu1 %v8462_v23 }
0x1683   : > { %7890 = vmatpush3.bf16.msra.mxu0 %v8463_v37 }
0x1684   : > { %7912 = vmatpush3.bf16.msra.mxu1 %v8464_v19  ;;  %7891 = vmatprep.subr.bf16.mxu0 %v8465_v20 }
0x1685   : > { %7913 = vmatprep.subr.bf16.mxu1 %v8466_v16 }
0x1687   : > { %7892 = vmatpush3.bf16.msra.mxu0 %v8467_v62 }
0x1688   : > { %7914 = vmatpush3.bf16.msra.mxu1 %v8468_v17  ;;  %7893 = vmatprep.subr.bf16.mxu0 %v8469_v24 }
0x1689   : > { %7915 = vmatprep.subr.bf16.mxu1 %v8470_v18 }
0x168b   : > { %7894 = vmatpush3.bf16.msra.mxu0 %v8471_v45 }
0x168c   : > { %7916 = vmatpush3.bf16.msra.mxu1 %v8472_v54  ;;  %7895 = vmatprep.subr.bf16.mxu0 %v8473_v47 }
0x168d   : > { %7917 = vmatprep.subr.bf16.mxu1 %v8474_v48 }
0x168f   : > { %7896 = vmatpush3.bf16.msra.mxu0 %v8475_v49 }
0x1690   : > { %7918 = vmatpush3.bf16.msra.mxu1 %v8476_v50  ;;  %7897 = vmatprep.subr.bf16.mxu0 %v8477_v35 }
0x1691   : > { %7919 = vmatprep.subr.bf16.mxu1 %v8478_v10 }
0x1693   : > { %7898 = vmatpush3.bf16.msra.mxu0 %v8479_v51 }
0x1694   : > { %7920 = vmatpush3.bf16.msra.mxu1 %v8480_v11  ;;  %7899 = vmatprep.subr.bf16.mxu0 %v8481_v52 }
0x1695   : > { %7921 = vmatprep.subr.bf16.mxu1 %v8482_v53 }
0x1697   : > { %7900 = vmatpush3.bf16.msra.mxu0 %v8483_v38 }
0x1698   : > { %7922 = vmatpush3.bf16.msra.mxu1 %v8484_v57 }
0x169a   : > { %6841 = vmatmul.mubr.bf16.vlgmr.msra.gmra.mrb[48].mxu0 %v5535_v40 }
0x169b   : > { %6881 = vmatmul.mubr.bf16.vlgmr.msra.gmra.mrb[48].mxu1 %v5537_v46 }
0x170d   : > { %v7769_v61 = vpop.f32.mrb[36].mxu0  ;;  %v7791_v63 = vpop.f32.mrb[36].mxu1 }
0x170e   : > { %v7770_v0 = vpop.f32.mrb[37].mxu0  ;;  %v7792_v59 = vpop.f32.mrb[37].mxu1 }
0x170f   : > { %v7771_v8 = vadd.f32 %v7770_v0, %v7769_v61  ;;  %v7793_v34 = vadd.f32 %v7792_v59, %v7791_v63  ;;  %v7772_v4 = vpop.f32.mrb[38].mxu0  ;;  %v7794_v60 = vpop.f32.mrb[38].mxu1 }
0x1710   : > { %v7773_v27 = vpop.f32.mrb[39].mxu0  ;;  %v7795_v25 = vpop.f32.mrb[39].mxu1 }
0x1711   : > { %v6603_v31 = vadd.f32 %v7771_v8, %v7381_v41 }
0x1713   : > { %v6643_v42 = vadd.f32 %v7793_v34, %v6603_v31 }
0x172d   : > { %v7813_v9 = vpop.f32.mrb[40].mxu0  ;;  %v7835_v2 = vpop.f32.mrb[40].mxu1 }
0x172e   : > { %v7814_v43 = vpop.f32.mrb[41].mxu0  ;;  %v7836_v56 = vpop.f32.mrb[41].mxu1 }
0x172f   : > { %v7815_v58 = vadd.f32 %v7814_v43, %v7813_v9  ;;  %v7837_v5 = vadd.f32 %v7836_v56, %v7835_v2  ;;  %v7816_v15 = vpop.f32.mrb[42].mxu0  ;;  %v7838_v44 = vpop.f32.mrb[42].mxu1 }
0x1730   : > { %v7817_v32 = vpop.f32.mrb[43].mxu0  ;;  %v7839_v21 = vpop.f32.mrb[43].mxu1 }
0x1731   : > { %v6683_v29 = vadd.f32 %v7815_v58, %v6643_v42 }
0x1733   : > { %v6723_v36 = vadd.f32 %v7837_v5, %v6683_v29 }
0x174d   : > { %v7857_v6 = vpop.f32.mrb[44].mxu0 }
0x174e   : > { %v7879_v7 = vpop.f32.mrb[44].mxu1  ;;  %v7858_v26 = vpop.f32.mrb[45].mxu0 }
0x174f   : > { %v7859_v1 = vadd.f32 %v7858_v26, %v7857_v6  ;;  %v7880_v3 = vpop.f32.mrb[45].mxu1  ;;  %v7860_v39 = vpop.f32.mrb[46].mxu0 }
0x1750   : > { %v7881_v28 = vadd.f32 %v7880_v3, %v7879_v7  ;;  %v7882_v14 = vpop.f32.mrb[46].mxu1  ;;  %v7861_v12 = vpop.f32.mrb[47].mxu0 }
0x1751   : > { %v6763_v30 = vadd.f32 %v7859_v1, %v6723_v36  ;;  %v7883_v13 = vpop.f32.mrb[47].mxu1 }
0x1753   : > { %v6803_v23 = vadd.f32 %v7881_v28, %v6763_v30 }
0x176d   : > { %v7901_v37 = vpop.f32.mrb[48].mxu0 }
0x176e   : > { %v7923_v19 = vpop.f32.mrb[48].mxu1  ;;  %v7902_v20 = vpop.f32.mrb[49].mxu0 }
0x176f   : > { %v7903_v16 = vadd.f32 %v7902_v20, %v7901_v37  ;;  %v7924_v62 = vpop.f32.mrb[49].mxu1  ;;  %v7904_v17 = vpop.f32.mrb[50].mxu0 }
0x1770   : > { %v7925_v24 = vadd.f32 %v7924_v62, %v7923_v19  ;;  %v7926_v18 = vpop.f32.mrb[50].mxu1  ;;  %v7905_v45 = vpop.f32.mrb[51].mxu0 }
0x1771   : > { %v6843_v54 = vadd.f32 %v7903_v16, %v6803_v23  ;;  %v7927_v47 = vpop.f32.mrb[51].mxu1 }
0x1773   : > { %v6883_v48 = vadd.f32 %v7925_v24, %v6843_v54 }
0x1775   : > { %v6888_v49 = vadd.f32 %v6883_v48, %v9430_v22  ;;  %v7511_v22 = vld [vmem:[%s8769_s30 + $0x8] ss:$0 sm:$0xff] }
0x1777   : > { %v6891_v50 = vsel %vm697_vm5, %v6888_v49, 0.0 }
0x1778   : > { %6892 = vadd.xlane.f32.xlu0 %v6891_v50 }
0x1805   : > { %v6893_v35 = vpop.xlane.xlu0 %6892 }
0x1806   : > { %v6894_v10 = vmul.f32 0.03125, %v6893_v35 }
0x1808   : > { %v6895_v51 = vsub.f32 %v6888_v49, %v6894_v10 }
0x180a   : > { %v6896_v11 = vmul.f32 %v6895_v51, %v6895_v51 }
0x180c   : > { %v6897_v52 = vsel %vm697_vm5, %v6896_v11, 0.0 }
0x180d   : > { %6898 = vadd.xlane.f32.xlu0 %v6897_v52 }
0x189a   : > { %v6899_v53 = vpop.xlane.xlu0 %6898 }
0x189b   : > { %v6900_v38 = vmul.f32 0.03125, %v6899_v53 }
0x189d   : > { %v6901_v55 = vadd.f32 1e-05, %v6900_v38 }
0x189f   : > { %8503 = vrsqrt.f32 %v6901_v55 }
0x18a9   : > { %v8504_v57 = vpop.eup %8503 }
0x18aa   : > { %v6903_v40 = vmul.f32 %v8504_v57, %v6895_v51 }
0x18ac   : > { %v6908_v46 = vmul.f32 %v7510_v33, %v6903_v40 }
0x18ae   : > { %v6913_v61 = vadd.f32 %v7511_v22, %v6908_v46 }
0x18b0   : > { %6916 = vst.msk [vmem:[%s8788_s26 - $0x7] sm:$0x80] %vm6915_vm2, %v6913_v61 }
0x18b1 PF: > { %s7512_s0 = sshll.u32 %s8587_s17, 4  ;;  %s9775_s21 = sld [smem:[#allocation16_spill]] }
0x18b2   : > { %s6930_s27 = sshll.u32 %s8788_s26, 4  ;;  %s9776_s28 = sand.u32 1, %s8575_s14   ;;  %s6931_s27 = int_to_ptr.vmem [resolvable:$true] %s6930_s27 }
0x18b3   : > { %s6918_s15 = scalar_lea.sflag [#allocation4], %s9776_s28  ;;  %s8505_s30 = scalar_lea.vmem %s6931_s27, 16 }
0x18b4   : > { %p8506_p4 = scmp.ne.s32.totalorder %s6931_s27, %s8505_s30  ;;  %s8628_s10 = smov [#allocation3]  }
0x18b5   : > { %s8509_s13 = sshll.u32 %s8628_s10, 4  ;;  %s8510_s13 = int_to_ptr.vmem [resolvable:$false] %s8509_s13 }
0x18b6   : > { %p8507_p5 = pnand %p8506_p4, %p8733_p3  ;;  %s8511_s20 = scalar_lea.vmem %s8510_s13, 32 }
0x18b7   : > { %s9690_s19 = scalar_lea.hbm %s9775_s21, %s7512_s0  ;;  %p8512_p7 = scmp.lt.s32.totalorder %s6931_s27, %s8510_s13 }
0x18b8   : > { %p8508_p6 = pneg %p8507_p5  ;;  %p8513_p8 = scmp.lt.s32.totalorder %s8511_s20, %s8505_s30 }
0x18ba   : > { %p8514_p10 = por %p8513_p8, %p8512_p7 }
0x18bc   : > { %p8515_p11 = pnand %p8514_p10, %p8508_p6 }
0x18be   : > { %8518 = shalt.err (!%p8515_p11)
}
0x18bf   : > { %s8519_s17 = scalar_lea.hbm %s9690_s19, 16  ;;  %s8523_s29 = scalar_lea.hbm %s9775_s21, 32 }
0x18c0   : > { %p8520_p12 = scmp.ne.s32.totalorder %s9690_s19, %s8519_s17  ;;  %p8524_p1 = scmp.lt.u32.totalorder %s9690_s19, %s9775_s21 }
0x18c1   : > { %p8525_p2 = scmp.lt.u32.totalorder %s8523_s29, %s8519_s17  ;;  %p8527_p5 = scmp.lt.u32.totalorder %s8519_s17, %s9690_s19 }
0x18c2   : > { %p8521_p13 = pnand %p8520_p12, %p8733_p3 }
0x18c3   : > { %p8526_p4 = por %p8525_p2, %p8524_p1 }
0x18c4   : > { %p8522_p0 = pneg %p8521_p13 }
0x18c5   : > { %p8528_p6 = por %p8527_p5, %p8526_p4 }
0x18c7   : > { %p8529_p7 = pnand %p8528_p6, %p8522_p0 }
0x18c9   : > { %8532 = shalt.err (!%p8529_p7)
}
0x18ca   : > { %8095 = dma.vmem_to_hbm [thread:$0]  (%p8733_p3), %s6931_s27, 16, %s9690_s19, %s6918_s15  }
0x18cb PF: > { %s9777_s12 = sld [smem:[#allocation10_spill]]  ;;  %s9778_s23 = sld [smem:[#allocation6_spill]] }
0x18d1   : > { %p8101_p8 = scmp.ge.s32.totalorder %s9777_s12, 2  ;;  %s6942_s11 = sand.u32 1, %s9778_s23  }
0x18d2   : > { %s6943_s22 = scalar_lea.sflag [#allocation4], %s6942_s11 }
0x18d3   : > { %p8098_p10 = pnand %p8101_p8, %p8743_p9 }
0x18d5   : > { %8566 = dma.done.wait (!%p8098_p10), %s6943_s22, 16  }
0x18d6   : > { %8568 = vsyncadd (!%p8098_p10), %s6943_s22, 4294967280  ;;  %s23_s20 = sadd.s32 1, %s9777_s12   ;;  %s9780_s28 = sld [smem:[#allocation7_spill]] }
0x18d7   : > { %p20_p11 = scmp.ge.s32.totalorder %s23_s20, 6   ;;  %s9781_s15 = sld [smem:[#allocation14_spill]] }
0x18d8   : > { %s9782_s16 = sld [smem:[#allocation8_spill]]  ;;  %s9783_s17 = sld [smem:[#allocation9_spill]] }
0x18d9   : > { %s9784_s18 = sld [smem:[#allocation11_spill]]  ;;  %s9785_s19 = sld [smem:[#allocation12_spill]] }
0x18da   : > { %s9786_s13 = smov %s8575_s14  ;;  %22 = sbr.rel (!%p20_p11) target bundleno = 8 (0x8), region = 131 }
0x18dc   : > { %s9787_s14 = smov %s9780_s28 }
0x18e1   :  { %6947 = vsyncpa [#allocation4], 1 }
0x18e2   :  { %6949 = vsyncpa [#allocation4 + $0x1], 1 }

</bundles_post_ra>
